<compile_context>
chip_gen: v6e
topology: v6e:2x2x1
jax: 0.10.0
libtpu: 0.0.40
codegen_flags: <defaults>
</compile_context>

<pallas_src>
import functools
import math

import jax
import jax.numpy as jnp
import numpy as np
from jax import lax
from jax.experimental import pallas as pl
from jax.experimental.pallas import tpu as pltpu


def _round_up(x, m):
    return ((x + m - 1) // m) * m


def _attention_kernel(x_ref, w_q_ref, b_q_ref, w_k_ref, b_k_ref, out_ref, *,
                      bb, t_pad, t_valid, mask):
    # x_ref   : (bb * t_pad, Din)  -- bb batch elements row-stacked so the
    #                                 projection matmuls feed the MXU with >=128
    #                                 LHS rows instead of tiny per-batch tiles.
    # w_q_ref : (Din, d_model)     fused (W_emb @ W_q) / sqrt(d_model)
    # b_q_ref : (1, d_model)       fused (b_emb @ W_q + b_q) / sqrt(d_model)
    # w_k_ref / b_k_ref            fused K projection (unscaled)
    # out_ref : (bb, t_pad, t_pad) lane-dense padded attention maps.
    x = x_ref[...]

    # Fused projections (embedding matmul + scale already folded in on host).
    q = jnp.dot(x, w_q_ref[...], preferred_element_type=jnp.float32,
                precision=lax.Precision.HIGHEST) + b_q_ref[...]
    k = jnp.dot(x, w_k_ref[...], preferred_element_type=jnp.float32,
                precision=lax.Precision.HIGHEST) + b_k_ref[...]

    col = lax.broadcasted_iota(jnp.int32, (t_pad, t_pad), 1)
    key_valid = col < t_valid
    if mask:
        row = lax.broadcasted_iota(jnp.int32, (t_pad, t_pad), 0)
        causal = row >= col

    for b in range(bb):  # static unroll, bb is small
        qb = q[b * t_pad:(b + 1) * t_pad, :]              # (t_pad, d_model)
        kb = k[b * t_pad:(b + 1) * t_pad, :]
        # QK^T without materializing k.T: contract the last dim of both operands.
        logits = lax.dot_general(qb, kb, (((1,), (1,)), ((), ())),
                                 preferred_element_type=jnp.float32,
                                 precision=lax.Precision.HIGHEST)
        # Padded key columns must not contribute to the softmax.
        logits = jnp.where(key_valid, logits, -jnp.inf)
        logits = logits - jnp.max(logits, axis=-1, keepdims=True)
        p = jnp.exp(logits)
        # Exact reciprocal: the approx EUP path costs ~3e-3 relative error,
        # which is visible in the final attention weights.
        attn = p / jnp.sum(p, axis=-1, keepdims=True)
        if mask:
            # NOTE: matches PyTorch module -- tril applied AFTER softmax.
            attn = jnp.where(causal, attn, 0.0)
        out_ref[b] = attn.astype(out_ref.dtype)


def self_attention(x, params, *, mask=False):
    """x: (B, T, in_dims) float32.  Returns attention map (B, T, T) float32."""
    B, T, Din = x.shape
    d_model = params["w_q"].shape[0]
    scale = 1.0 / math.sqrt(float(d_model))

    # Host-side weight fusion: eliminate the Din->d_model embedding matmul and
    # the logits scale from the kernel entirely.
    w_q_f = (params["w_emb"] @ params["w_q"]) * scale
    b_q_f = (params["b_emb"] @ params["w_q"] + params["b_q"]) * scale
    w_k_f = params["w_emb"] @ params["w_k"]
    b_k_f = params["b_emb"] @ params["w_k"] + params["b_k"]

    # Lane-dense output: pad the sequence dim to a multiple of 128 so the
    # attention-map stores are full-width vst instead of masked partial stores.
    t_pad = _round_up(T, 128)
    x_p = jnp.pad(x, ((0, 0), (0, t_pad - T), (0, 0)))
    x2 = x_p.reshape(B * t_pad, Din)          # row-stack batches for the MXU

    # One grid step handles bb batch elements (single step at test sizes) to
    # avoid per-grid-step dispatch overhead dominating tiny work.
    bb = B if B <= 8 else math.gcd(B, 8)
    grid = (B // bb,)

    kernel = functools.partial(_attention_kernel, bb=bb, t_pad=t_pad,
                               t_valid=T, mask=mask)

    out_p = pl.pallas_call(
        kernel,
        out_shape=jax.ShapeDtypeStruct((B, t_pad, t_pad), jnp.float32),
        grid=grid,
        in_specs=[
            pl.BlockSpec((bb * t_pad, Din), lambda g: (g, 0)),   # stacked x
            pl.BlockSpec((Din, d_model), lambda g: (0, 0)),      # fused W_q
            pl.BlockSpec((1, d_model), lambda g: (0, 0)),        # fused b_q
            pl.BlockSpec((Din, d_model), lambda g: (0, 0)),      # fused W_k
            pl.BlockSpec((1, d_model), lambda g: (0, 0)),        # fused b_k
        ],
        out_specs=pl.BlockSpec((bb, t_pad, t_pad), lambda g: (g, 0, 0)),
        compiler_params=pltpu.CompilerParams(
            dimension_semantics=("parallel",)),
    )(x2, w_q_f, b_q_f, w_k_f, b_k_f)

    # Strip the lane padding outside the kernel.
    return out_p[:, :T, :T]


def init_params(key, in_dims=2, d_model=64):
    """Deterministic Linear-layer params (uniform, PyTorch-style fan-in bound)."""
    ks = jax.random.split(key, 6)

    def lin(kw, kb, fan_in, fan_out):
        bound = 1.0 / math.sqrt(fan_in)
        w = jax.random.uniform(kw, (fan_in, fan_out), jnp.float32, -bound, bound)
        b = jax.random.uniform(kb, (1, fan_out), jnp.float32, -bound, bound)
        return w, b

    w_emb, b_emb = lin(ks[0], ks[1], in_dims, d_model)
    w_q, b_q = lin(ks[2], ks[3], d_model, d_model)
    w_k, b_k = lin(ks[4], ks[5], d_model, d_model)
    return dict(w_emb=w_emb, b_emb=b_emb, w_q=w_q, b_q=b_q, w_k=w_k, b_k=b_k)


def _reference(x, params, scale_den):
    # Unfused reference (validates the host-side weight fusion as well).
    emb = x @ params["w_emb"] + params["b_emb"]
    q = emb @ params["w_q"] + params["b_q"]
    k = emb @ params["w_k"] + params["b_k"]
    att = jnp.einsum("btd,bsd->bts", q, k,
                     precision=lax.Precision.HIGHEST) / scale_den
    return jax.nn.softmax(att, axis=-1)


if __name__ == "__main__":
    B, T, IN_DIMS, D_MODEL = 2, 8, 2, 64

    key = jax.random.PRNGKey(0)
    k_x, k_p = jax.random.split(key)
    x = jax.random.normal(k_x, (B, T, IN_DIMS), jnp.float32)
    params = init_params(k_p, in_dims=IN_DIMS, d_model=D_MODEL)

    out = self_attention(x, params, mask=False)
    out = jax.block_until_ready(out)
    ref = _reference(x, params, math.sqrt(float(D_MODEL)))
    assert out.shape == (B, T, T)
    np.testing.assert_allclose(np.asarray(out), np.asarray(ref),
                               rtol=5e-4, atol=1e-6)

    # Masked path (tril applied after softmax, matching the PyTorch module).
    out_m = jax.block_until_ready(self_attention(x, params, mask=True))
    tril = np.tril(np.ones((T, T), np.float32))
    np.testing.assert_allclose(np.asarray(out_m), np.asarray(ref) * tril,
                               rtol=5e-4, atol=1e-6)

    print("KERNEL_OK")
</pallas_src>

<mosaic_0001>
module attributes {stable_mosaic.version = 11 : i64} {
  func.func @_attention_kernel(%arg0: i32, %arg1: memref<256x2xf32, #tpu.memory_space<vmem>>, %arg2: memref<2x64xf32, #tpu.memory_space<vmem>>, %arg3: memref<1x64xf32, #tpu.memory_space<vmem>>, %arg4: memref<2x64xf32, #tpu.memory_space<vmem>>, %arg5: memref<1x64xf32, #tpu.memory_space<vmem>>, %arg6: memref<2x128x128xf32, #tpu.memory_space<vmem>>) attributes {dimension_semantics = [#tpu.dimension_semantics<parallel>], iteration_bounds = array<i64: 1>, scalar_prefetch = 0 : i64, scratch_operands = 0 : i64, tpu.core_type = #tpu.core_type<tc>, window_params = [{transform_indices = @transform_0, window_bounds = array<i64: 256, 2>}, {pipeline_mode = #tpu.pipeline_mode<synchronous>, transform_indices = @transform_1, window_bounds = array<i64: 2, 64>}, {pipeline_mode = #tpu.pipeline_mode<synchronous>, transform_indices = @transform_2, window_bounds = array<i64: 1, 64>}, {pipeline_mode = #tpu.pipeline_mode<synchronous>, transform_indices = @transform_3, window_bounds = array<i64: 2, 64>}, {pipeline_mode = #tpu.pipeline_mode<synchronous>, transform_indices = @transform_4, window_bounds = array<i64: 1, 64>}, {transform_indices = @transform_5, window_bounds = array<i64: 2, 128, 128>}]} {
    %c0 = arith.constant 0 : index
    %c0_0 = arith.constant 0 : index
    %0 = vector.load %arg1[%c0, %c0_0] : memref<256x2xf32, #tpu.memory_space<vmem>>, vector<256x2xf32>
    %c0_1 = arith.constant 0 : index
    %c0_2 = arith.constant 0 : index
    %1 = vector.load %arg2[%c0_1, %c0_2] : memref<2x64xf32, #tpu.memory_space<vmem>>, vector<2x64xf32>
    %cst = arith.constant dense<0.000000e+00> : vector<256x64xf32>
    %2 = tpu.matmul %0, %1, %cst {dimension_numbers = #tpu.dot_dimension_numbers<[1], [0], [0], [1], [0, 0, 1, 1], [], []>, precision = #tpu.contract_precision<fp32>} : vector<256x2xf32>, vector<2x64xf32>, vector<256x64xf32> -> vector<256x64xf32>
    %c0_3 = arith.constant 0 : index
    %c0_4 = arith.constant 0 : index
    %3 = vector.load %arg3[%c0_3, %c0_4] : memref<1x64xf32, #tpu.memory_space<vmem>>, vector<1x64xf32>
    %4 = vector.broadcast %3 : vector<1x64xf32> to vector<256x64xf32>
    %5 = arith.addf %2, %4 : vector<256x64xf32>
    %c0_5 = arith.constant 0 : index
    %c0_6 = arith.constant 0 : index
    %6 = vector.load %arg4[%c0_5, %c0_6] : memref<2x64xf32, #tpu.memory_space<vmem>>, vector<2x64xf32>
    %cst_7 = arith.constant dense<0.000000e+00> : vector<256x64xf32>
    %7 = tpu.matmul %0, %6, %cst_7 {dimension_numbers = #tpu.dot_dimension_numbers<[1], [0], [0], [1], [0, 0, 1, 1], [], []>, precision = #tpu.contract_precision<fp32>} : vector<256x2xf32>, vector<2x64xf32>, vector<256x64xf32> -> vector<256x64xf32>
    %c0_8 = arith.constant 0 : index
    %c0_9 = arith.constant 0 : index
    %8 = vector.load %arg5[%c0_8, %c0_9] : memref<1x64xf32, #tpu.memory_space<vmem>>, vector<1x64xf32>
    %9 = vector.broadcast %8 : vector<1x64xf32> to vector<256x64xf32>
    %10 = arith.addf %7, %9 : vector<256x64xf32>
    %11 = tpu.iota {dimensions = array<i32: 1>} : vector<128x128xi32>
    %c8_i32 = arith.constant 8 : i32
    %12 = vector.broadcast %c8_i32 : i32 to vector<128x128xi32>
    %13 = arith.cmpi slt, %11, %12 : vector<128x128xi32>
    %14 = vector.extract_strided_slice %5 {offsets = [0, 0], sizes = [128, 64], strides = [1, 1]} : vector<256x64xf32> to vector<128x64xf32>
    %15 = vector.extract_strided_slice %10 {offsets = [0, 0], sizes = [128, 64], strides = [1, 1]} : vector<256x64xf32> to vector<128x64xf32>
    %cst_10 = arith.constant dense<0.000000e+00> : vector<128x128xf32>
    %16 = tpu.matmul %14, %15, %cst_10 {dimension_numbers = #tpu.dot_dimension_numbers<[1], [1], [0], [0], [0, 0, 1, 0], [], []>, precision = #tpu.contract_precision<fp32>} : vector<128x64xf32>, vector<128x64xf32>, vector<128x128xf32> -> vector<128x128xf32>
    %cst_11 = arith.constant 0xFF800000 : f32
    %17 = vector.broadcast %cst_11 : f32 to vector<128x128xf32>
    %18 = arith.select %13, %16, %17 : vector<128x128xi1>, vector<128x128xf32>
    %cst_12 = arith.constant dense<0xFF800000> : vector<128xf32>
    %19 = vector.multi_reduction <maximumf>, %18, %cst_12 [1] : vector<128x128xf32> to vector<128xf32>
    %20 = vector.shape_cast %19 : vector<128xf32> to vector<128x1xf32>
    %21 = vector.broadcast %20 : vector<128x1xf32> to vector<128x128xf32>
    %22 = arith.subf %18, %21 : vector<128x128xf32>
    %23 = math.exp %22 : vector<128x128xf32>
    %cst_13 = arith.constant dense<0.000000e+00> : vector<128xf32>
    %24 = vector.multi_reduction <add>, %23, %cst_13 [1] : vector<128x128xf32> to vector<128xf32>
    %25 = vector.shape_cast %24 : vector<128xf32> to vector<128x1xf32>
    %26 = vector.broadcast %25 : vector<128x1xf32> to vector<128x128xf32>
    %27 = arith.divf %23, %26 : vector<128x128xf32>
    %c0_14 = arith.constant 0 : index
    %c0_15 = arith.constant 0 : index
    %c0_16 = arith.constant 0 : index
    %28 = vector.load %arg6[%c0_14, %c0_15, %c0_16] : memref<2x128x128xf32, #tpu.memory_space<vmem>>, vector<1x128x128xf32>
    %29 = vector.shape_cast %28 : vector<1x128x128xf32> to vector<128x128xf32>
    %30 = vector.shape_cast %27 : vector<128x128xf32> to vector<1x128x128xf32>
    tpu.vector_store %arg6[%c0_14, %c0_15, %c0_16], %30 {strides = array<i32>} : memref<2x128x128xf32, #tpu.memory_space<vmem>>, vector<1x128x128xf32>,
    %31 = vector.extract_strided_slice %5 {offsets = [128, 0], sizes = [128, 64], strides = [1, 1]} : vector<256x64xf32> to vector<128x64xf32>
    %32 = vector.extract_strided_slice %10 {offsets = [128, 0], sizes = [128, 64], strides = [1, 1]} : vector<256x64xf32> to vector<128x64xf32>
    %cst_17 = arith.constant dense<0.000000e+00> : vector<128x128xf32>
    %33 = tpu.matmul %31, %32, %cst_17 {dimension_numbers = #tpu.dot_dimension_numbers<[1], [1], [0], [0], [0, 0, 1, 0], [], []>, precision = #tpu.contract_precision<fp32>} : vector<128x64xf32>, vector<128x64xf32>, vector<128x128xf32> -> vector<128x128xf32>
    %cst_18 = arith.constant 0xFF800000 : f32
    %34 = vector.broadcast %cst_18 : f32 to vector<128x128xf32>
    %35 = arith.select %13, %33, %34 : vector<128x128xi1>, vector<128x128xf32>
    %cst_19 = arith.constant dense<0xFF800000> : vector<128xf32>
    %36 = vector.multi_reduction <maximumf>, %35, %cst_19 [1] : vector<128x128xf32> to vector<128xf32>
    %37 = vector.shape_cast %36 : vector<128xf32> to vector<128x1xf32>
    %38 = vector.broadcast %37 : vector<128x1xf32> to vector<128x128xf32>
    %39 = arith.subf %35, %38 : vector<128x128xf32>
    %40 = math.exp %39 : vector<128x128xf32>
    %cst_20 = arith.constant dense<0.000000e+00> : vector<128xf32>
    %41 = vector.multi_reduction <add>, %40, %cst_20 [1] : vector<128x128xf32> to vector<128xf32>
    %42 = vector.shape_cast %41 : vector<128xf32> to vector<128x1xf32>
    %43 = vector.broadcast %42 : vector<128x1xf32> to vector<128x128xf32>
    %44 = arith.divf %40, %43 : vector<128x128xf32>
    %c1 = arith.constant 1 : index
    %c0_21 = arith.constant 0 : index
    %c0_22 = arith.constant 0 : index
    %45 = vector.load %arg6[%c1, %c0_21, %c0_22] : memref<2x128x128xf32, #tpu.memory_space<vmem>>, vector<1x128x128xf32>
    %46 = vector.shape_cast %45 : vector<1x128x128xf32> to vector<128x128xf32>
    %47 = vector.shape_cast %44 : vector<128x128xf32> to vector<1x128x128xf32>
    tpu.vector_store %arg6[%c1, %c0_21, %c0_22], %47 {strides = array<i32>} : memref<2x128x128xf32, #tpu.memory_space<vmem>>, vector<1x128x128xf32>,
    return
  }
  func.func @transform_0(%arg0: i32) -> (i32, i32) {
    %c0_i32 = arith.constant 0 : i32
    %c0_i32_0 = arith.constant 0 : i32
    return %arg0, %c0_i32 : i32, i32
  }
  func.func @transform_1(%arg0: i32) -> (i32, i32) {
    %c0_i32 = arith.constant 0 : i32
    %c0_i32_0 = arith.constant 0 : i32
    %c0_i32_1 = arith.constant 0 : i32
    return %c0_i32, %c0_i32_0 : i32, i32
  }
  func.func @transform_2(%arg0: i32) -> (i32, i32) {
    %c0_i32 = arith.constant 0 : i32
    %c0_i32_0 = arith.constant 0 : i32
    %c0_i32_1 = arith.constant 0 : i32
    return %c0_i32, %c0_i32_0 : i32, i32
  }
  func.func @transform_3(%arg0: i32) -> (i32, i32) {
    %c0_i32 = arith.constant 0 : i32
    %c0_i32_0 = arith.constant 0 : i32
    %c0_i32_1 = arith.constant 0 : i32
    return %c0_i32, %c0_i32_0 : i32, i32
  }
  func.func @transform_4(%arg0: i32) -> (i32, i32) {
    %c0_i32 = arith.constant 0 : i32
    %c0_i32_0 = arith.constant 0 : i32
    %c0_i32_1 = arith.constant 0 : i32
    return %c0_i32, %c0_i32_0 : i32, i32
  }
  func.func @transform_5(%arg0: i32) -> (i32, i32, i32) {
    %c0_i32 = arith.constant 0 : i32
    %c0_i32_0 = arith.constant 0 : i32
    %c0_i32_1 = arith.constant 0 : i32
    return %arg0, %c0_i32, %c0_i32_0 : i32, i32, i32
  }
}

</mosaic_0001>

<bundles_post_ra>
// kernel: tpu_custom_call.1
= control target key start
LH: loop header
LB: loop body
LE: loop exit
PB: predicated region body
PF: predicated region fallthrough
CT: control target
= control target key end

     0   :  { %vm158_vm0 = vcmask 1041408   ;;  %vm61_vm1 = vcmask 15360   ;;  %s12723_s0 = inlined_call_operand.vmem [shape: f32[256,2], index: 0, kind: input, shape index: {}]   ;;  %s12724_s1 = inlined_call_operand.vmem [shape: f32[2,64], index: 1, kind: input, shape index: {}]   ;;  %s12725_s2 = inlined_call_operand.vmem [shape: f32[1,64], index: 2, kind: input, shape index: {}]   ;;  %s12726_s3 = inlined_call_operand.vmem [shape: f32[2,64], index: 3, kind: input, shape index: {}]   ;;  %s12727_s4 = inlined_call_operand.vmem [shape: f32[1,64], index: 4, kind: input, shape index: {}]   ;;  %s12728_s5 = inlined_call_operand.hbm [shape: f32[2,128,128], index: 5, kind: output, shape index: {}]  }
   0x1   :  { %v53_v0 = vld [vmem:[%s12724_s1] sm:$0x3]  ;;  %v22_v2 = vld [vmem:[%s12723_s0 + $0x8] sm:$0xff]  ;;  %v23_v6 = vld [vmem:[%s12723_s0 + $0x10] sm:$0xff] }
   0x2   :  { %v21_v1 = vld [vmem:[%s12723_s0] sm:$0xff]  ;;  %v160_v3 = vsel %vm158_vm0, %v53_v0, 0  ;;  %v66_v5 = vsel %vm61_vm1, %v22_v2, 0  ;;  %v24_v7 = vld [vmem:[%s12723_s0 + $0x18] sm:$0xff]  ;;  %v69_v12 = vsel %vm61_vm1, %v23_v6, 0  ;;  %v26_v13 = vld [vmem:[%s12723_s0 + $0x28] sm:$0xff] }
   0x3   :  { %v63_v4 = vsel %vm61_vm1, %v21_v1, 0  ;;  %v25_v8 = vld [vmem:[%s12723_s0 + $0x20] sm:$0xff]  ;;  %v9130_v9 = vand.u32 4294901760, %v160_v3  ;;  %v9134_v11 = vand.u32 4294901760, %v66_v5  ;;  %v27_v14 = vld [vmem:[%s12723_s0 + $0x30] sm:$0xff]  ;;  %v9143_v15 = vand.u32 4294901760, %v69_v12 }
   0x4   :  { %v9132_v10 = vand.u32 4294901760, %v63_v4  ;;  %v72_v16 = vsel %vm61_vm1, %v24_v7, 0  ;;  %v75_v17 = vsel %vm61_vm1, %v25_v8, 0  ;;  %v78_v18 = vsel %vm61_vm1, %v26_v13, 0  ;;  %v28_v43 = vld [vmem:[%s12723_s0 + $0x38] sm:$0xff]  ;;  %v29_v44 = vld [vmem:[%s12723_s0 + $0x40] sm:$0xff] }
   0x5   :  { %13042 = vst [vmem:[#allocation6_spill] sm:$0xff] %v9134_v11  ;;  %13043 = vst [vmem:[#allocation7_spill] sm:$0xff] %v9143_v15  ;;  %7650 = vmatprep.subr.mxu0 %v9130_v9  ;;  %v580_v20 = vsub.f32 %v160_v3, %v9130_v9  ;;  %v9154_v21 = vsub.f32 %v66_v5, %v9134_v11  ;;  %v9157_v22 = vand.u32 4294901760, %v72_v16  ;;  %v9163_v24 = vand.u32 4294901760, %v75_v17  ;;  %v30_v45 = vld [vmem:[%s12723_s0 + $0x48] sm:$0xff]  ;;  %v31_v54 = vld [vmem:[%s12723_s0 + $0x50] sm:$0xff] }
   0x6   :  { %13041 = vst [vmem:[#allocation5_spill] sm:$0xff] %v9132_v10  ;;  %v9150_v19 = vsub.f32 %v63_v4, %v9132_v10  ;;  %7702 = vmatprep.mubr.f32.mxu1 %v9132_v10  ;;  %7651 = vmatpush3.msra.mxu0 %v9130_v9  ;;  %v9161_v23 = vsub.f32 %v69_v12, %v9143_v15  ;;  %v9165_v25 = vand.u32 4294901760, %v78_v18  ;;  %v81_v26 = vsel %vm61_vm1, %v27_v14, 0  ;;  %v32_v55 = vld [vmem:[%s12723_s0 + $0x58] sm:$0xff] }
   0x7   :  { %13044 = vst [vmem:[#allocation8_spill] sm:$0xff] %v9157_v22  ;;  %13045 = vst [vmem:[#allocation9_spill] sm:$0xff] %v9163_v24  ;;  %v9171_v28 = vand.u32 4294901760, %v580_v20  ;;  %7750 = vmatprep.subr.mxu0 %v580_v20  ;;  %v9174_v29 = vand.u32 4294901760, %v9154_v21  ;;  %v9177_v30 = vsub.f32 %v72_v16, %v9157_v22  ;;  %v9183_v32 = vsub.f32 %v75_v17, %v9163_v24 }
   0x8   :  { %13046 = vst [vmem:[#allocation10_spill] sm:$0xff] %v9165_v25  ;;  %v9169_v27 = vand.u32 4294901760, %v9150_v19  ;;  %v9180_v31 = vand.u32 4294901760, %v9161_v23  ;;  %v9186_v33 = vsub.f32 %v78_v18, %v9165_v25  ;;  %v9188_v34 = vand.u32 4294901760, %v81_v26 }
   0x9   :  { %v582_v36 = vsub.f32 %v580_v20, %v9171_v28  ;;  %v241_v37 = vsub.f32 %v9154_v21, %v9174_v29  ;;  %v9196_v38 = vand.u32 4294901760, %v9177_v30  ;;  %v9201_v40 = vand.u32 4294901760, %v9183_v32 }
   0xa   :  { %13047 = vst [vmem:[#allocation11_spill] sm:$0xff] %v9188_v34  ;;  %v231_v35 = vsub.f32 %v9150_v19, %v9169_v27  ;;  %v251_v39 = vsub.f32 %v9161_v23, %v9180_v31  ;;  %v9204_v41 = vand.u32 4294901760, %v9186_v33  ;;  %v9207_v42 = vsub.f32 %v81_v26, %v9188_v34 }
   0xb   :  { %v583_v47 = vand.u32 4294901760, %v582_v36  ;;  %v9220_v48 = vand.u32 4294901760, %v241_v37  ;;  %v261_v49 = vsub.f32 %v9177_v30, %v9196_v38  ;;  %v271_v51 = vsub.f32 %v9183_v32, %v9201_v40 }
   0xc   :  { %13048 = vst [vmem:[#allocation12_spill] sm:$0xff] %v9207_v42  ;;  %v9218_v46 = vand.u32 4294901760, %v231_v35  ;;  %v9224_v50 = vand.u32 4294901760, %v251_v39  ;;  %v281_v52 = vsub.f32 %v9186_v33, %v9204_v41  ;;  %v9231_v53 = vand.u32 4294901760, %v9207_v42 }
   0xd   :  { %13050 = vst [vmem:[#allocation14_spill] sm:$0xff] %v9220_v48  ;;  %7700 = vmatprep.subr.mxu1 %v583_v47  ;;  %v9240_v56 = vand.u32 4294901760, %v261_v49  ;;  %v84_v57 = vsel %vm61_vm1, %v28_v43, 0  ;;  %v87_v58 = vsel %vm61_vm1, %v29_v44, 0  ;;  %v90_v59 = vsel %vm61_vm1, %v30_v45, 0 }
   0xe   :  { %13049 = vst [vmem:[#allocation13_spill] sm:$0xff] %v9218_v46  ;;  %13051 = vst [vmem:[#allocation15_spill] sm:$0xff] %v9224_v50  ;;  %7652 = vmatprep.mubr.f32.mxu0 %v9218_v46 }
   0xf   :  { %13052 = vst [vmem:[#allocation16_spill] sm:$0xff] %v9231_v53  ;;  %13053 = vst [vmem:[#allocation17_spill] sm:$0xff] %v9240_v56 }
  0x10   :  { %10 = vsyncpa [#allocation3], 0  ;;  %7653 = vmatmul.mubr.f32.vlgmr.msra.gmra.mxu0 %v9220_v48  ;;  %7701 = vmatpush3.msra.mxu1 %v583_v47  ;;  %v9246_v60 = vand.u32 4294901760, %v271_v51  ;;  %v9248_v61 = vand.u32 4294901760, %v281_v52  ;;  %v291_v62 = vsub.f32 %v9207_v42, %v9231_v53  ;;  %v9252_v63 = vand.u32 4294901760, %v84_v57  ;;  %v33_v0 = vld [vmem:[%s12723_s0 + $0x60] sm:$0xff] }
  0x11   :  { %v34_v1 = vld [vmem:[%s12723_s0 + $0x68] sm:$0xff]  ;;  %7751 = vmatpush3.msra.mxu0 %v580_v20  ;;  %7703 = vmatmul.mubr.f32.vlgmr.msra.gmra.mxu1 %v9134_v11  ;;  %v9261_v2 = vand.u32 4294901760, %v87_v58  ;;  %v9263_v3 = vand.u32 4294901760, %v90_v59  ;;  %v93_v4 = vsel %vm61_vm1, %v31_v54, 0  ;;  %v96_v5 = vsel %vm61_vm1, %v32_v55, 0  ;;  %v35_v13 = vld [vmem:[%s12723_s0 + $0x70] sm:$0xff] }
  0x12   :  { %13054 = vst [vmem:[#allocation18_spill] sm:$0xff] %v9246_v60  ;;  %13055 = vst [vmem:[#allocation19_spill] sm:$0xff] %v9248_v61  ;;  %7800 = vmatprep.subr.mxu1 %v9130_v9  ;;  %7655 = vmatprep.mubr.f32.mxu0 %v9224_v50  ;;  %v9269_v6 = vand.u32 4294901760, %v291_v62  ;;  %v9272_v7 = vsub.f32 %v84_v57, %v9252_v63  ;;  %v9274_v8 = vand.u32 4294901760, %v93_v4  ;;  %v9276_v12 = vand.u32 4294901760, %v96_v5  ;;  %v36_v57 = vld [vmem:[%s12723_s0 + $0x78] sm:$0xff] }
  0x13   :  { %13056 = vst [vmem:[#allocation20_spill] sm:$0xff] %v9252_v63  ;;  %13057 = vst [vmem:[#allocation21_spill] sm:$0xff] %v9261_v2  ;;  %7801 = vmatpush3.msra.mxu1 %v9130_v9  ;;  %7705 = vmatprep.mubr.f32.mxu1 %v9143_v15  ;;  %v9284_v14 = vsub.f32 %v87_v58, %v9261_v2  ;;  %v9287_v16 = vsub.f32 %v90_v59, %v9263_v3  ;;  %v99_v17 = vsel %vm61_vm1, %v33_v0, 0  ;;  %v37_v62 = vld [vmem:[%s12723_s0 + $0x80] sm:$0xff]  ;;  %vm3734_vm2 = vcmask 523264  }
  0x14   :  { %13058 = vst [vmem:[#allocation22_spill] sm:$0xff] %v9263_v3  ;;  %13059 = vst [vmem:[#allocation23_spill] sm:$0xff] %v9269_v6  ;;  %v102_v18 = vsel %vm61_vm1, %v34_v1, 0  ;;  %7656 = vmatmul.mubr.f32.gmra.mxu0 %v9240_v56  ;;  %v9293_v20 = vand.u32 4294901760, %v9272_v7  ;;  %v9296_v26 = vsub.f32 %v93_v4, %v9274_v8  ;;  %v9299_v35 = vsub.f32 %v96_v5, %v9276_v12  ;;  %v41_v56 = vld [vmem:[%s12723_s0 + $0xa0] sm:$0xff] }
  0x15   :  { %13060 = vst [vmem:[#allocation24_spill] sm:$0xff] %v9272_v7  ;;  %13061 = vst [vmem:[#allocation25_spill] sm:$0xff] %v9274_v8  ;;  %v9301_v36 = vand.u32 4294901760, %v99_v17  ;;  %7850 = vmatprep.subr.mxu0 %v9171_v28  ;;  %7706 = vmatmul.mubr.f32.gmra.mxu1 %v9157_v22  ;;  %v9307_v37 = vand.u32 4294901760, %v9284_v14  ;;  %v9310_v39 = vand.u32 4294901760, %v9287_v16  ;;  %v9312_v43 = vand.u32 4294901760, %v102_v18 }
  0x16   :  { %13062 = vst [vmem:[#allocation26_spill] sm:$0xff] %v9276_v12  ;;  %13063 = vst [vmem:[#allocation27_spill] sm:$0xff] %v9284_v14  ;;  %7658 = vmatprep.mubr.f32.mxu0 %v9246_v60  ;;  %v105_v44 = vsel %vm61_vm1, %v35_v13, 0  ;;  %7708 = vmatprep.mubr.f32.mxu1 %v9163_v24  ;;  %v301_v45 = vsub.f32 %v9272_v7, %v9293_v20  ;;  %v9319_v47 = vand.u32 4294901760, %v9296_v26  ;;  %v9322_v49 = vand.u32 4294901760, %v9299_v35  ;;  %v38_v13 = vld [vmem:[%s12723_s0 + $0x88] sm:$0xff] }
  0x17   :  { %13064 = vst [vmem:[#allocation28_spill] sm:$0xff] %v9287_v16  ;;  %13065 = vst [vmem:[#allocation29_spill] sm:$0xff] %v9293_v20  ;;  %v9325_v51 = vsub.f32 %v99_v17, %v9301_v36  ;;  %7900 = vmatprep.subr.mxu1 %v9130_v9  ;;  %v311_v52 = vsub.f32 %v9284_v14, %v9307_v37  ;;  %v9331_v54 = vsub.f32 %v102_v18, %v9312_v43  ;;  %v39_v17 = vld [vmem:[%s12723_s0 + $0x90] sm:$0xff]  ;;  %v40_v60 = vld [vmem:[%s12723_s0 + $0x98] sm:$0xff] }
  0x18   :  { %13066 = vst [vmem:[#allocation30_spill] sm:$0xff] %v9296_v26  ;;  %13067 = vst [vmem:[#allocation31_spill] sm:$0xff] %v9299_v35  ;;  %v9333_v55 = vand.u32 4294901760, %v105_v44  ;;  %7659 = vmatmul.mubr.f32.gmra.mxu0 %v9248_v61  ;;  %v9339_v58 = vand.u32 4294901760, %v301_v45  ;;  %v321_v59 = vsub.f32 %v9287_v16, %v9310_v39  ;;  %v331_v1 = vsub.f32 %v9296_v26, %v9319_v47 }
  0x19   :  { %13068 = vst [vmem:[#allocation32_spill] sm:$0xff] %v9301_v36  ;;  %13069 = vst [vmem:[#allocation33_spill] sm:$0xff] %v9307_v37  ;;  %7709 = vmatmul.mubr.f32.gmra.mxu1 %v9165_v25  ;;  %7661 = vmatprep.mubr.f32.mxu0 %v9269_v6  ;;  %v9348_v0 = vand.u32 4294901760, %v311_v52  ;;  %v9353_v4 = vand.u32 4294901760, %v9325_v51  ;;  %v341_v18 = vsub.f32 %v9299_v35, %v9322_v49  ;;  %v108_v45 = vsel %vm61_vm1, %v36_v57, 0 }
  0x1a   :  { %13070 = vst [vmem:[#allocation34_spill] sm:$0xff] %v9310_v39  ;;  %13071 = vst [vmem:[#allocation35_spill] sm:$0xff] %v9312_v43  ;;  %v9356_v5 = vsub.f32 %v105_v44, %v9333_v55  ;;  %7711 = vmatprep.mubr.f32.mxu1 %v9188_v34  ;;  %v9369_v52 = vand.u32 4294901760, %v9331_v54  ;;  %v9374_v6 = vand.u32 4294901760, %v108_v45  ;;  %v111_v61 = vsel %vm61_vm1, %v37_v62, 0 }
  0x1b   :  { %13072 = vst [vmem:[#allocation36_spill] sm:$0xff] %v9319_v47  ;;  %13073 = vst [vmem:[#allocation37_spill] sm:$0xff] %v9322_v49  ;;  %v9384_v57 = vand.u32 4294901760, %v321_v59  ;;  %v9386_v50 = vand.u32 4294901760, %v111_v61  ;;  %v114_v48 = vsel %vm61_vm1, %v38_v13, 0  ;;  %v117_v46 = vsel %vm61_vm1, %v39_v17, 0 }
  0x1c   :  { %13074 = vst [vmem:[#allocation38_spill] sm:$0xff] %v9325_v51  ;;  %13075 = vst [vmem:[#allocation39_spill] sm:$0xff] %v9331_v54  ;;  %v9372_v44 = vand.u32 4294901760, %v9356_v5  ;;  %7662 = vmatmul.mubr.f32.gmra.mxu0 %v9339_v58  ;;  %v9392_v62 = vand.u32 4294901760, %v331_v1  ;;  %v351_v34 = vsub.f32 %v9325_v51, %v9353_v4  ;;  %v9397_v25 = vsub.f32 %v108_v45, %v9374_v6  ;;  %v42_v13 = vld [vmem:[%s12723_s0 + $0xa8] sm:$0xff] }
  0x1d   :  { %13076 = vst [vmem:[#allocation40_spill] sm:$0xff] %v9333_v55  ;;  %13077 = vst [vmem:[#allocation41_spill] sm:$0xff] %v9339_v58  ;;  %7712 = vmatmul.mubr.f32.gmra.mxu1 %v9252_v63  ;;  %7664 = vmatprep.mubr.f32.mxu0 %v9348_v0  ;;  %v9399_v59 = vand.u32 4294901760, %v114_v48  ;;  %v9406_v17 = vsub.f32 %v111_v61, %v9386_v50  ;;  %v120_v1 = vsel %vm61_vm1, %v40_v60, 0  ;;  %v123_v58 = vsel %vm61_vm1, %v41_v56, 0 }
  0x1e   :  { %13078 = vst [vmem:[#allocation42_spill] sm:$0xff] %v9348_v0  ;;  %13079 = vst [vmem:[#allocation43_spill] sm:$0xff] %v9353_v4  ;;  %7714 = vmatprep.mubr.f32.mxu1 %v9261_v2  ;;  %v9408_v0 = vand.u32 4294901760, %v117_v46  ;;  %v9412_v63 = vand.u32 4294901760, %v341_v18  ;;  %v361_v45 = vsub.f32 %v9331_v54, %v9369_v52  ;;  %v371_v24 = vsub.f32 %v9356_v5, %v9372_v44  ;;  %v43_v2 = vld [vmem:[%s12723_s0 + $0xb0] sm:$0xff] }
  0x1f   :  { %13080 = vst [vmem:[#allocation44_spill] sm:$0xff] %v9356_v5  ;;  %13081 = vst [vmem:[#allocation45_spill] sm:$0xff] %v9369_v52  ;;  %v9423_v61 = vand.u32 4294901760, %v9397_v25  ;;  %v9426_v60 = vsub.f32 %v114_v48, %v9399_v59  ;;  %v9428_v56 = vand.u32 4294901760, %v120_v1  ;;  %v126_v18 = vsel %vm61_vm1, %v42_v13, 0  ;;  %v44_v13 = vld [vmem:[%s12723_s0 + $0xb8] sm:$0xff] }
  0x20   :  { %13082 = vst [vmem:[#allocation46_spill] sm:$0xff] %v9372_v44  ;;  %13083 = vst [vmem:[#allocation47_spill] sm:$0xff] %v9374_v6  ;;  %7665 = vmatmul.mubr.f32.gmra.mxu0 %v9384_v57  ;;  %v9433_v22 = vand.u32 4294901760, %v351_v34  ;;  %v9436_v15 = vand.u32 4294901760, %v9406_v17  ;;  %v9441_v11 = vand.u32 4294901760, %v123_v58  ;;  %v129_v48 = vsel %vm61_vm1, %v43_v2, 0 }
  0x21   :  { %13084 = vst [vmem:[#allocation48_spill] sm:$0xff] %v9384_v57  ;;  %13085 = vst [vmem:[#allocation49_spill] sm:$0xff] %v9386_v50  ;;  %7715 = vmatmul.mubr.f32.gmra.mxu1 %v9263_v3  ;;  %7667 = vmatprep.mubr.f32.mxu0 %v9392_v62  ;;  %v9439_v57 = vsub.f32 %v117_v46, %v9408_v0  ;;  %v9448_v3 = vand.u32 4294901760, %v361_v45  ;;  %v9450_v34 = vand.u32 4294901760, %v371_v24  ;;  %v9458_v10 = vand.u32 4294901760, %v9426_v60  ;;  %v45_v24 = vld [vmem:[%s12723_s0 + $0xc0] sm:$0xff] }
  0x22   :  { %13086 = vst [vmem:[#allocation50_spill] sm:$0xff] %v9392_v62  ;;  %13087 = vst [vmem:[#allocation51_spill] sm:$0xff] %v9397_v25  ;;  %7717 = vmatprep.mubr.f32.mxu1 %v9274_v8  ;;  %v9452_v62 = vand.u32 4294901760, %v126_v18  ;;  %v381_v46 = vsub.f32 %v9397_v25, %v9423_v61  ;;  %v9461_v2 = vsub.f32 %v120_v1, %v9428_v56  ;;  %v9463_v8 = vand.u32 4294901760, %v129_v48  ;;  %v46_v25 = vld [vmem:[%s12723_s0 + $0xc8] sm:$0xff] }
  0x23   :  { %13088 = vst [vmem:[#allocation52_spill] sm:$0xff] %v9399_v59  ;;  %13089 = vst [vmem:[#allocation53_spill] sm:$0xff] %v9406_v17  ;;  %v391_v45 = vsub.f32 %v9406_v17, %v9436_v15  ;;  %v132_v1 = vsel %vm61_vm1, %v44_v13, 0  ;;  %v135_v17 = vsel %vm61_vm1, %v45_v24, 0 }
  0x24   :  { %13090 = vst [vmem:[#allocation54_spill] sm:$0xff] %v9408_v0  ;;  %13091 = vst [vmem:[#allocation55_spill] sm:$0xff] %v9412_v63  ;;  %7668 = vmatmul.mubr.f32.gmra.mxu0 %v9412_v63  ;;  %v9473_v63 = vand.u32 4294901760, %v9439_v57  ;;  %v9496_v13 = vand.u32 4294901760, %v381_v46 }
  0x25   :  { %13092 = vst [vmem:[#allocation56_spill] sm:$0xff] %v9423_v61  ;;  %13093 = vst [vmem:[#allocation57_spill] sm:$0xff] %v9426_v60  ;;  %7718 = vmatmul.mubr.f32.gmra.mxu1 %v9276_v12  ;;  %7670 = vmatprep.mubr.f32.mxu0 %v9433_v22  ;;  %v9476_v61 = vsub.f32 %v123_v58, %v9441_v11  ;;  %v9484_v12 = vsub.f32 %v126_v18, %v9452_v62  ;;  %v47_v58 = vld [vmem:[%s12723_s0 + $0xd0] sm:$0xff]  ;;  %v9501_v18 = vand.u32 4294901760, %v9461_v2 }
  0x26   :  { %13094 = vst [vmem:[#allocation58_spill] sm:$0xff] %v9428_v56  ;;  %13095 = vst [vmem:[#allocation59_spill] sm:$0xff] %v9433_v22  ;;  %7720 = vmatprep.mubr.f32.mxu1 %v9301_v36  ;;  %v9487_v22 = vsub.f32 %v129_v48, %v9463_v8  ;;  %v401_v36 = vsub.f32 %v9426_v60, %v9458_v10  ;;  %v9503_v48 = vand.u32 4294901760, %v135_v17  ;;  %v9507_v24 = vand.u32 4294901760, %v391_v45 }
  0x27   :  { %13096 = vst [vmem:[#allocation60_spill] sm:$0xff] %v9436_v15  ;;  %13097 = vst [vmem:[#allocation61_spill] sm:$0xff] %v9439_v57  ;;  %v9489_v15 = vand.u32 4294901760, %v132_v1  ;;  %v411_v44 = vsub.f32 %v9439_v57, %v9473_v63  ;;  %v9512_v46 = vand.u32 4294901760, %v9476_v61 }
  0x28   :  { %13098 = vst [vmem:[#allocation62_spill] sm:$0xff] %v9441_v11  ;;  %13099 = vst [vmem:[#allocation63_spill] sm:$0xff] %v9448_v3  ;;  %7671 = vmatmul.mubr.f32.gmra.mxu0 %v9448_v3  ;;  %v138_v3 = vsel %vm61_vm1, %v46_v25, 0  ;;  %v9524_v45 = vand.u32 4294901760, %v9487_v22  ;;  %v49_v25 = vld [vmem:[%s12723_s0 + $0xe0] sm:$0xff]  ;;  %v9538_v57 = vsub.f32 %v135_v17, %v9503_v48 }
  0x29   :  { %13100 = vst [vmem:[#allocation64_spill] sm:$0xff] %v9450_v34  ;;  %13101 = vst [vmem:[#allocation65_spill] sm:$0xff] %v9452_v62  ;;  %7721 = vmatmul.mubr.f32.gmra.mxu1 %v9312_v43  ;;  %7673 = vmatprep.mubr.f32.mxu0 %v9450_v34  ;;  %v48_v43 = vld [vmem:[%s12723_s0 + $0xd8] sm:$0xff]  ;;  %v9521_v34 = vand.u32 4294901760, %v9484_v12  ;;  %v9540_v60 = vand.u32 4294901760, %v138_v3  ;;  %v431_v5 = vsub.f32 %v9476_v61, %v9512_v46  ;;  %v147_v17 = vsel %vm61_vm1, %v49_v25, 0 }
  0x2a   :  { %13102 = vst [vmem:[#allocation66_spill] sm:$0xff] %v9458_v10  ;;  %13103 = vst [vmem:[#allocation67_spill] sm:$0xff] %v9461_v2  ;;  %7723 = vmatprep.mubr.f32.mxu1 %v9333_v55  ;;  %v141_v10 = vsel %vm61_vm1, %v47_v58, 0  ;;  %v9533_v58 = vand.u32 4294901760, %v401_v36  ;;  %v421_v55 = vsub.f32 %v9461_v2, %v9501_v18  ;;  %v144_v36 = vsel %vm61_vm1, %v48_v43, 0  ;;  %v51_v43 = vld [vmem:[%s12723_s0 + $0xf0] sm:$0xff] }
  0x2b   :  { %13104 = vst [vmem:[#allocation68_spill] sm:$0xff] %v9463_v8  ;;  %13105 = vst [vmem:[#allocation69_spill] sm:$0xff] %v9473_v63  ;;  %v9527_v63 = vsub.f32 %v132_v1, %v9489_v15  ;;  %v9544_v1 = vand.u32 4294901760, %v411_v44  ;;  %v451_v44 = vsub.f32 %v9487_v22, %v9524_v45 }
  0x2c   :  { %13106 = vst [vmem:[#allocation70_spill] sm:$0xff] %v9476_v61  ;;  %13107 = vst [vmem:[#allocation71_spill] sm:$0xff] %v9484_v12  ;;  %7674 = vmatmul.mubr.f32.gmra.mxu0 %v9496_v13  ;;  %v9567_v25 = vand.u32 4294901760, %v421_v55 }
  0x2d   :  { %13108 = vst [vmem:[#allocation72_spill] sm:$0xff] %v9487_v22  ;;  %13109 = vst [vmem:[#allocation73_spill] sm:$0xff] %v9489_v15  ;;  %7724 = vmatmul.mubr.f32.gmra.mxu1 %v9374_v6  ;;  %7676 = vmatprep.mubr.f32.mxu0 %v9507_v24  ;;  %v9561_v6 = vand.u32 4294901760, %v9527_v63 }
  0x2e   :  { %13110 = vst [vmem:[#allocation74_spill] sm:$0xff] %v9496_v13  ;;  %13111 = vst [vmem:[#allocation75_spill] sm:$0xff] %v9501_v18  ;;  %v9548_v13 = vand.u32 4294901760, %v141_v10  ;;  %7726 = vmatprep.mubr.f32.mxu1 %v9386_v50  ;;  %v50_v18 = vld [vmem:[%s12723_s0 + $0xe8] sm:$0xff]  ;;  %v9570_v50 = vand.u32 4294901760, %v9538_v57 }
  0x2f   :  { %13112 = vst [vmem:[#allocation76_spill] sm:$0xff] %v9503_v48  ;;  %13113 = vst [vmem:[#allocation77_spill] sm:$0xff] %v9507_v24  ;;  %v441_v24 = vsub.f32 %v9484_v12, %v9521_v34  ;;  %v150_v55 = vsel %vm61_vm1, %v50_v18, 0  ;;  %v52_v12 = vld [vmem:[%s12723_s0 + $0xf8] sm:$0xff] }
  0x30   :  { %13114 = vst [vmem:[#allocation78_spill] sm:$0xff] %v9512_v46  ;;  %13115 = vst [vmem:[#allocation79_spill] sm:$0xff] %v9521_v34  ;;  %7677 = vmatmul.mubr.f32.gmra.mxu0 %v9533_v58  ;;  %v9573_v46 = vsub.f32 %v138_v3, %v9540_v60  ;;  %v9575_v34 = vand.u32 4294901760, %v144_v36  ;;  %v9582_v22 = vsub.f32 %v141_v10, %v9548_v13  ;;  %v153_v3 = vsel %vm61_vm1, %v51_v43, 0 }
  0x31   :  { %13116 = vst [vmem:[#allocation80_spill] sm:$0xff] %v9524_v45  ;;  %13117 = vst [vmem:[#allocation81_spill] sm:$0xff] %v9527_v63  ;;  %7727 = vmatmul.mubr.f32.gmra.mxu1 %v9399_v59  ;;  %7679 = vmatprep.mubr.f32.mxu0 %v9544_v1  ;;  %v9579_v45 = vand.u32 4294901760, %v431_v5  ;;  %v9592_v59 = vand.u32 4294901760, %v441_v24  ;;  %v461_v10 = vsub.f32 %v9527_v63, %v9561_v6 }
  0x32   :  { %13118 = vst [vmem:[#allocation82_spill] sm:$0xff] %v9533_v58  ;;  %13119 = vst [vmem:[#allocation83_spill] sm:$0xff] %v9538_v57  ;;  %v9584_v58 = vand.u32 4294901760, %v147_v17  ;;  %7729 = vmatprep.mubr.f32.mxu1 %v9408_v0  ;;  %v471_v5 = vsub.f32 %v9538_v57, %v9570_v50  ;;  %v9602_v18 = vand.u32 4294901760, %v9573_v46  ;;  %v9605_v43 = vsub.f32 %v144_v36, %v9575_v34 }
  0x33   :  { %13120 = vst [vmem:[#allocation84_spill] sm:$0xff] %v9544_v1  ;;  %13121 = vst [vmem:[#allocation85_spill] sm:$0xff] %v9561_v6  ;;  %v9594_v1 = vand.u32 4294901760, %v451_v44  ;;  %v9607_v0 = vand.u32 4294901760, %v150_v55  ;;  %v9612_v24 = vand.u32 4294901760, %v9582_v22  ;;  %v9621_v36 = vand.u32 4294901760, %v461_v10 }
  0x34   :  { %13122 = vst [vmem:[#allocation86_spill] sm:$0xff] %v9567_v25  ;;  %13123 = vst [vmem:[#allocation87_spill] sm:$0xff] %v9570_v50  ;;  %7680 = vmatmul.mubr.f32.gmra.mxu0 %v9567_v25  ;;  %v9615_v44 = vsub.f32 %v147_v17, %v9584_v58  ;;  %v9617_v25 = vand.u32 4294901760, %v153_v3  ;;  %v156_v50 = vsel %vm61_vm1, %v52_v12, 0  ;;  %v9636_v12 = vand.u32 4294901760, %v471_v5 }
  0x35   :  { %13124 = vst [vmem:[#allocation88_spill] sm:$0xff] %v9573_v46  ;;  %13125 = vst [vmem:[#allocation89_spill] sm:$0xff] %v9579_v45  ;;  %7730 = vmatmul.mubr.f32.gmra.mxu1 %v9428_v56  ;;  %7682 = vmatprep.mubr.f32.mxu0 %v9579_v45  ;;  %v481_v56 = vsub.f32 %v9573_v46, %v9602_v18  ;;  %v9627_v45 = vand.u32 4294901760, %v9605_v43  ;;  %v9630_v57 = vsub.f32 %v150_v55, %v9607_v0  ;;  %v1941_v55 = vld [vmem:[%s12726_s3] sm:$0x3] }
  0x36   :  { %13126 = vst [vmem:[#allocation90_spill] sm:$0xff] %v9582_v22  ;;  %13127 = vst [vmem:[#allocation91_spill] sm:$0xff] %v9592_v59  ;;  %7732 = vmatprep.mubr.f32.mxu1 %v9441_v11  ;;  %v9632_v17 = vand.u32 4294901760, %v156_v50  ;;  %v491_v10 = vsub.f32 %v9582_v22, %v9612_v24  ;;  %v9644_v11 = vsub.f32 %v153_v3, %v9617_v25 }
  0x37   :  { %13128 = vst [vmem:[#allocation92_spill] sm:$0xff] %v9594_v1  ;;  %13129 = vst [vmem:[#allocation93_spill] sm:$0xff] %v9602_v18  ;;  %v501_v5 = vsub.f32 %v9605_v43, %v9627_v45 }
  0x38   :  { %13130 = vst [vmem:[#allocation94_spill] sm:$0xff] %v9605_v43  ;;  %13131 = vst [vmem:[#allocation95_spill] sm:$0xff] %v9612_v24  ;;  %7683 = vmatmul.mubr.f32.gmra.mxu0 %v9592_v59  ;;  %v9641_v59 = vand.u32 4294901760, %v9615_v44  ;;  %v9659_v24 = vsub.f32 %v156_v50, %v9632_v17  ;;  %v9663_v3 = vand.u32 4294901760, %v491_v10 }
  0x39   :  { %13132 = vst [vmem:[#allocation96_spill] sm:$0xff] %v9615_v44  ;;  %13133 = vst [vmem:[#allocation97_spill] sm:$0xff] %v9621_v36  ;;  %7733 = vmatmul.mubr.f32.gmra.mxu1 %v9452_v62  ;;  %7685 = vmatprep.mubr.f32.mxu0 %v9594_v1  ;;  %v9651_v1 = vand.u32 4294901760, %v481_v56  ;;  %v9656_v62 = vand.u32 4294901760, %v9630_v57  ;;  %v9668_v56 = vand.u32 4294901760, %v9644_v11  ;;  %v9673_v50 = vand.u32 4294901760, %v501_v5 }
  0x3a   :  { %13134 = vst [vmem:[#allocation98_spill] sm:$0xff] %v9627_v45  ;;  %13135 = vst [vmem:[#allocation99_spill] sm:$0xff] %v9630_v57  ;;  %7735 = vmatprep.mubr.f32.mxu1 %v9463_v8  ;;  %v1950_v8 = vsel %vm158_vm0, %v1941_v55, 0  ;;  %v9678_v10 = vand.u32 4294901760, %v9659_v24 }
  0x3b   :  { %13136 = vst [vmem:[#allocation100_spill] sm:$0xff] %v9636_v12  ;;  %13137 = vst [vmem:[#allocation101_spill] sm:$0xff] %v9641_v59  ;;  %v531_v55 = vsub.f32 %v9644_v11, %v9668_v56 }
  0x3c   :  { %13138 = vst [vmem:[#allocation102_spill] sm:$0xff] %v9644_v11  ;;  %7686 = vmatmul.mubr.f32.gmra.mxu0 %v9621_v36  ;;  %13139 = vst [vmem:[#allocation103_spill] sm:$0xff] %v9651_v1  ;;  %v511_v36 = vsub.f32 %v9615_v44, %v9641_v59 }
  0x3d   :  { %13140 = vst [vmem:[#allocation104_spill] sm:$0xff] %v9656_v62  ;;  %13141 = vst [vmem:[#allocation105_spill] sm:$0xff] %v9659_v24  ;;  %7736 = vmatmul.mubr.f32.gmra.mxu1 %v9489_v15  ;;  %7688 = vmatprep.mubr.f32.mxu0 %v9636_v12  ;;  %v521_v15 = vsub.f32 %v9630_v57, %v9656_v62  ;;  %v9680_v12 = vand.u32 4294901760, %v1950_v8 }
  0x3e   :  { %13142 = vst [vmem:[#allocation106_spill] sm:$0xff] %v9663_v3  ;;  %13143 = vst [vmem:[#allocation107_spill] sm:$0xff] %v9668_v56  ;;  %7738 = vmatprep.mubr.f32.mxu1 %v9503_v48  ;;  %v9684_v59 = vand.u32 4294901760, %v511_v36  ;;  %v9699_v36 = vand.u32 4294901760, %v531_v55  ;;  %v13147_v55 = vld [vmem:[#allocation51_spill] sm:$0xff] }
  0x3f   :  { %13144 = vst [vmem:[#allocation108_spill] sm:$0xff] %v9678_v10  ;;  %v9690_v5 = vand.u32 4294901760, %v521_v15  ;;  %v9695_v48 = vsub.f32 %v1950_v8, %v9680_v12 }
  0x40   :  { %7689 = vmatmul.mubr.f32.gmra.mxu0 %v9651_v1  ;;  %v541_v1 = vsub.f32 %v9659_v24, %v9678_v10 }
  0x41   :  { %7739 = vmatmul.mubr.f32.gmra.mxu1 %v9540_v60  ;;  %7691 = vmatprep.mubr.f32.mxu0 %v9663_v3  ;;  %v9706_v15 = vand.u32 4294901760, %v9695_v48 }
  0x42   :  { %7741 = vmatprep.mubr.f32.mxu1 %v9548_v13  ;;  %v9703_v3 = vand.u32 4294901760, %v541_v1 }
  0x43   :  { %v2372_v8 = vsub.f32 %v9695_v48, %v9706_v15 }
  0x44   :  { %7692 = vmatmul.mubr.f32.gmra.mxu0 %v9673_v50 }
  0x45   :  { %7742 = vmatmul.mubr.f32.gmra.mxu1 %v9575_v34  ;;  %7694 = vmatprep.mubr.f32.mxu0 %v9684_v59  ;;  %v9718_v1 = vand.u32 4294901760, %v2372_v8  ;;  %v13148_v8 = vld [vmem:[#allocation56_spill] sm:$0xff] }
  0x46   :  { %7744 = vmatprep.mubr.f32.mxu1 %v9584_v58 }
  0x48   :  { %7695 = vmatmul.mubr.f32.gmra.mxu0 %v9690_v5 }
  0x49   :  { %7745 = vmatmul.mubr.f32.gmra.mxu1 %v9607_v0  ;;  %7697 = vmatprep.mubr.f32.mxu0 %v9699_v36 }
  0x4a   :  { %7747 = vmatprep.mubr.f32.mxu1 %v9617_v25 }
  0x4c   :  { %7698 = vmatmul.mubr.f32.gmra.mxu0 %v9703_v3 }
  0x4d   :  { %7748 = vmatmul.mubr.f32.gmra.mxu1 %v9632_v17  ;;  %7752 = vmatprep.mubr.f32.mxu0 %v9150_v19 }
  0x4e   :  { %7802 = vmatprep.mubr.f32.mxu1 %v9169_v27 }
  0x50   :  { %7753 = vmatmul.mubr.f32.vlgmr.msra.gmra.mxu0 %v9154_v21 }
  0x51   :  { %7851 = vmatpush3.msra.mxu0 %v9171_v28  ;;  %7803 = vmatmul.mubr.f32.vlgmr.msra.gmra.mxu1 %v9174_v29  ;;  %v13146_v28 = vld [vmem:[#allocation46_spill] sm:$0xff] }
  0x52   :  { %7901 = vmatpush3.msra.mxu1 %v9130_v9  ;;  %7755 = vmatprep.mubr.f32.mxu0 %v9161_v23  ;;  %v13145_v9 = vld [vmem:[#allocation44_spill] sm:$0xff] }
  0x53   :  { %7805 = vmatprep.mubr.f32.mxu1 %v9180_v31  ;;  %7950 = vmatprep.subr.mxu0 %v9680_v12 }
  0x54   :  { %7756 = vmatmul.mubr.f32.gmra.mxu0 %v9177_v30  ;;  %8000 = vmatprep.subr.mxu1 %v9718_v1 }
  0x55   :  { %7806 = vmatmul.mubr.f32.gmra.mxu1 %v9196_v38  ;;  %7758 = vmatprep.mubr.f32.mxu0 %v9183_v32 }
  0x56   :  { %7808 = vmatprep.mubr.f32.mxu1 %v9201_v40 }
  0x58   :  { %7759 = vmatmul.mubr.f32.gmra.mxu0 %v9186_v33 }
  0x59   :  { %7809 = vmatmul.mubr.f32.gmra.mxu1 %v9204_v41  ;;  %7761 = vmatprep.mubr.f32.mxu0 %v9207_v42  ;;  %v13197_v42 = vld [vmem:[#allocation41_spill] sm:$0xff] }
  0x5a   :  { %7811 = vmatprep.mubr.f32.mxu1 %v9231_v53  ;;  %v13195_v53 = vld [vmem:[#allocation19_spill] sm:$0xff] }
  0x5c   :  { %7762 = vmatmul.mubr.f32.gmra.mxu0 %v9272_v7 }
  0x5d   :  { %7812 = vmatmul.mubr.f32.gmra.mxu1 %v9293_v20  ;;  %7764 = vmatprep.mubr.f32.mxu0 %v9284_v14 }
  0x5e   :  { %7814 = vmatprep.mubr.f32.mxu1 %v9307_v37 }
  0x60   :  { %7765 = vmatmul.mubr.f32.gmra.mxu0 %v9287_v16 }
  0x61   :  { %7815 = vmatmul.mubr.f32.gmra.mxu1 %v9310_v39  ;;  %7767 = vmatprep.mubr.f32.mxu0 %v9296_v26  ;;  %v13191_v26 = vld [vmem:[#allocation14_spill] sm:$0xff] }
  0x62   :  { %7817 = vmatprep.mubr.f32.mxu1 %v9319_v47  ;;  %v13149_v47 = vld [vmem:[#allocation53_spill] sm:$0xff] }
  0x64   :  { %7768 = vmatmul.mubr.f32.gmra.mxu0 %v9299_v35  ;;  %v13150_v35 = vld [vmem:[#allocation60_spill] sm:$0xff] }
  0x65   :  { %7818 = vmatmul.mubr.f32.gmra.mxu1 %v9322_v49  ;;  %7770 = vmatprep.mubr.f32.mxu0 %v9325_v51  ;;  %v13151_v49 = vld [vmem:[#allocation57_spill] sm:$0xff]  ;;  %v13152_v51 = vld [vmem:[#allocation66_spill] sm:$0xff] }
  0x66   :  { %7820 = vmatprep.mubr.f32.mxu1 %v9353_v4  ;;  %v13153_v4 = vld [vmem:[#allocation61_spill] sm:$0xff] }
  0x68   :  { %7771 = vmatmul.mubr.f32.gmra.mxu0 %v9331_v54  ;;  %v13154_v54 = vld [vmem:[#allocation69_spill] sm:$0xff] }
  0x69   :  { %7821 = vmatmul.mubr.f32.gmra.mxu1 %v9369_v52  ;;  %7773 = vmatprep.mubr.f32.mxu0 %v13145_v9  ;;  %v13155_v9 = vld [vmem:[#allocation75_spill] sm:$0xff] }
  0x6a   :  { %7823 = vmatprep.mubr.f32.mxu1 %v13146_v28  ;;  %v9857_v28 = vld [vmem:[%s12725_s2] ss:$0 sm:$0xff] }
  0x6c   :  { %7774 = vmatmul.mubr.f32.gmra.mxu0 %v13147_v55  ;;  %v13156_v55 = vld [vmem:[#allocation78_spill] sm:$0xff] }
  0x6d   :  { %7824 = vmatmul.mubr.f32.gmra.mxu1 %v13148_v8  ;;  %7776 = vmatprep.mubr.f32.mxu0 %v13149_v47  ;;  %v13157_v8 = vld [vmem:[#allocation71_spill] sm:$0xff] }
  0x6e   :  { %7826 = vmatprep.mubr.f32.mxu1 %v13150_v35  ;;  %v13158_v47 = vld [vmem:[#allocation79_spill] sm:$0xff]  ;;  %v13159_v35 = vld [vmem:[#allocation72_spill] sm:$0xff] }
  0x70   :  { %7777 = vmatmul.mubr.f32.gmra.mxu0 %v13151_v49  ;;  %v13160_v49 = vld [vmem:[#allocation80_spill] sm:$0xff] }
  0x71   :  { %7827 = vmatmul.mubr.f32.gmra.mxu1 %v13152_v51  ;;  %7779 = vmatprep.mubr.f32.mxu0 %v13153_v4  ;;  %v13189_v4 = vld [vmem:[#allocation76_spill] sm:$0xff]  ;;  %v13190_v51 = vld [vmem:[#allocation13_spill] sm:$0xff] }
  0x72   :  { %7829 = vmatprep.mubr.f32.mxu1 %v13154_v54  ;;  %v13161_v54 = vld [vmem:[#allocation83_spill] sm:$0xff] }
  0x74   :  { %7780 = vmatmul.mubr.f32.gmra.mxu0 %v9461_v2  ;;  %v13162_v2 = vld [vmem:[#allocation87_spill] sm:$0xff] }
  0x75   :  { %7830 = vmatmul.mubr.f32.gmra.mxu1 %v13155_v9  ;;  %7782 = vmatprep.mubr.f32.mxu0 %v9476_v61  ;;  %v13187_v61 = vld [vmem:[#allocation68_spill] sm:$0xff]  ;;  %v13188_v9 = vld [vmem:[#allocation73_spill] sm:$0xff] }
  0x76   :  { %7832 = vmatprep.mubr.f32.mxu1 %v13156_v55  ;;  %v13186_v55 = vld [vmem:[#allocation65_spill] sm:$0xff] }
  0x78   :  { %7783 = vmatmul.mubr.f32.gmra.mxu0 %v13157_v8  ;;  %v13163_v8 = vld [vmem:[#allocation95_spill] sm:$0xff] }
  0x79   :  { %7833 = vmatmul.mubr.f32.gmra.mxu1 %v13158_v47  ;;  %7785 = vmatprep.mubr.f32.mxu0 %v13159_v35  ;;  %v13184_v35 = vld [vmem:[#allocation58_spill] sm:$0xff] }
  0x7a   :  { %7835 = vmatprep.mubr.f32.mxu1 %v13160_v49  ;;  %v13183_v49 = vld [vmem:[#allocation54_spill] sm:$0xff] }
  0x7b   :  { %v13185_v47 = vld [vmem:[#allocation62_spill] sm:$0xff] }
  0x7c   :  { %7786 = vmatmul.mubr.f32.gmra.mxu0 %v9527_v63  ;;  %v13164_v63 = vld [vmem:[#allocation101_spill] sm:$0xff] }
  0x7d   :  { %7836 = vmatmul.mubr.f32.gmra.mxu1 %v9561_v6  ;;  %7788 = vmatprep.mubr.f32.mxu0 %v13161_v54  ;;  %v13181_v54 = vld [vmem:[#allocation49_spill] sm:$0xff]  ;;  %v13182_v6 = vld [vmem:[#allocation52_spill] sm:$0xff] }
  0x7e   :  { %7838 = vmatprep.mubr.f32.mxu1 %v13162_v2  ;;  %v13180_v2 = vld [vmem:[#allocation47_spill] sm:$0xff] }
  0x80   :  { %7789 = vmatmul.mubr.f32.gmra.mxu0 %v9573_v46  ;;  %v13179_v46 = vld [vmem:[#allocation40_spill] sm:$0xff] }
  0x81   :  { %7839 = vmatmul.mubr.f32.gmra.mxu1 %v9602_v18  ;;  %7791 = vmatprep.mubr.f32.mxu0 %v9582_v22  ;;  %v13177_v22 = vld [vmem:[#allocation32_spill] sm:$0xff]  ;;  %v13178_v18 = vld [vmem:[#allocation35_spill] sm:$0xff] }
  0x82   :  { %7841 = vmatprep.mubr.f32.mxu1 %v13163_v8  ;;  %v13165_v8 = vld [vmem:[#allocation5_spill] sm:$0xff] }
  0x84   :  { %7792 = vmatmul.mubr.f32.gmra.mxu0 %v9605_v43  ;;  %v13176_v43 = vld [vmem:[#allocation26_spill] sm:$0xff] }
  0x85   :  { %7842 = vmatmul.mubr.f32.gmra.mxu1 %v9627_v45  ;;  %7794 = vmatprep.mubr.f32.mxu0 %v9615_v44  ;;  %v13166_v45 = vld [vmem:[#allocation6_spill] sm:$0xff]  ;;  %v13175_v44 = vld [vmem:[#allocation25_spill] sm:$0xff] }
  0x86   :  { %7844 = vmatprep.mubr.f32.mxu1 %v13164_v63  ;;  %v13174_v63 = vld [vmem:[#allocation22_spill] sm:$0xff] }
  0x88   :  { %7795 = vmatmul.mubr.f32.gmra.mxu0 %v9630_v57  ;;  %v13173_v57 = vld [vmem:[#allocation21_spill] sm:$0xff] }
  0x89   :  { %7845 = vmatmul.mubr.f32.gmra.mxu1 %v9656_v62  ;;  %7797 = vmatprep.mubr.f32.mxu0 %v9644_v11  ;;  %v13167_v62 = vld [vmem:[#allocation7_spill] sm:$0xff]  ;;  %v13172_v11 = vld [vmem:[#allocation20_spill] sm:$0xff] }
  0x8a   :  { %7847 = vmatprep.mubr.f32.mxu1 %v9668_v56  ;;  %v13170_v56 = vld [vmem:[#allocation10_spill] sm:$0xff] }
  0x8c   :  { %7798 = vmatmul.mubr.f32.gmra.mxu0 %v9659_v24  ;;  %v13168_v24 = vld [vmem:[#allocation8_spill] sm:$0xff] }
  0x8d   :  { %7848 = vmatmul.mubr.f32.gmra.mxu1 %v9678_v10  ;;  %7852 = vmatprep.mubr.f32.mxu0 %v13165_v8  ;;  %v13169_v10 = vld [vmem:[#allocation9_spill] sm:$0xff] }
  0x8e   :  { %7902 = vmatprep.mubr.f32.mxu1 %v13165_v8 }
  0x90   :  { %7853 = vmatmul.mubr.f32.vlgmr.msra.gmra.mxu0 %v13166_v45 }
  0x91   :  { %7951 = vmatpush3.msra.mxu0 %v9680_v12  ;;  %7903 = vmatmul.mubr.f32.vlgmr.msra.gmra.mxu1 %v13166_v45 }
  0x92   :  { %8001 = vmatpush3.msra.mxu1 %v9718_v1  ;;  %7855 = vmatprep.mubr.f32.mxu0 %v13167_v62  ;;  %v13171_v1 = vld [vmem:[#allocation11_spill] sm:$0xff] }
  0x93   :  { %7905 = vmatprep.mubr.f32.mxu1 %v13167_v62  ;;  %8050 = vmatprep.subr.mxu0 %v9695_v48 }
  0x94   :  { %7856 = vmatmul.mubr.f32.gmra.mxu0 %v13168_v24  ;;  %8100 = vmatprep.subr.mxu1 %v9680_v12 }
  0x95   :  { %7906 = vmatmul.mubr.f32.gmra.mxu1 %v13168_v24  ;;  %7858 = vmatprep.mubr.f32.mxu0 %v13169_v10 }
  0x96   :  { %7908 = vmatprep.mubr.f32.mxu1 %v13169_v10 }
  0x98   :  { %7859 = vmatmul.mubr.f32.gmra.mxu0 %v13170_v56 }
  0x99   :  { %7909 = vmatmul.mubr.f32.gmra.mxu1 %v13170_v56  ;;  %7861 = vmatprep.mubr.f32.mxu0 %v13171_v1 }
  0x9a   :  { %7911 = vmatprep.mubr.f32.mxu1 %v13171_v1 }
  0x9c   :  { %7862 = vmatmul.mubr.f32.gmra.mxu0 %v13172_v11 }
  0x9d   :  { %7912 = vmatmul.mubr.f32.gmra.mxu1 %v13172_v11  ;;  %7864 = vmatprep.mubr.f32.mxu0 %v13173_v57 }
  0x9e   :  { %7914 = vmatprep.mubr.f32.mxu1 %v13173_v57 }
  0xa0   :  { %7865 = vmatmul.mubr.f32.gmra.mxu0 %v13174_v63 }
  0xa1   :  { %7915 = vmatmul.mubr.f32.gmra.mxu1 %v13174_v63  ;;  %7867 = vmatprep.mubr.f32.mxu0 %v13175_v44 }
  0xa2   :  { %7917 = vmatprep.mubr.f32.mxu1 %v13175_v44 }
  0xa4   :  { %7868 = vmatmul.mubr.f32.gmra.mxu0 %v13176_v43 }
  0xa5   :  { %7918 = vmatmul.mubr.f32.gmra.mxu1 %v13176_v43  ;;  %7870 = vmatprep.mubr.f32.mxu0 %v13177_v22 }
  0xa6   :  { %7920 = vmatprep.mubr.f32.mxu1 %v13177_v22 }
  0xa8   :  { %7871 = vmatmul.mubr.f32.gmra.mxu0 %v13178_v18 }
  0xa9   :  { %7921 = vmatmul.mubr.f32.gmra.mxu1 %v13178_v18  ;;  %7873 = vmatprep.mubr.f32.mxu0 %v13179_v46 }
  0xaa   :  { %7923 = vmatprep.mubr.f32.mxu1 %v13179_v46 }
  0xac   :  { %7874 = vmatmul.mubr.f32.gmra.mxu0 %v13180_v2 }
  0xad   :  { %7924 = vmatmul.mubr.f32.gmra.mxu1 %v13180_v2  ;;  %7876 = vmatprep.mubr.f32.mxu0 %v13181_v54 }
  0xae   :  { %7926 = vmatprep.mubr.f32.mxu1 %v13181_v54 }
  0xb0   :  { %7877 = vmatmul.mubr.f32.gmra.mxu0 %v13182_v6 }
  0xb1   :  { %7927 = vmatmul.mubr.f32.gmra.mxu1 %v13182_v6  ;;  %7879 = vmatprep.mubr.f32.mxu0 %v13183_v49 }
  0xb2   :  { %7929 = vmatprep.mubr.f32.mxu1 %v13183_v49 }
  0xb4   :  { %7880 = vmatmul.mubr.f32.gmra.mxu0 %v13184_v35 }
  0xb5   :  { %7930 = vmatmul.mubr.f32.gmra.mxu1 %v13184_v35  ;;  %7882 = vmatprep.mubr.f32.mxu0 %v13185_v47 }
  0xb6   :  { %7932 = vmatprep.mubr.f32.mxu1 %v13185_v47 }
  0xb8   :  { %7883 = vmatmul.mubr.f32.gmra.mxu0 %v13186_v55 }
  0xb9   :  { %7933 = vmatmul.mubr.f32.gmra.mxu1 %v13186_v55  ;;  %7885 = vmatprep.mubr.f32.mxu0 %v13187_v61 }
  0xba   :  { %7935 = vmatprep.mubr.f32.mxu1 %v13187_v61 }
  0xbc   :  { %7886 = vmatmul.mubr.f32.gmra.mxu0 %v13188_v9 }
  0xbd   :  { %7936 = vmatmul.mubr.f32.gmra.mxu1 %v13188_v9  ;;  %7888 = vmatprep.mubr.f32.mxu0 %v13189_v4 }
  0xbe   :  { %7938 = vmatprep.mubr.f32.mxu1 %v13189_v4 }
  0xc0   :  { %7889 = vmatmul.mubr.f32.gmra.mxu0 %v9540_v60 }
  0xc1   :  { %7939 = vmatmul.mubr.f32.gmra.mxu1 %v9540_v60  ;;  %7891 = vmatprep.mubr.f32.mxu0 %v9548_v13 }
  0xc2   :  { %7941 = vmatprep.mubr.f32.mxu1 %v9548_v13 }
  0xc4   :  { %7892 = vmatmul.mubr.f32.gmra.mxu0 %v9575_v34 }
  0xc5   :  { %7942 = vmatmul.mubr.f32.gmra.mxu1 %v9575_v34  ;;  %7894 = vmatprep.mubr.f32.mxu0 %v9584_v58 }
  0xc6   :  { %7944 = vmatprep.mubr.f32.mxu1 %v9584_v58 }
  0xc8   :  { %7895 = vmatmul.mubr.f32.gmra.mxu0 %v9607_v0 }
  0xc9   :  { %7945 = vmatmul.mubr.f32.gmra.mxu1 %v9607_v0  ;;  %7897 = vmatprep.mubr.f32.mxu0 %v9617_v25 }
  0xca   :  { %7947 = vmatprep.mubr.f32.mxu1 %v9617_v25 }
  0xcc   :  { %7898 = vmatmul.mubr.f32.gmra.mxu0 %v9632_v17 }
  0xcd   :  { %7948 = vmatmul.mubr.f32.gmra.mxu1 %v9632_v17  ;;  %7952 = vmatprep.mubr.f32.mxu0 %v13190_v51  ;;  %v13192_v51 = vld [vmem:[#allocation15_spill] sm:$0xff] }
  0xce   :  { %8002 = vmatprep.mubr.f32.mxu1 %v13165_v8 }
  0xd0   :  { %v7654_v52 = vpop.f32.mrf.mxu0  ;;  %7953 = vmatmul.mubr.f32.vlgmr.msra.gmra.mxu0 %v13191_v26 }
  0xd1   :  { %v245_v39 = vadd.f32 %v7654_v52, %v9857_v28  ;;  %8051 = vmatpush3.msra.mxu0 %v9695_v48  ;;  %v7704_v16 = vpop.f32.mrf.mxu1  ;;  %8003 = vmatmul.mubr.f32.vlgmr.msra.gmra.mxu1 %v13166_v45  ;;  %v13193_v52 = vld [vmem:[#allocation17_spill] sm:$0xff] }
  0xd2   :  { %v234_v37 = vpop.f32.mrf.mxu0  ;;  %8101 = vmatpush3.msra.mxu1 %v9680_v12  ;;  %7955 = vmatprep.mubr.f32.mxu0 %v13192_v51 }
  0xd3   :  { %v9866_v14 = vadd.f32 %v7704_v16, %v245_v39  ;;  %v235_v20 = vadd.f32 %v9857_v28, %v234_v37  ;;  %v620_v8 = vpop.f32.mrf.mxu1  ;;  %8005 = vmatprep.mubr.f32.mxu1 %v13167_v62  ;;  %8150 = vmatprep.subr.mxu0 %v9706_v15  ;;  %v13194_v16 = vld [vmem:[#allocation18_spill] sm:$0xff] }
  0xd4   :  { %v7657_v26 = vpop.f32.mrf.mxu0  ;;  %7956 = vmatmul.mubr.f32.gmra.mxu0 %v13193_v52  ;;  %8200 = vmatprep.subr.mxu1 %v9680_v12 }
  0xd5   :  { %v9873_v48 = vadd.f32 %v620_v8, %v235_v20  ;;  %v265_v45 = vadd.f32 %v7657_v26, %v9857_v28  ;;  %v7707_v7 = vpop.f32.mrf.mxu1  ;;  %8006 = vmatmul.mubr.f32.gmra.mxu1 %v13168_v24  ;;  %7958 = vmatprep.mubr.f32.mxu0 %v13194_v16  ;;  %v13196_v24 = vld [vmem:[#allocation23_spill] sm:$0xff] }
  0xd6   :  { %v254_v37 = vpop.f32.mrf.mxu0  ;;  %8008 = vmatprep.mubr.f32.mxu1 %v13169_v10 }
  0xd7   :  { %v9879_v39 = vadd.f32 %v7707_v7, %v265_v45  ;;  %v255_v51 = vadd.f32 %v9857_v28, %v254_v37  ;;  %v632_v62 = vpop.f32.mrf.mxu1 }
  0xd8   :  { %v7660_v52 = vpop.f32.mrf.mxu0  ;;  %7959 = vmatmul.mubr.f32.gmra.mxu0 %v13195_v53 }
  0xd9   :  { %v9883_v20 = vadd.f32 %v632_v62, %v255_v51  ;;  %v285_v8 = vadd.f32 %v7660_v52, %v9857_v28  ;;  %v7710_v26 = vpop.f32.mrf.mxu1  ;;  %8009 = vmatmul.mubr.f32.gmra.mxu1 %v13170_v56  ;;  %7961 = vmatprep.mubr.f32.mxu0 %v13196_v24  ;;  %v13198_v52 = vld [vmem:[#allocation42_spill] sm:$0xff]  ;;  %v13199_v56 = vld [vmem:[#allocation48_spill] sm:$0xff] }
  0xda   :  { %v274_v16 = vpop.f32.mrf.mxu0  ;;  %8011 = vmatprep.mubr.f32.mxu1 %v13171_v1 }
  0xdb   :  { %v9889_v7 = vadd.f32 %v7710_v26, %v285_v8  ;;  %v275_v45 = vadd.f32 %v9857_v28, %v274_v16  ;;  %v644_v37 = vpop.f32.mrf.mxu1 }
  0xdc   :  { %v7663_v10 = vpop.f32.mrf.mxu0  ;;  %7962 = vmatmul.mubr.f32.gmra.mxu0 %v13197_v42 }
  0xdd   :  { %v9893_v53 = vadd.f32 %v644_v37, %v275_v45  ;;  %v305_v62 = vadd.f32 %v7663_v10, %v9857_v28  ;;  %v7713_v51 = vpop.f32.mrf.mxu1  ;;  %8012 = vmatmul.mubr.f32.gmra.mxu1 %v13172_v11  ;;  %7964 = vmatprep.mubr.f32.mxu0 %v13198_v52  ;;  %v13200_v37 = vld [vmem:[#allocation50_spill] sm:$0xff]  ;;  %v13201_v11 = vld [vmem:[#allocation55_spill] sm:$0xff] }
  0xde   :  { %v294_v24 = vpop.f32.mrf.mxu0  ;;  %8014 = vmatprep.mubr.f32.mxu1 %v13173_v57 }
  0xdf   :  { %v9899_v8 = vadd.f32 %v7713_v51, %v305_v62  ;;  %v295_v26 = vadd.f32 %v9857_v28, %v294_v24  ;;  %v656_v16 = vpop.f32.mrf.mxu1 }
  0xe0   :  { %v7666_v1 = vpop.f32.mrf.mxu0  ;;  %7965 = vmatmul.mubr.f32.gmra.mxu0 %v13199_v56 }
  0xe1   :  { %v9903_v42 = vadd.f32 %v656_v16, %v295_v26  ;;  %v325_v10 = vadd.f32 %v7666_v1, %v9857_v28  ;;  %v7716_v45 = vpop.f32.mrf.mxu1  ;;  %8015 = vmatmul.mubr.f32.gmra.mxu1 %v13174_v63  ;;  %7967 = vmatprep.mubr.f32.mxu0 %v13200_v37  ;;  %v13202_v16 = vld [vmem:[#allocation59_spill] sm:$0xff] }
  0xe2   :  { %v314_v52 = vpop.f32.mrf.mxu0  ;;  %8017 = vmatprep.mubr.f32.mxu1 %v13175_v44  ;;  %v13203_v63 = vld [vmem:[#allocation63_spill] sm:$0xff] }
  0xe3   :  { %v9909_v62 = vadd.f32 %v7716_v45, %v325_v10  ;;  %v315_v51 = vadd.f32 %v9857_v28, %v314_v52  ;;  %v668_v24 = vpop.f32.mrf.mxu1 }
  0xe4   :  { %v7669_v57 = vpop.f32.mrf.mxu0  ;;  %7968 = vmatmul.mubr.f32.gmra.mxu0 %v13201_v11 }
  0xe5   :  { %v9913_v56 = vadd.f32 %v668_v24, %v315_v51  ;;  %v345_v1 = vadd.f32 %v7669_v57, %v9857_v28  ;;  %v7719_v26 = vpop.f32.mrf.mxu1  ;;  %8018 = vmatmul.mubr.f32.gmra.mxu1 %v13176_v43  ;;  %7970 = vmatprep.mubr.f32.mxu0 %v13202_v16  ;;  %v13204_v24 = vld [vmem:[#allocation64_spill] sm:$0xff]  ;;  %v13205_v43 = vld [vmem:[#allocation74_spill] sm:$0xff] }
  0xe6   :  { %v334_v37 = vpop.f32.mrf.mxu0  ;;  %8020 = vmatprep.mubr.f32.mxu1 %v13177_v22 }
  0xe7   :  { %v9919_v10 = vadd.f32 %v7719_v26, %v345_v1  ;;  %v335_v45 = vadd.f32 %v9857_v28, %v334_v37  ;;  %v680_v52 = vpop.f32.mrf.mxu1 }
  0xe8   :  { %v7672_v44 = vpop.f32.mrf.mxu0  ;;  %7971 = vmatmul.mubr.f32.gmra.mxu0 %v13203_v63 }
  0xe9   :  { %v9923_v11 = vadd.f32 %v680_v52, %v335_v45  ;;  %v365_v57 = vadd.f32 %v7672_v44, %v9857_v28  ;;  %v7722_v51 = vpop.f32.mrf.mxu1  ;;  %8021 = vmatmul.mubr.f32.gmra.mxu1 %v13178_v18  ;;  %7973 = vmatprep.mubr.f32.mxu0 %v13204_v24  ;;  %v13206_v52 = vld [vmem:[#allocation77_spill] sm:$0xff]  ;;  %v13207_v18 = vld [vmem:[#allocation82_spill] sm:$0xff] }
  0xea   :  { %v354_v16 = vpop.f32.mrf.mxu0  ;;  %8023 = vmatprep.mubr.f32.mxu1 %v13179_v46 }
  0xeb   :  { %v9929_v1 = vadd.f32 %v7722_v51, %v365_v57  ;;  %v355_v26 = vadd.f32 %v9857_v28, %v354_v16  ;;  %v692_v37 = vpop.f32.mrf.mxu1 }
  0xec   :  { %v7675_v22 = vpop.f32.mrf.mxu0  ;;  %7974 = vmatmul.mubr.f32.gmra.mxu0 %v13205_v43 }
  0xed   :  { %v9933_v63 = vadd.f32 %v692_v37, %v355_v26  ;;  %v385_v44 = vadd.f32 %v7675_v22, %v9857_v28  ;;  %v7725_v45 = vpop.f32.mrf.mxu1  ;;  %8024 = vmatmul.mubr.f32.gmra.mxu1 %v13180_v2  ;;  %7976 = vmatprep.mubr.f32.mxu0 %v13206_v52  ;;  %v13208_v37 = vld [vmem:[#allocation84_spill] sm:$0xff]  ;;  %v13209_v2 = vld [vmem:[#allocation86_spill] sm:$0xff] }
  0xee   :  { %v374_v24 = vpop.f32.mrf.mxu0  ;;  %8026 = vmatprep.mubr.f32.mxu1 %v13181_v54 }
  0xef   :  { %v9939_v57 = vadd.f32 %v7725_v45, %v385_v44  ;;  %v375_v51 = vadd.f32 %v9857_v28, %v374_v24  ;;  %v704_v16 = vpop.f32.mrf.mxu1 }
  0xf0   :  { %v7678_v46 = vpop.f32.mrf.mxu0  ;;  %7977 = vmatmul.mubr.f32.gmra.mxu0 %v13207_v18 }
  0xf1   :  { %v9943_v43 = vadd.f32 %v704_v16, %v375_v51  ;;  %v405_v22 = vadd.f32 %v7678_v46, %v9857_v28  ;;  %v7728_v26 = vpop.f32.mrf.mxu1  ;;  %8027 = vmatmul.mubr.f32.gmra.mxu1 %v13182_v6  ;;  %7979 = vmatprep.mubr.f32.mxu0 %v13208_v37  ;;  %v13210_v16 = vld [vmem:[#allocation89_spill] sm:$0xff]  ;;  %v13211_v6 = vld [vmem:[#allocation91_spill] sm:$0xff] }
  0xf2   :  { %v394_v52 = vpop.f32.mrf.mxu0  ;;  %8029 = vmatprep.mubr.f32.mxu1 %v13183_v49 }
  0xf3   :  { %v9949_v44 = vadd.f32 %v7728_v26, %v405_v22  ;;  %v395_v45 = vadd.f32 %v9857_v28, %v394_v52  ;;  %v716_v24 = vpop.f32.mrf.mxu1 }
  0xf4   :  { %v7681_v54 = vpop.f32.mrf.mxu0  ;;  %7980 = vmatmul.mubr.f32.gmra.mxu0 %v13209_v2 }
  0xf5   :  { %v9953_v18 = vadd.f32 %v716_v24, %v395_v45  ;;  %v425_v46 = vadd.f32 %v7681_v54, %v9857_v28  ;;  %v7731_v51 = vpop.f32.mrf.mxu1  ;;  %8030 = vmatmul.mubr.f32.gmra.mxu1 %v13184_v35  ;;  %7982 = vmatprep.mubr.f32.mxu0 %v13210_v16  ;;  %v13212_v24 = vld [vmem:[#allocation92_spill] sm:$0xff]  ;;  %v13213_v35 = vld [vmem:[#allocation97_spill] sm:$0xff] }
  0xf6   :  { %v414_v37 = vpop.f32.mrf.mxu0  ;;  %8032 = vmatprep.mubr.f32.mxu1 %v13185_v47 }
  0xf7   :  { %v9959_v22 = vadd.f32 %v7731_v51, %v425_v46  ;;  %v415_v26 = vadd.f32 %v9857_v28, %v414_v37  ;;  %v728_v52 = vpop.f32.mrf.mxu1 }
  0xf8   :  { %v7684_v49 = vpop.f32.mrf.mxu0  ;;  %7983 = vmatmul.mubr.f32.gmra.mxu0 %v13211_v6 }
  0xf9   :  { %v9963_v2 = vadd.f32 %v728_v52, %v415_v26  ;;  %v445_v54 = vadd.f32 %v7684_v49, %v9857_v28  ;;  %v7734_v45 = vpop.f32.mrf.mxu1  ;;  %8033 = vmatmul.mubr.f32.gmra.mxu1 %v13186_v55  ;;  %7985 = vmatprep.mubr.f32.mxu0 %v13212_v24  ;;  %v13214_v52 = vld [vmem:[#allocation100_spill] sm:$0xff]  ;;  %v13215_v55 = vld [vmem:[#allocation103_spill] sm:$0xff] }
  0xfa   :  { %v434_v16 = vpop.f32.mrf.mxu0  ;;  %8035 = vmatprep.mubr.f32.mxu1 %v13187_v61 }
  0xfb   :  { %v9969_v46 = vadd.f32 %v7734_v45, %v445_v54  ;;  %v435_v51 = vadd.f32 %v9857_v28, %v434_v16  ;;  %v740_v37 = vpop.f32.mrf.mxu1 }
  0xfc   :  { %v7687_v47 = vpop.f32.mrf.mxu0  ;;  %7986 = vmatmul.mubr.f32.gmra.mxu0 %v13213_v35 }
  0xfd   :  { %v9973_v6 = vadd.f32 %v740_v37, %v435_v51  ;;  %v465_v49 = vadd.f32 %v7687_v47, %v9857_v28  ;;  %v7737_v26 = vpop.f32.mrf.mxu1  ;;  %8036 = vmatmul.mubr.f32.gmra.mxu1 %v13188_v9  ;;  %7988 = vmatprep.mubr.f32.mxu0 %v13214_v52  ;;  %v13216_v37 = vld [vmem:[#allocation106_spill] sm:$0xff] }
  0xfe   :  { %v454_v24 = vpop.f32.mrf.mxu0  ;;  %8038 = vmatprep.mubr.f32.mxu1 %v13189_v4 }
  0xff   :  { %v9979_v54 = vadd.f32 %v7737_v26, %v465_v49  ;;  %v455_v45 = vadd.f32 %v9857_v28, %v454_v24  ;;  %v752_v16 = vpop.f32.mrf.mxu1 }
 0x100   :  { %v7690_v61 = vpop.f32.mrf.mxu0  ;;  %7989 = vmatmul.mubr.f32.gmra.mxu0 %v13215_v55 }
 0x101   :  { %v9983_v35 = vadd.f32 %v752_v16, %v455_v45  ;;  %v485_v47 = vadd.f32 %v7690_v61, %v9857_v28  ;;  %v7740_v51 = vpop.f32.mrf.mxu1  ;;  %8039 = vmatmul.mubr.f32.gmra.mxu1 %v9540_v60  ;;  %7991 = vmatprep.mubr.f32.mxu0 %v13216_v37 }
 0x102   :  { %v474_v52 = vpop.f32.mrf.mxu0  ;;  %8041 = vmatprep.mubr.f32.mxu1 %v9548_v13 }
 0x103   :  { %v9989_v49 = vadd.f32 %v7740_v51, %v485_v47  ;;  %v475_v26 = vadd.f32 %v9857_v28, %v474_v52  ;;  %v764_v24 = vpop.f32.mrf.mxu1 }
 0x104   :  { %v7693_v4 = vpop.f32.mrf.mxu0  ;;  %7992 = vmatmul.mubr.f32.gmra.mxu0 %v9673_v50 }
 0x105   :  { %v9993_v55 = vadd.f32 %v764_v24, %v475_v26  ;;  %v505_v61 = vadd.f32 %v7693_v4, %v9857_v28  ;;  %v7743_v45 = vpop.f32.mrf.mxu1  ;;  %8042 = vmatmul.mubr.f32.gmra.mxu1 %v9575_v34  ;;  %7994 = vmatprep.mubr.f32.mxu0 %v9684_v59 }
 0x106   :  { %v494_v16 = vpop.f32.mrf.mxu0  ;;  %8044 = vmatprep.mubr.f32.mxu1 %v9584_v58 }
 0x107   :  { %v9999_v47 = vadd.f32 %v7743_v45, %v505_v61  ;;  %v495_v51 = vadd.f32 %v9857_v28, %v494_v16  ;;  %v776_v37 = vpop.f32.mrf.mxu1 }
 0x108   :  { %v7696_v52 = vpop.f32.mrf.mxu0  ;;  %7995 = vmatmul.mubr.f32.gmra.mxu0 %v9690_v5 }
 0x109   :  { %v10003_v50 = vadd.f32 %v776_v37, %v495_v51  ;;  %v525_v4 = vadd.f32 %v7696_v52, %v9857_v28  ;;  %v7746_v26 = vpop.f32.mrf.mxu1  ;;  %8045 = vmatmul.mubr.f32.gmra.mxu1 %v9607_v0  ;;  %7997 = vmatprep.mubr.f32.mxu0 %v9699_v36 }
 0x10a   :  { %v514_v59 = vpop.f32.mrf.mxu0  ;;  %8047 = vmatprep.mubr.f32.mxu1 %v9617_v25 }
 0x10b   :  { %v10009_v24 = vadd.f32 %v7746_v26, %v525_v4  ;;  %v515_v61 = vadd.f32 %v9857_v28, %v514_v59  ;;  %v788_v45 = vpop.f32.mrf.mxu1 }
 0x10c   :  { %v7699_v16 = vpop.f32.mrf.mxu0  ;;  %7998 = vmatmul.mubr.f32.gmra.mxu0 %v9703_v3 }
 0x10d   :  { %v10013_v5 = vadd.f32 %v788_v45, %v515_v61  ;;  %v545_v51 = vadd.f32 %v7699_v16, %v9857_v28  ;;  %v7749_v37 = vpop.f32.mrf.mxu1  ;;  %8048 = vmatmul.mubr.f32.gmra.mxu1 %v9632_v17  ;;  %8052 = vmatprep.mubr.f32.mxu0 %v9150_v19 }
 0x10e   :  { %v534_v36 = vpop.f32.mrf.mxu0  ;;  %8102 = vmatprep.mubr.f32.mxu1 %v9169_v27 }
 0x10f   :  { %v10019_v52 = vadd.f32 %v7749_v37, %v545_v51  ;;  %v535_v4 = vadd.f32 %v9857_v28, %v534_v36  ;;  %v800_v26 = vpop.f32.mrf.mxu1  ;;  %v13218_v36 = vld [vmem:[#allocation16_spill] sm:$0xff] }
 0x110   :  { %v7754_v59 = vpop.f32.mrf.mxu0  ;;  %8053 = vmatmul.mubr.f32.vlgmr.msra.gmra.mxu0 %v9154_v21 }
 0x111   :  { %v10023_v3 = vadd.f32 %v800_v26, %v535_v4  ;;  %v888_v61 = vadd.f32 %v7754_v59, %v9866_v14  ;;  %8151 = vmatpush3.msra.mxu0 %v9706_v15  ;;  %v7804_v45 = vpop.f32.mrf.mxu1  ;;  %8103 = vmatmul.mubr.f32.vlgmr.msra.gmra.mxu1 %v9174_v29  ;;  %v13219_v59 = vld [vmem:[#allocation24_spill] sm:$0xff] }
 0x112   :  { %v880_v19 = vpop.f32.mrf.mxu0  ;;  %8201 = vmatpush3.msra.mxu1 %v9680_v12  ;;  %8055 = vmatprep.mubr.f32.mxu0 %v9161_v23 }
 0x113   :  { %v10030_v27 = vadd.f32 %v7804_v45, %v888_v61  ;;  %v881_v28 = vadd.f32 %v880_v19, %v9873_v48  ;;  %v1171_v16 = vpop.f32.mrf.mxu1  ;;  %8105 = vmatprep.mubr.f32.mxu1 %v9180_v31  ;;  %v13220_v45 = vld [vmem:[#allocation29_spill] sm:$0xff] }
 0x114   :  { %v7757_v21 = vpop.f32.mrf.mxu0  ;;  %8056 = vmatmul.mubr.f32.gmra.mxu0 %v9177_v30 }
 0x115   :  { %v10035_v14 = vadd.f32 %v1171_v16, %v881_v28  ;;  %v902_v15 = vadd.f32 %v7757_v21, %v9879_v39  ;;  %v7807_v29 = vpop.f32.mrf.mxu1  ;;  %8106 = vmatmul.mubr.f32.gmra.mxu1 %v9196_v38  ;;  %8058 = vmatprep.mubr.f32.mxu0 %v9183_v32  ;;  %v13217_v38 = vld [vmem:[#allocation12_spill] sm:$0xff]  ;;  %v13222_v28 = vld [vmem:[#allocation33_spill] sm:$0xff] }
 0x116   :  { %v894_v23 = vpop.f32.mrf.mxu0  ;;  %8108 = vmatprep.mubr.f32.mxu1 %v9201_v40 }
 0x117   :  { %v10041_v12 = vadd.f32 %v7807_v29, %v902_v15  ;;  %v895_v48 = vadd.f32 %v894_v23, %v9883_v20  ;;  %v1187_v31 = vpop.f32.mrf.mxu1  ;;  %v13223_v29 = vld [vmem:[#allocation28_spill] sm:$0xff] }
 0x118   :  { %v7760_v51 = vpop.f32.mrf.mxu0  ;;  %8059 = vmatmul.mubr.f32.gmra.mxu0 %v9186_v33 }
 0x119   :  { %v10045_v30 = vadd.f32 %v1187_v31, %v895_v48  ;;  %v916_v39 = vadd.f32 %v7760_v51, %v9889_v7  ;;  %v7810_v37 = vpop.f32.mrf.mxu1  ;;  %8109 = vmatmul.mubr.f32.gmra.mxu1 %v9204_v41  ;;  %8061 = vmatprep.mubr.f32.mxu0 %v13217_v38  ;;  %v13221_v41 = vld [vmem:[#allocation27_spill] sm:$0xff]  ;;  %v13224_v31 = vld [vmem:[#allocation34_spill] sm:$0xff] }
 0x11a   :  { %v908_v32 = vpop.f32.mrf.mxu0  ;;  %8111 = vmatprep.mubr.f32.mxu1 %v13218_v36  ;;  %v13225_v51 = vld [vmem:[#allocation30_spill] sm:$0xff] }
 0x11b   :  { %v10051_v40 = vadd.f32 %v7810_v37, %v916_v39  ;;  %v909_v20 = vadd.f32 %v908_v32, %v9893_v53  ;;  %v1203_v4 = vpop.f32.mrf.mxu1  ;;  %v13226_v37 = vld [vmem:[#allocation36_spill] sm:$0xff] }
 0x11c   :  { %v7763_v26 = vpop.f32.mrf.mxu0  ;;  %8062 = vmatmul.mubr.f32.gmra.mxu0 %v13219_v59  ;;  %v13228_v59 = vld [vmem:[#allocation37_spill] sm:$0xff] }
 0x11d   :  { %v10055_v33 = vadd.f32 %v1203_v4, %v909_v20  ;;  %v930_v7 = vadd.f32 %v7763_v26, %v9899_v8  ;;  %v7813_v61 = vpop.f32.mrf.mxu1  ;;  %8112 = vmatmul.mubr.f32.gmra.mxu1 %v13220_v45  ;;  %8064 = vmatprep.mubr.f32.mxu0 %v13221_v41  ;;  %v13227_v20 = vld [vmem:[#allocation31_spill] sm:$0xff] }
 0x11e   :  { %v922_v19 = vpop.f32.mrf.mxu0  ;;  %8114 = vmatprep.mubr.f32.mxu1 %v13222_v28  ;;  %v13230_v45 = vld [vmem:[#allocation43_spill] sm:$0xff] }
 0x11f   :  { %v10061_v16 = vadd.f32 %v7813_v61, %v930_v7  ;;  %v923_v53 = vadd.f32 %v922_v19, %v9903_v42  ;;  %v1219_v21 = vpop.f32.mrf.mxu1  ;;  %v13229_v7 = vld [vmem:[#allocation38_spill] sm:$0xff] }
 0x120   :  { %v7766_v15 = vpop.f32.mrf.mxu0  ;;  %8065 = vmatmul.mubr.f32.gmra.mxu0 %v13223_v29  ;;  %v13232_v29 = vld [vmem:[#allocation45_spill] sm:$0xff] }
 0x121   :  { %v10065_v23 = vadd.f32 %v1219_v21, %v923_v53  ;;  %v944_v8 = vadd.f32 %v7766_v15, %v9909_v62  ;;  %v7816_v48 = vpop.f32.mrf.mxu1  ;;  %8115 = vmatmul.mubr.f32.gmra.mxu1 %v13224_v31  ;;  %8067 = vmatprep.mubr.f32.mxu0 %v13225_v51  ;;  %v13231_v53 = vld [vmem:[#allocation39_spill] sm:$0xff]  ;;  %v13234_v31 = vld [vmem:[#allocation46_spill] sm:$0xff] }
 0x122   :  { %v936_v39 = vpop.f32.mrf.mxu0  ;;  %8117 = vmatprep.mubr.f32.mxu1 %v13226_v37 }
 0x123   :  { %v10071_v38 = vadd.f32 %v7816_v48, %v944_v8  ;;  %v937_v42 = vadd.f32 %v936_v39, %v9913_v56  ;;  %v1235_v32 = vpop.f32.mrf.mxu1  ;;  %v13233_v8 = vld [vmem:[#allocation44_spill] sm:$0xff] }
 0x124   :  { %v7769_v36 = vpop.f32.mrf.mxu0  ;;  %8068 = vmatmul.mubr.f32.gmra.mxu0 %v13227_v20  ;;  %v13236_v20 = vld [vmem:[#allocation56_spill] sm:$0xff] }
 0x125   :  { %v10075_v4 = vadd.f32 %v1235_v32, %v937_v42  ;;  %v958_v62 = vadd.f32 %v7769_v36, %v9919_v10  ;;  %v7819_v26 = vpop.f32.mrf.mxu1  ;;  %8118 = vmatmul.mubr.f32.gmra.mxu1 %v13228_v59  ;;  %8070 = vmatprep.mubr.f32.mxu0 %v13229_v7  ;;  %v13235_v42 = vld [vmem:[#allocation51_spill] sm:$0xff]  ;;  %v13238_v59 = vld [vmem:[#allocation60_spill] sm:$0xff] }
 0x126   :  { %v950_v61 = vpop.f32.mrf.mxu0  ;;  %8120 = vmatprep.mubr.f32.mxu1 %v13230_v45 }
 0x127   :  { %v10081_v41 = vadd.f32 %v7819_v26, %v958_v62  ;;  %v951_v56 = vadd.f32 %v950_v61, %v9923_v11  ;;  %v1251_v19 = vpop.f32.mrf.mxu1  ;;  %v13237_v62 = vld [vmem:[#allocation53_spill] sm:$0xff] }
 0x128   :  { %v7772_v28 = vpop.f32.mrf.mxu0  ;;  %8071 = vmatmul.mubr.f32.gmra.mxu0 %v13231_v53  ;;  %v13240_v53 = vld [vmem:[#allocation66_spill] sm:$0xff] }
 0x129   :  { %v10085_v21 = vadd.f32 %v1251_v19, %v951_v56  ;;  %v972_v10 = vadd.f32 %v7772_v28, %v9929_v1  ;;  %v7822_v15 = vpop.f32.mrf.mxu1  ;;  %8121 = vmatmul.mubr.f32.gmra.mxu1 %v13232_v29  ;;  %8073 = vmatprep.mubr.f32.mxu0 %v13233_v8  ;;  %v13239_v56 = vld [vmem:[#allocation57_spill] sm:$0xff] }
 0x12a   :  { %v964_v48 = vpop.f32.mrf.mxu0  ;;  %8123 = vmatprep.mubr.f32.mxu1 %v13234_v31  ;;  %v13242_v29 = vld [vmem:[#allocation69_spill] sm:$0xff] }
 0x12b   :  { %v10091_v51 = vadd.f32 %v7822_v15, %v972_v10  ;;  %v965_v11 = vadd.f32 %v964_v48, %v9933_v63  ;;  %v1267_v39 = vpop.f32.mrf.mxu1  ;;  %v13241_v10 = vld [vmem:[#allocation61_spill] sm:$0xff] }
 0x12c   :  { %v7775_v37 = vpop.f32.mrf.mxu0  ;;  %8074 = vmatmul.mubr.f32.gmra.mxu0 %v13235_v42  ;;  %v13245_v42 = vld [vmem:[#allocation75_spill] sm:$0xff] }
 0x12d   :  { %v10095_v32 = vadd.f32 %v1267_v39, %v965_v11  ;;  %v986_v1 = vadd.f32 %v7775_v37, %v9939_v57  ;;  %v7825_v36 = vpop.f32.mrf.mxu1  ;;  %8124 = vmatmul.mubr.f32.gmra.mxu1 %v13236_v20  ;;  %8076 = vmatprep.mubr.f32.mxu0 %v13237_v62  ;;  %v13243_v11 = vld [vmem:[#allocation67_spill] sm:$0xff]  ;;  %v13247_v20 = vld [vmem:[#allocation78_spill] sm:$0xff] }
 0x12e   :  { %v978_v26 = vpop.f32.mrf.mxu0  ;;  %8126 = vmatprep.mubr.f32.mxu1 %v13238_v59 }
 0x12f   :  { %v10101_v7 = vadd.f32 %v7825_v36, %v986_v1  ;;  %v979_v63 = vadd.f32 %v978_v26, %v9943_v43  ;;  %v1283_v61 = vpop.f32.mrf.mxu1  ;;  %v13246_v1 = vld [vmem:[#allocation70_spill] sm:$0xff] }
 0x130   :  { %v7778_v45 = vpop.f32.mrf.mxu0  ;;  %8077 = vmatmul.mubr.f32.gmra.mxu0 %v13239_v56  ;;  %v13250_v56 = vld [vmem:[#allocation79_spill] sm:$0xff] }
 0x131   :  { %v10105_v19 = vadd.f32 %v1283_v61, %v979_v63  ;;  %v1000_v57 = vadd.f32 %v7778_v45, %v9949_v44  ;;  %v7828_v28 = vpop.f32.mrf.mxu1  ;;  %8127 = vmatmul.mubr.f32.gmra.mxu1 %v13240_v53  ;;  %8079 = vmatprep.mubr.f32.mxu0 %v13241_v10  ;;  %v13248_v63 = vld [vmem:[#allocation71_spill] sm:$0xff]  ;;  %v13252_v53 = vld [vmem:[#allocation80_spill] sm:$0xff] }
 0x132   :  { %v992_v15 = vpop.f32.mrf.mxu0  ;;  %8129 = vmatprep.mubr.f32.mxu1 %v13242_v29 }
 0x133   :  { %v10111_v8 = vadd.f32 %v7828_v28, %v1000_v57  ;;  %v993_v43 = vadd.f32 %v992_v15, %v9953_v18  ;;  %v1299_v48 = vpop.f32.mrf.mxu1  ;;  %v13251_v57 = vld [vmem:[#allocation72_spill] sm:$0xff] }
 0x134   :  { %v7781_v31 = vpop.f32.mrf.mxu0  ;;  %8080 = vmatmul.mubr.f32.gmra.mxu0 %v13243_v11  ;;  %v13255_v11 = vld [vmem:[#allocation85_spill] sm:$0xff] }
 0x135   :  { %v10115_v39 = vadd.f32 %v1299_v48, %v993_v43  ;;  %v1014_v44 = vadd.f32 %v7781_v31, %v9959_v22  ;;  %v7831_v37 = vpop.f32.mrf.mxu1  ;;  %8130 = vmatmul.mubr.f32.gmra.mxu1 %v13245_v42  ;;  %8082 = vmatprep.mubr.f32.mxu0 %v13246_v1  ;;  %v13253_v43 = vld [vmem:[#allocation81_spill] sm:$0xff]  ;;  %v13257_v42 = vld [vmem:[#allocation87_spill] sm:$0xff] }
 0x136   :  { %v1006_v36 = vpop.f32.mrf.mxu0  ;;  %8132 = vmatprep.mubr.f32.mxu1 %v13247_v20 }
 0x137   :  { %13244 = vst [vmem:[#allocation73_spill] sm:$0xff] %v10115_v39  ;;  %v10121_v62 = vadd.f32 %v7831_v37, %v1014_v44  ;;  %v1007_v18 = vadd.f32 %v1006_v36, %v9963_v2  ;;  %v1315_v26 = vpop.f32.mrf.mxu1  ;;  %v13256_v44 = vld [vmem:[#allocation83_spill] sm:$0xff] }
 0x138   :  { %v7784_v59 = vpop.f32.mrf.mxu0  ;;  %8083 = vmatmul.mubr.f32.gmra.mxu0 %v13248_v63  ;;  %v13260_v63 = vld [vmem:[#allocation93_spill] sm:$0xff] }
 0x139   :  { %v10125_v61 = vadd.f32 %v1315_v26, %v1007_v18  ;;  %v1028_v22 = vadd.f32 %v7784_v59, %v9969_v46  ;;  %v7834_v45 = vpop.f32.mrf.mxu1  ;;  %8133 = vmatmul.mubr.f32.gmra.mxu1 %v13250_v56  ;;  %8085 = vmatprep.mubr.f32.mxu0 %v13251_v57  ;;  %v13258_v18 = vld [vmem:[#allocation88_spill] sm:$0xff]  ;;  %v13262_v56 = vld [vmem:[#allocation95_spill] sm:$0xff] }
 0x13a   :  { %v1020_v28 = vpop.f32.mrf.mxu0  ;;  %8135 = vmatprep.mubr.f32.mxu1 %v13252_v53 }
 0x13b   :  { %13249 = vst [vmem:[#allocation13_spill] sm:$0xff] %v10125_v61  ;;  %v10131_v10 = vadd.f32 %v7834_v45, %v1028_v22  ;;  %v1021_v2 = vadd.f32 %v1020_v28, %v9973_v6  ;;  %v1331_v15 = vpop.f32.mrf.mxu1  ;;  %v13261_v22 = vld [vmem:[#allocation90_spill] sm:$0xff] }
 0x13c   :  { %v7787_v29 = vpop.f32.mrf.mxu0  ;;  %8086 = vmatmul.mubr.f32.gmra.mxu0 %v13253_v43  ;;  %v13265_v43 = vld [vmem:[#allocation98_spill] sm:$0xff] }
 0x13d   :  { %v10135_v48 = vadd.f32 %v1331_v15, %v1021_v2  ;;  %v1042_v46 = vadd.f32 %v7787_v29, %v9979_v54  ;;  %v7837_v31 = vpop.f32.mrf.mxu1  ;;  %8136 = vmatmul.mubr.f32.gmra.mxu1 %v13255_v11  ;;  %8088 = vmatprep.mubr.f32.mxu0 %v13256_v44  ;;  %v13263_v2 = vld [vmem:[#allocation94_spill] sm:$0xff]  ;;  %v13267_v11 = vld [vmem:[#allocation101_spill] sm:$0xff] }
 0x13e   :  { %v1034_v37 = vpop.f32.mrf.mxu0  ;;  %8138 = vmatprep.mubr.f32.mxu1 %v13257_v42 }
 0x13f   :  { %13254 = vst [vmem:[#allocation14_spill] sm:$0xff] %v10135_v48  ;;  %v10141_v1 = vadd.f32 %v7837_v31, %v1042_v46  ;;  %v1035_v6 = vadd.f32 %v1034_v37, %v9983_v35  ;;  %v1347_v36 = vpop.f32.mrf.mxu1  ;;  %v13266_v46 = vld [vmem:[#allocation96_spill] sm:$0xff] }
 0x140   :  { %v7790_v20 = vpop.f32.mrf.mxu0  ;;  %8089 = vmatmul.mubr.f32.gmra.mxu0 %v13258_v18  ;;  %v13270_v18 = vld [vmem:[#allocation104_spill] sm:$0xff] }
 0x141   :  { %v10145_v26 = vadd.f32 %v1347_v36, %v1035_v6  ;;  %v1056_v54 = vadd.f32 %v7790_v20, %v9989_v49  ;;  %v7840_v59 = vpop.f32.mrf.mxu1  ;;  %8139 = vmatmul.mubr.f32.gmra.mxu1 %v13260_v63  ;;  %8091 = vmatprep.mubr.f32.mxu0 %v13261_v22  ;;  %v13268_v6 = vld [vmem:[#allocation99_spill] sm:$0xff] }
 0x142   :  { %v1048_v45 = vpop.f32.mrf.mxu0  ;;  %8141 = vmatprep.mubr.f32.mxu1 %v13262_v56  ;;  %v13272_v63 = vld [vmem:[#allocation107_spill] sm:$0xff] }
 0x143   :  { %13259 = vst [vmem:[#allocation15_spill] sm:$0xff] %v10145_v26  ;;  %v10151_v57 = vadd.f32 %v7840_v59, %v1056_v54  ;;  %v1049_v35 = vadd.f32 %v1048_v45, %v9993_v55  ;;  %v1363_v28 = vpop.f32.mrf.mxu1  ;;  %v13271_v54 = vld [vmem:[#allocation102_spill] sm:$0xff] }
 0x144   :  { %v7793_v53 = vpop.f32.mrf.mxu0  ;;  %8092 = vmatmul.mubr.f32.gmra.mxu0 %v13263_v2  ;;  %v13275_v2 = vld [vmem:[#allocation108_spill] sm:$0xff] }
 0x145   :  { %v10155_v15 = vadd.f32 %v1363_v28, %v1049_v35  ;;  %v1070_v49 = vadd.f32 %v7793_v53, %v9999_v47  ;;  %v7843_v29 = vpop.f32.mrf.mxu1  ;;  %8142 = vmatmul.mubr.f32.gmra.mxu1 %v13265_v43  ;;  %8094 = vmatprep.mubr.f32.mxu0 %v13266_v46  ;;  %v13273_v35 = vld [vmem:[#allocation105_spill] sm:$0xff] }
 0x146   :  { %v1062_v31 = vpop.f32.mrf.mxu0  ;;  %8144 = vmatprep.mubr.f32.mxu1 %v13267_v11  ;;  %v13277_v11 = vld [vmem:[#allocation6_spill] sm:$0xff] }
 0x147   :  { %13264 = vst [vmem:[#allocation17_spill] sm:$0xff] %v10155_v15  ;;  %v10161_v44 = vadd.f32 %v7843_v29, %v1070_v49  ;;  %v1063_v55 = vadd.f32 %v1062_v31, %v10003_v50  ;;  %v1379_v37 = vpop.f32.mrf.mxu1  ;;  %v13276_v49 = vld [vmem:[#allocation5_spill] sm:$0xff] }
 0x148   :  { %v7796_v42 = vpop.f32.mrf.mxu0  ;;  %8095 = vmatmul.mubr.f32.gmra.mxu0 %v13268_v6 }
 0x149   :  { %v10165_v36 = vadd.f32 %v1379_v37, %v1063_v55  ;;  %v1084_v47 = vadd.f32 %v7796_v42, %v10009_v24  ;;  %v7846_v20 = vpop.f32.mrf.mxu1  ;;  %8145 = vmatmul.mubr.f32.gmra.mxu1 %v13270_v18  ;;  %8097 = vmatprep.mubr.f32.mxu0 %v13271_v54  ;;  %v13279_v42 = vld [vmem:[#allocation7_spill] sm:$0xff]  ;;  %v13281_v18 = vld [vmem:[#allocation8_spill] sm:$0xff] }
 0x14a   :  { %v1076_v59 = vpop.f32.mrf.mxu0  ;;  %8147 = vmatprep.mubr.f32.mxu1 %v13272_v63 }
 0x14b   :  { %13269 = vst [vmem:[#allocation18_spill] sm:$0xff] %v10165_v36  ;;  %v10171_v22 = vadd.f32 %v7846_v20, %v1084_v47  ;;  %v1077_v50 = vadd.f32 %v1076_v59, %v10013_v5  ;;  %v1395_v45 = vpop.f32.mrf.mxu1 }
 0x14c   :  { %v7799_v56 = vpop.f32.mrf.mxu0  ;;  %8098 = vmatmul.mubr.f32.gmra.mxu0 %v13273_v35 }
 0x14d   :  { %v10175_v28 = vadd.f32 %v1395_v45, %v1077_v50  ;;  %v1098_v24 = vadd.f32 %v7799_v56, %v10019_v52  ;;  %v7849_v53 = vpop.f32.mrf.mxu1  ;;  %8148 = vmatmul.mubr.f32.gmra.mxu1 %v13275_v2  ;;  %8152 = vmatprep.mubr.f32.mxu0 %v13276_v49 }
 0x14e   :  { %v1090_v29 = vpop.f32.mrf.mxu0  ;;  %8202 = vmatprep.mubr.f32.mxu1 %v13276_v49  ;;  %v13286_v49 = vld [vmem:[#allocation11_spill] sm:$0xff] }
 0x14f   :  { %13274 = vst [vmem:[#allocation19_spill] sm:$0xff] %v10175_v28  ;;  %v10181_v43 = vadd.f32 %v7849_v53, %v1098_v24  ;;  %v1091_v5 = vadd.f32 %v1090_v29, %v10023_v3  ;;  %v1411_v46 = vpop.f32.mrf.mxu1  ;;  %v13284_v24 = vld [vmem:[#allocation10_spill] sm:$0xff] }
 0x150   :  { %v7854_v31 = vpop.f32.mrf.mxu0  ;;  %8153 = vmatmul.mubr.f32.vlgmr.msra.gmra.mxu0 %v13277_v11 }
 0x151   :  { %v10185_v55 = vadd.f32 %v1411_v46, %v1091_v5  ;;  %v1500_v52 = vadd.f32 %v7854_v31, %v10030_v27  ;;  %v7904_v37 = vpop.f32.mrf.mxu1  ;;  %8203 = vmatmul.mubr.f32.vlgmr.msra.gmra.mxu1 %v13277_v11  ;;  %8155 = vmatprep.mubr.f32.mxu0 %v13279_v42  ;;  %v13282_v27 = vld [vmem:[#allocation9_spill] sm:$0xff]  ;;  %v13288_v11 = vld [vmem:[#allocation20_spill] sm:$0xff] }
 0x152   :  { %v10190_v6 = vpop.f32.mrf.mxu0  ;;  %8205 = vmatprep.mubr.f32.mxu1 %v13279_v42  ;;  %v13290_v42 = vld [vmem:[#allocation21_spill] sm:$0xff] }
 0x153   :  { %13278 = vst [vmem:[#allocation23_spill] sm:$0xff] %v10185_v55  ;;  %v10193_v47 = vadd.f32 %v7904_v37, %v1500_v52  ;;  %v10195_v3 = vpop.f32.mrf.mxu1 }
 0x154   :  { %v7857_v20 = vpop.f32.mrf.mxu0  ;;  %8156 = vmatmul.mubr.f32.gmra.mxu0 %v13281_v18 }
 0x155   :  { %13280 = vst [vmem:[#allocation41_spill] sm:$0xff] %v10193_v47  ;;  %v1512_v54 = vadd.f32 %v7857_v20, %v10041_v12  ;;  %v7907_v59 = vpop.f32.mrf.mxu1  ;;  %8206 = vmatmul.mubr.f32.gmra.mxu1 %v13281_v18  ;;  %8158 = vmatprep.mubr.f32.mxu0 %v13282_v27 }
 0x156   :  { %v1505_v63 = vpop.f32.mrf.mxu0  ;;  %8208 = vmatprep.mubr.f32.mxu1 %v13282_v27  ;;  %v13292_v27 = vld [vmem:[#allocation22_spill] sm:$0xff] }
 0x157   :  { %v10202_v50 = vadd.f32 %v7907_v59, %v1512_v54  ;;  %v1506_v45 = vadd.f32 %v1505_v63, %v10045_v30  ;;  %v1763_v56 = vpop.f32.mrf.mxu1 }
 0x158   :  { %v7860_v35 = vpop.f32.mrf.mxu0  ;;  %8159 = vmatmul.mubr.f32.gmra.mxu0 %v13284_v24 }
 0x159   :  { %13283 = vst [vmem:[#allocation42_spill] sm:$0xff] %v10202_v50  ;;  %v10206_v53 = vadd.f32 %v1763_v56, %v1506_v45  ;;  %v1524_v12 = vadd.f32 %v7860_v35, %v10051_v40  ;;  %v7910_v2 = vpop.f32.mrf.mxu1  ;;  %8209 = vmatmul.mubr.f32.gmra.mxu1 %v13284_v24  ;;  %8161 = vmatprep.mubr.f32.mxu0 %v13286_v49  ;;  %v13294_v56 = vld [vmem:[#allocation25_spill] sm:$0xff] }
 0x15a   :  { %v1517_v29 = vpop.f32.mrf.mxu0  ;;  %8211 = vmatprep.mubr.f32.mxu1 %v13286_v49  ;;  %v13296_v49 = vld [vmem:[#allocation26_spill] sm:$0xff] }
 0x15b   :  { %13285 = vst [vmem:[#allocation48_spill] sm:$0xff] %v10206_v53  ;;  %v10212_v5 = vadd.f32 %v7910_v2, %v1524_v12  ;;  %v1518_v30 = vadd.f32 %v1517_v29, %v10055_v33  ;;  %v1775_v46 = vpop.f32.mrf.mxu1 }
 0x15c   :  { %v7863_v31 = vpop.f32.mrf.mxu0  ;;  %8162 = vmatmul.mubr.f32.gmra.mxu0 %v13288_v11 }
 0x15d   :  { %13287 = vst [vmem:[#allocation50_spill] sm:$0xff] %v10212_v5  ;;  %v10216_v52 = vadd.f32 %v1775_v46, %v1518_v30  ;;  %v1536_v40 = vadd.f32 %v7863_v31, %v10061_v16  ;;  %v7913_v37 = vpop.f32.mrf.mxu1  ;;  %8212 = vmatmul.mubr.f32.gmra.mxu1 %v13288_v11  ;;  %8164 = vmatprep.mubr.f32.mxu0 %v13290_v42  ;;  %v13298_v46 = vld [vmem:[#allocation32_spill] sm:$0xff] }
 0x15e   :  { %v1529_v20 = vpop.f32.mrf.mxu0  ;;  %8214 = vmatprep.mubr.f32.mxu1 %v13290_v42  ;;  %v13300_v42 = vld [vmem:[#allocation35_spill] sm:$0xff] }
 0x15f   :  { %13289 = vst [vmem:[#allocation55_spill] sm:$0xff] %v10216_v52  ;;  %v10222_v18 = vadd.f32 %v7913_v37, %v1536_v40  ;;  %v1530_v33 = vadd.f32 %v1529_v20, %v10065_v23  ;;  %v1787_v54 = vpop.f32.mrf.mxu1 }
 0x160   :  { %v7866_v59 = vpop.f32.mrf.mxu0  ;;  %8165 = vmatmul.mubr.f32.gmra.mxu0 %v13292_v27 }
 0x161   :  { %13291 = vst [vmem:[#allocation59_spill] sm:$0xff] %v10222_v18  ;;  %v10226_v63 = vadd.f32 %v1787_v54, %v1530_v33  ;;  %v1548_v16 = vadd.f32 %v7866_v59, %v10071_v38  ;;  %v7916_v45 = vpop.f32.mrf.mxu1  ;;  %8215 = vmatmul.mubr.f32.gmra.mxu1 %v13292_v27  ;;  %8167 = vmatprep.mubr.f32.mxu0 %v13294_v56  ;;  %v13302_v54 = vld [vmem:[#allocation40_spill] sm:$0xff] }
 0x162   :  { %v1541_v35 = vpop.f32.mrf.mxu0  ;;  %8217 = vmatprep.mubr.f32.mxu1 %v13294_v56  ;;  %v13304_v56 = vld [vmem:[#allocation47_spill] sm:$0xff] }
 0x163   :  { %13293 = vst [vmem:[#allocation63_spill] sm:$0xff] %v10226_v63  ;;  %v10232_v24 = vadd.f32 %v7916_v45, %v1548_v16  ;;  %v1542_v23 = vadd.f32 %v1541_v35, %v10075_v4  ;;  %v1799_v12 = vpop.f32.mrf.mxu1 }
 0x164   :  { %v7869_v2 = vpop.f32.mrf.mxu0  ;;  %8168 = vmatmul.mubr.f32.gmra.mxu0 %v13296_v49 }
 0x165   :  { %13295 = vst [vmem:[#allocation64_spill] sm:$0xff] %v10232_v24  ;;  %v10236_v29 = vadd.f32 %v1799_v12, %v1542_v23  ;;  %v1560_v38 = vadd.f32 %v7869_v2, %v10081_v41  ;;  %v7919_v30 = vpop.f32.mrf.mxu1  ;;  %8218 = vmatmul.mubr.f32.gmra.mxu1 %v13296_v49  ;;  %8170 = vmatprep.mubr.f32.mxu0 %v13298_v46  ;;  %v13306_v12 = vld [vmem:[#allocation49_spill] sm:$0xff] }
 0x166   :  { %v1553_v31 = vpop.f32.mrf.mxu0  ;;  %8220 = vmatprep.mubr.f32.mxu1 %v13298_v46 }
 0x167   :  { %13297 = vst [vmem:[#allocation74_spill] sm:$0xff] %v10236_v29  ;;  %v10242_v11 = vadd.f32 %v7919_v30, %v1560_v38  ;;  %v1554_v4 = vadd.f32 %v1553_v31, %v10085_v21  ;;  %v1811_v40 = vpop.f32.mrf.mxu1  ;;  %v1494_v30 = vadd.f32 %v10190_v6, %v10035_v14  ;;  %v13308_v31 = vld [vmem:[#allocation52_spill] sm:$0xff] }
 0x168   :  { %v7872_v37 = vpop.f32.mrf.mxu0  ;;  %8171 = vmatmul.mubr.f32.gmra.mxu0 %v13300_v42 }
 0x169   :  { %13299 = vst [vmem:[#allocation77_spill] sm:$0xff] %v10242_v11  ;;  %v10246_v20 = vadd.f32 %v1811_v40, %v1554_v4  ;;  %v1572_v41 = vadd.f32 %v7872_v37, %v10091_v51  ;;  %v7922_v33 = vpop.f32.mrf.mxu1  ;;  %8221 = vmatmul.mubr.f32.gmra.mxu1 %v13300_v42  ;;  %8173 = vmatprep.mubr.f32.mxu0 %v13302_v54  ;;  %v13310_v37 = vld [vmem:[#allocation54_spill] sm:$0xff] }
 0x16a   :  { %v1565_v59 = vpop.f32.mrf.mxu0  ;;  %8223 = vmatprep.mubr.f32.mxu1 %v13302_v54  ;;  %v1752_v14 = vadd.f32 %v10195_v3, %v1494_v30 }
 0x16b   :  { %13301 = vst [vmem:[#allocation82_spill] sm:$0xff] %v10246_v20  ;;  %v10252_v27 = vadd.f32 %v7922_v33, %v1572_v41  ;;  %v1566_v21 = vadd.f32 %v1565_v59, %v10095_v32  ;;  %v1823_v16 = vpop.f32.mrf.mxu1  ;;  %v13314_v33 = vld [vmem:[#allocation58_spill] sm:$0xff] }
 0x16c   :  { %v7875_v45 = vpop.f32.mrf.mxu0  ;;  %8174 = vmatmul.mubr.f32.gmra.mxu0 %v13304_v56  ;;  %v13315_v59 = vld [vmem:[#allocation62_spill] sm:$0xff]  ;;  %v3736_v3 = vsel %vm3734_vm2, %v1752_v14, 0 }
 0x16d   :  { %13303 = vst [vmem:[#allocation84_spill] sm:$0xff] %v10252_v27  ;;  %v10256_v35 = vadd.f32 %v1823_v16, %v1566_v21  ;;  %v1584_v51 = vadd.f32 %v7875_v45, %v10101_v7  ;;  %v7925_v23 = vpop.f32.mrf.mxu1  ;;  %8224 = vmatmul.mubr.f32.gmra.mxu1 %v13304_v56  ;;  %8176 = vmatprep.mubr.f32.mxu0 %v13306_v12 }
 0x16e   :  { %v1577_v2 = vpop.f32.mrf.mxu0  ;;  %8226 = vmatprep.mubr.f32.mxu1 %v13306_v12  ;;  %v13320_v12 = vld [vmem:[#allocation68_spill] sm:$0xff] }
 0x16f   :  { %13305 = vst [vmem:[#allocation86_spill] sm:$0xff] %v10256_v35  ;;  %v10262_v49 = vadd.f32 %v7925_v23, %v1584_v51  ;;  %v1578_v32 = vadd.f32 %v1577_v2, %v10105_v19  ;;  %v1835_v38 = vpop.f32.mrf.mxu1  ;;  %v13319_v51 = vld [vmem:[#allocation65_spill] sm:$0xff] }
 0x170   :  { %v7878_v46 = vpop.f32.mrf.mxu0  ;;  %8177 = vmatmul.mubr.f32.gmra.mxu0 %v13308_v31 }
 0x171   :  { %13307 = vst [vmem:[#allocation89_spill] sm:$0xff] %v10262_v49  ;;  %v10268_v7 = vadd.f32 %v1835_v38, %v1578_v32  ;;  %v1596_v4 = vadd.f32 %v7878_v46, %v10111_v8  ;;  %v7928_v40 = vpop.f32.mrf.mxu1  ;;  %8227 = vmatmul.mubr.f32.gmra.mxu1 %v13308_v31  ;;  %8179 = vmatprep.mubr.f32.mxu0 %v13310_v37  ;;  %v10300_v32 = vand.u32 4294901760, %v3736_v3 }
 0x172   :  { %v10273_v42 = vpop.f32.mrf.mxu0  ;;  %8229 = vmatprep.mubr.f32.mxu1 %v13310_v37 }
 0x173   :  { %13309 = vst [vmem:[#allocation91_spill] sm:$0xff] %v10268_v7  ;;  %13311 = vst [vmem:[#allocation92_spill] sm:$0xff] %v10273_v42  ;;  %v10276_v19 = vadd.f32 %v7928_v40, %v1596_v4  ;;  %v10278_v41 = vpop.f32.mrf.mxu1  ;;  %v13325_v4 = vld [vmem:[#allocation76_spill] sm:$0xff]  ;;  %v10314_v37 = vsub.f32 %v3736_v3, %v10300_v32 }
 0x174   :  { %13313 = vst [vmem:[#allocation100_spill] sm:$0xff] %v10278_v41  ;;  %v7881_v6 = vpop.f32.mrf.mxu0  ;;  %8180 = vmatmul.mubr.f32.gmra.mxu0 %v13314_v33  ;;  %13322 = vst [vmem:[#allocation24_spill] sm:$0xff] %v10300_v32 }
 0x175   :  { %13312 = vst [vmem:[#allocation97_spill] sm:$0xff] %v10276_v19  ;;  %v1608_v8 = vadd.f32 %v7881_v6, %v10121_v62  ;;  %v7931_v54 = vpop.f32.mrf.mxu1  ;;  %8230 = vmatmul.mubr.f32.gmra.mxu1 %v13314_v33  ;;  %8182 = vmatprep.mubr.f32.mxu0 %v13315_v59  ;;  %13327 = vst [vmem:[#allocation28_spill] sm:$0xff] %v10314_v37  ;;  %v12902_v3 = vand.u32 4294901760, %v10314_v37 }
 0x176   :  { %v10285_v21 = vpop.f32.mrf.mxu0  ;;  %8232 = vmatprep.mubr.f32.mxu1 %v13315_v59 }
 0x177   :  { %13316 = vst [vmem:[#allocation103_spill] sm:$0xff] %v10285_v21  ;;  %v10288_v16 = vadd.f32 %v7931_v54, %v1608_v8  ;;  %v10290_v45 = vpop.f32.mrf.mxu1 }
 0x178   :  { %13318 = vst [vmem:[#allocation12_spill] sm:$0xff] %v10290_v45  ;;  %v7884_v56 = vpop.f32.mrf.mxu0  ;;  %8183 = vmatmul.mubr.f32.gmra.mxu0 %v13319_v51 }
 0x179   :  { %13317 = vst [vmem:[#allocation106_spill] sm:$0xff] %v10288_v16  ;;  %v1620_v62 = vadd.f32 %v7884_v56, %v10131_v10  ;;  %v7934_v23 = vpop.f32.mrf.mxu1  ;;  %8233 = vmatmul.mubr.f32.gmra.mxu1 %v13319_v51  ;;  %8185 = vmatprep.mubr.f32.mxu0 %v13320_v12 }
 0x17a   :  { %v10297_v2 = vpop.f32.mrf.mxu0  ;;  %8235 = vmatprep.mubr.f32.mxu1 %v13320_v12 }
 0x17b   :  { %13321 = vst [vmem:[#allocation16_spill] sm:$0xff] %v10297_v2  ;;  %v10302_v38 = vadd.f32 %v7934_v23, %v1620_v62  ;;  %v10304_v30 = vpop.f32.mrf.mxu1  ;;  %v3915_v23 = vsub.f32 %v10314_v37, %v12902_v3 }
 0x17c   :  { %13324 = vst [vmem:[#allocation27_spill] sm:$0xff] %v10304_v30  ;;  %v7887_v46 = vpop.f32.mrf.mxu0  ;;  %8186 = vmatmul.mubr.f32.gmra.mxu0 %v13188_v9 }
 0x17d   :  { %13323 = vst [vmem:[#allocation29_spill] sm:$0xff] %v10302_v38  ;;  %v1632_v10 = vadd.f32 %v7887_v46, %v10141_v1  ;;  %v7937_v31 = vpop.f32.mrf.mxu1  ;;  %8236 = vmatmul.mubr.f32.gmra.mxu1 %v13188_v9  ;;  %8188 = vmatprep.mubr.f32.mxu0 %v13325_v4 }
 0x17e   :  { %v10310_v40 = vpop.f32.mrf.mxu0  ;;  %8238 = vmatprep.mubr.f32.mxu1 %v13325_v4 }
 0x17f   :  { %13326 = vst [vmem:[#allocation33_spill] sm:$0xff] %v10310_v40  ;;  %v10316_v14 = vadd.f32 %v7937_v31, %v1632_v10  ;;  %v10318_v6 = vpop.f32.mrf.mxu1  ;;  %v3916_v31 = vand.u32 4294901760, %v3915_v23 }
 0x180   :  { %13329 = vst [vmem:[#allocation30_spill] sm:$0xff] %v10318_v6  ;;  %v7890_v33 = vpop.f32.mrf.mxu0  ;;  %8189 = vmatmul.mubr.f32.gmra.mxu0 %v9540_v60 }
 0x181   :  { %13328 = vst [vmem:[#allocation34_spill] sm:$0xff] %v10316_v14  ;;  %v1644_v1 = vadd.f32 %v7890_v33, %v10151_v57  ;;  %v7940_v8 = vpop.f32.mrf.mxu1  ;;  %8239 = vmatmul.mubr.f32.gmra.mxu1 %v9540_v60  ;;  %8191 = vmatprep.mubr.f32.mxu0 %v9548_v13 }
 0x182   :  { %v10324_v9 = vpop.f32.mrf.mxu0  ;;  %8241 = vmatprep.mubr.f32.mxu1 %v9548_v13 }
 0x183   :  { %13330 = vst [vmem:[#allocation36_spill] sm:$0xff] %v10324_v9  ;;  %v10327_v54 = vadd.f32 %v7940_v8, %v1644_v1  ;;  %v10329_v59 = vpop.f32.mrf.mxu1 }
 0x184   :  { %13332 = vst [vmem:[#allocation37_spill] sm:$0xff] %v10329_v59  ;;  %v7893_v56 = vpop.f32.mrf.mxu0  ;;  %8192 = vmatmul.mubr.f32.gmra.mxu0 %v9575_v34 }
 0x185   :  { %13331 = vst [vmem:[#allocation31_spill] sm:$0xff] %v10327_v54  ;;  %v1656_v57 = vadd.f32 %v7893_v56, %v10161_v44  ;;  %v7943_v51 = vpop.f32.mrf.mxu1  ;;  %8242 = vmatmul.mubr.f32.gmra.mxu1 %v9575_v34  ;;  %8194 = vmatprep.mubr.f32.mxu0 %v9584_v58 }
 0x186   :  { %v10336_v60 = vpop.f32.mrf.mxu0  ;;  %8244 = vmatprep.mubr.f32.mxu1 %v9584_v58 }
 0x187   :  { %13333 = vst [vmem:[#allocation38_spill] sm:$0xff] %v10336_v60  ;;  %v10339_v13 = vadd.f32 %v7943_v51, %v1656_v57  ;;  %v10341_v62 = vpop.f32.mrf.mxu1 }
 0x188   :  { %13335 = vst [vmem:[#allocation39_spill] sm:$0xff] %v10341_v62  ;;  %v7896_v12 = vpop.f32.mrf.mxu0  ;;  %8195 = vmatmul.mubr.f32.gmra.mxu0 %v9607_v0 }
 0x189   :  { %13334 = vst [vmem:[#allocation43_spill] sm:$0xff] %v10339_v13  ;;  %v1668_v44 = vadd.f32 %v7896_v12, %v10171_v22  ;;  %v7946_v34 = vpop.f32.mrf.mxu1  ;;  %8245 = vmatmul.mubr.f32.gmra.mxu1 %v9607_v0  ;;  %8197 = vmatprep.mubr.f32.mxu0 %v9617_v25 }
 0x18a   :  { %v10350_v46 = vpop.f32.mrf.mxu0  ;;  %8247 = vmatprep.mubr.f32.mxu1 %v9617_v25  ;;  %v10366_v25 = vld [vmem:[%s12727_s4] ss:$0 sm:$0xff] }
 0x18b   :  { %13336 = vst [vmem:[#allocation45_spill] sm:$0xff] %v10350_v46  ;;  %v10353_v58 = vadd.f32 %v7946_v34, %v1668_v44  ;;  %v10355_v10 = vpop.f32.mrf.mxu1 }
 0x18c   :  { %13338 = vst [vmem:[#allocation46_spill] sm:$0xff] %v10355_v10  ;;  %v7899_v4 = vpop.f32.mrf.mxu0  ;;  %8198 = vmatmul.mubr.f32.gmra.mxu0 %v9632_v17 }
 0x18d   :  { %13337 = vst [vmem:[#allocation44_spill] sm:$0xff] %v10353_v58  ;;  %v1680_v33 = vadd.f32 %v7899_v4, %v10181_v43  ;;  %v7949_v22 = vpop.f32.mrf.mxu1  ;;  %8248 = vmatmul.mubr.f32.gmra.mxu1 %v9632_v17  ;;  %8282 = vmatprep.mubr.f32.mxu0 %v3916_v31 }
 0x18e   :  { %v10360_v0 = vpop.f32.mrf.mxu0  ;;  %8338 = vmatprep.mubr.f32.mxu1 %v10300_v32 }
 0x18f   :  { %13339 = vst [vmem:[#allocation51_spill] sm:$0xff] %v10360_v0  ;;  %v10368_v1 = vadd.f32 %v7949_v22, %v1680_v33  ;;  %v10370_v8 = vpop.f32.mrf.mxu1 }
 0x190   :  { %13341 = vst [vmem:[#allocation53_spill] sm:$0xff] %v10370_v8  ;;  %v7954_v56 = vpop.f32.mrf.mxu0 }
 0x191   :  { %13340 = vst [vmem:[#allocation56_spill] sm:$0xff] %v10368_v1  ;;  %v2035_v43 = vadd.f32 %v7954_v56, %v10366_v25  ;;  %v8004_v57 = vpop.f32.mrf.mxu1 }
 0x192   :  { %v10373_v51 = vpop.f32.mrf.mxu0 }
 0x193   :  { %13342 = vst [vmem:[#allocation60_spill] sm:$0xff] %v10373_v51  ;;  %v10375_v17 = vadd.f32 %v8004_v57, %v2035_v43  ;;  %v10377_v23 = vpop.f32.mrf.mxu1 }
 0x194   :  { %13343 = vst [vmem:[#allocation57_spill] sm:$0xff] %v10377_v23  ;;  %v7957_v12 = vpop.f32.mrf.mxu0 }
 0x195   :  { %v2055_v44 = vadd.f32 %v7957_v12, %v10366_v25  ;;  %v8007_v34 = vpop.f32.mrf.mxu1 }
 0x196   :  { %v10380_v31 = vpop.f32.mrf.mxu0 }
 0x197   :  { %13344 = vst [vmem:[#allocation66_spill] sm:$0xff] %v10380_v31  ;;  %v10382_v4 = vadd.f32 %v8007_v34, %v2055_v44  ;;  %v10384_v33 = vpop.f32.mrf.mxu1 }
 0x198   :  { %13345 = vst [vmem:[#allocation61_spill] sm:$0xff] %v10384_v33  ;;  %v7960_v22 = vpop.f32.mrf.mxu0 }
 0x199   :  { %v2075_v56 = vadd.f32 %v7960_v22, %v10366_v25  ;;  %v8010_v3 = vpop.f32.mrf.mxu1 }
 0x19a   :  { %v10387_v1 = vpop.f32.mrf.mxu0 }
 0x19b   :  { %v10389_v43 = vadd.f32 %v8010_v3, %v2075_v56  ;;  %v10391_v57 = vpop.f32.mrf.mxu1 }
 0x19c   :  { %v7963_v58 = vpop.f32.mrf.mxu0 }
 0x19d   :  { %v2095_v12 = vadd.f32 %v7963_v58, %v10366_v25  ;;  %v8013_v8 = vpop.f32.mrf.mxu1 }
 0x19e   :  { %v10394_v13 = vpop.f32.mrf.mxu0 }
 0x19f   :  { %v10396_v44 = vadd.f32 %v8013_v8, %v2095_v12  ;;  %v10398_v34 = vpop.f32.mrf.mxu1 }
 0x1a0   :  { %v7966_v0 = vpop.f32.mrf.mxu0 }
 0x1a1   :  { %v2115_v22 = vadd.f32 %v7966_v0, %v10366_v25  ;;  %v8016_v55 = vpop.f32.mrf.mxu1 }
 0x1a2   :  { %v10401_v10 = vpop.f32.mrf.mxu0 }
 0x1a3   :  { %v10403_v3 = vadd.f32 %v8016_v55, %v2115_v22  ;;  %v10405_v56 = vpop.f32.mrf.mxu1 }
 0x1a4   :  { %v7969_v54 = vpop.f32.mrf.mxu0 }
 0x1a5   :  { %v2135_v58 = vadd.f32 %v7969_v54, %v10366_v25  ;;  %v8019_v46 = vpop.f32.mrf.mxu1 }
 0x1a6   :  { %v10408_v28 = vpop.f32.mrf.mxu0 }
 0x1a7   :  { %v10410_v8 = vadd.f32 %v8019_v46, %v2135_v58  ;;  %v10412_v12 = vpop.f32.mrf.mxu1 }
 0x1a8   :  { %v7972_v62 = vpop.f32.mrf.mxu0 }
 0x1a9   :  { %v2155_v0 = vadd.f32 %v7972_v62, %v10366_v25  ;;  %v8022_v14 = vpop.f32.mrf.mxu1 }
 0x1aa   :  { %v10415_v60 = vpop.f32.mrf.mxu0 }
 0x1ab   :  { %v10417_v55 = vadd.f32 %v8022_v14, %v2155_v0  ;;  %v10419_v22 = vpop.f32.mrf.mxu1 }
 0x1ac   :  { %v7975_v36 = vpop.f32.mrf.mxu0 }
 0x1ad   :  { %v2175_v54 = vadd.f32 %v7975_v36, %v10366_v25  ;;  %v8025_v59 = vpop.f32.mrf.mxu1 }
 0x1ae   :  { %v10422_v38 = vpop.f32.mrf.mxu0 }
 0x1af   :  { %v10424_v46 = vadd.f32 %v8025_v59, %v2175_v54  ;;  %v10426_v58 = vpop.f32.mrf.mxu1 }
 0x1b0   :  { %v7978_v9 = vpop.f32.mrf.mxu0 }
 0x1b1   :  { %v2195_v62 = vadd.f32 %v7978_v9, %v10366_v25  ;;  %v8028_v15 = vpop.f32.mrf.mxu1 }
 0x1b2   :  { %v10429_v6 = vpop.f32.mrf.mxu0 }
 0x1b3   :  { %v10431_v14 = vadd.f32 %v8028_v15, %v2195_v62  ;;  %v10433_v0 = vpop.f32.mrf.mxu1 }
 0x1b4   :  { %v7981_v16 = vpop.f32.mrf.mxu0 }
 0x1b5   :  { %v2215_v36 = vadd.f32 %v7981_v16, %v10366_v25  ;;  %v8031_v40 = vpop.f32.mrf.mxu1 }
 0x1b6   :  { %v10436_v26 = vpop.f32.mrf.mxu0 }
 0x1b7   :  { %v10438_v59 = vadd.f32 %v8031_v40, %v2215_v36  ;;  %v10440_v54 = vpop.f32.mrf.mxu1 }
 0x1b8   :  { %v7984_v30 = vpop.f32.mrf.mxu0 }
 0x1b9   :  { %v2235_v9 = vadd.f32 %v7984_v30, %v10366_v25  ;;  %v8034_v19 = vpop.f32.mrf.mxu1 }
 0x1ba   :  { %v10443_v2 = vpop.f32.mrf.mxu0 }
 0x1bb   :  { %13346 = vst [vmem:[#allocation69_spill] sm:$0xff] %v10443_v2  ;;  %v10445_v15 = vadd.f32 %v8034_v19, %v2235_v9  ;;  %v10447_v62 = vpop.f32.mrf.mxu1 }
 0x1bc   :  { %13347 = vst [vmem:[#allocation67_spill] sm:$0xff] %v10447_v62  ;;  %v7987_v48 = vpop.f32.mrf.mxu0 }
 0x1bd   :  { %v2255_v16 = vadd.f32 %v7987_v48, %v10366_v25  ;;  %v8037_v45 = vpop.f32.mrf.mxu1 }
 0x1be   :  { %v10450_v21 = vpop.f32.mrf.mxu0 }
 0x1bf   :  { %13348 = vst [vmem:[#allocation75_spill] sm:$0xff] %v10450_v21  ;;  %v10452_v40 = vadd.f32 %v8037_v45, %v2255_v16  ;;  %v10454_v36 = vpop.f32.mrf.mxu1 }
 0x1c0   :  { %13349 = vst [vmem:[#allocation70_spill] sm:$0xff] %v10454_v36  ;;  %v7990_v61 = vpop.f32.mrf.mxu0 }
 0x1c1   :  { %v2275_v30 = vadd.f32 %v7990_v61, %v10366_v25  ;;  %v8040_v41 = vpop.f32.mrf.mxu1 }
 0x1c2   :  { %v10457_v42 = vpop.f32.mrf.mxu0 }
 0x1c3   :  { %13350 = vst [vmem:[#allocation78_spill] sm:$0xff] %v10457_v42  ;;  %v10459_v19 = vadd.f32 %v8040_v41, %v2275_v30  ;;  %v10461_v9 = vpop.f32.mrf.mxu1 }
 0x1c4   :  { %13351 = vst [vmem:[#allocation71_spill] sm:$0xff] %v10461_v9  ;;  %v7993_v62 = vpop.f32.mrf.mxu0 }
 0x1c5   :  { %v2295_v48 = vadd.f32 %v7993_v62, %v10366_v25  ;;  %v8043_v2 = vpop.f32.mrf.mxu1 }
 0x1c6   :  { %v10464_v39 = vpop.f32.mrf.mxu0 }
 0x1c7   :  { %13352 = vst [vmem:[#allocation79_spill] sm:$0xff] %v10464_v39  ;;  %v10466_v45 = vadd.f32 %v8043_v2, %v2295_v48  ;;  %v10468_v16 = vpop.f32.mrf.mxu1 }
 0x1c8   :  { %13353 = vst [vmem:[#allocation72_spill] sm:$0xff] %v10468_v16  ;;  %v7996_v36 = vpop.f32.mrf.mxu0 }
 0x1c9   :  { %v2315_v61 = vadd.f32 %v7996_v36, %v10366_v25  ;;  %v8046_v21 = vpop.f32.mrf.mxu1 }
 0x1ca   :  { %v10471_v32 = vpop.f32.mrf.mxu0 }
 0x1cb   :  { %13354 = vst [vmem:[#allocation80_spill] sm:$0xff] %v10471_v32  ;;  %v10473_v41 = vadd.f32 %v8046_v21, %v2315_v61  ;;  %v10475_v30 = vpop.f32.mrf.mxu1 }
 0x1cc   :  { %13355 = vst [vmem:[#allocation81_spill] sm:$0xff] %v10475_v30  ;;  %v7999_v9 = vpop.f32.mrf.mxu0 }
 0x1cd   :  { %v2335_v62 = vadd.f32 %v7999_v9, %v10366_v25  ;;  %v8049_v42 = vpop.f32.mrf.mxu1 }
 0x1ce   :  { %v10478_v37 = vpop.f32.mrf.mxu0 }
 0x1cf   :  { %13356 = vst [vmem:[#allocation85_spill] sm:$0xff] %v10478_v37  ;;  %v10480_v2 = vadd.f32 %v8049_v42, %v2335_v62  ;;  %v10482_v48 = vpop.f32.mrf.mxu1 }
 0x1d0   :  { %13357 = vst [vmem:[#allocation83_spill] sm:$0xff] %v10482_v48  ;;  %v8054_v16 = vpop.f32.mrf.mxu0 }
 0x1d1   :  { %v2678_v36 = vadd.f32 %v8054_v16, %v10375_v17  ;;  %v8104_v39 = vpop.f32.mrf.mxu1 }
 0x1d2   :  { %v10485_v49 = vpop.f32.mrf.mxu0 }
 0x1d3   :  { %13358 = vst [vmem:[#allocation87_spill] sm:$0xff] %v10485_v49  ;;  %v10487_v21 = vadd.f32 %v8104_v39, %v2678_v36  ;;  %v10489_v61 = vpop.f32.mrf.mxu1 }
 0x1d4   :  { %13359 = vst [vmem:[#allocation88_spill] sm:$0xff] %v10489_v61  ;;  %v8057_v30 = vpop.f32.mrf.mxu0 }
 0x1d5   :  { %v2692_v9 = vadd.f32 %v8057_v30, %v10382_v4  ;;  %v8107_v32 = vpop.f32.mrf.mxu1 }
 0x1d6   :  { %v10492_v7 = vpop.f32.mrf.mxu0 }
 0x1d7   :  { %13360 = vst [vmem:[#allocation93_spill] sm:$0xff] %v10492_v7  ;;  %v10494_v42 = vadd.f32 %v8107_v32, %v2692_v9  ;;  %v10496_v62 = vpop.f32.mrf.mxu1 }
 0x1d8   :  { %13361 = vst [vmem:[#allocation90_spill] sm:$0xff] %v10496_v62  ;;  %v8060_v48 = vpop.f32.mrf.mxu0 }
 0x1d9   :  { %v2706_v17 = vadd.f32 %v8060_v48, %v10389_v43  ;;  %v8110_v16 = vpop.f32.mrf.mxu1 }
 0x1da   :  { %v10499_v37 = vpop.f32.mrf.mxu0 }
 0x1db   :  { %v10501_v39 = vadd.f32 %v8110_v16, %v2706_v17  ;;  %v10503_v36 = vpop.f32.mrf.mxu1 }
 0x1dc   :  { %13362 = vst [vmem:[#allocation95_spill] sm:$0xff] %v10503_v36  ;;  %v8063_v27 = vpop.f32.mrf.mxu0 }
 0x1dd   :  { %v2720_v4 = vadd.f32 %v8063_v27, %v10396_v44  ;;  %v8113_v30 = vpop.f32.mrf.mxu1 }
 0x1de   :  { %v10506_v35 = vpop.f32.mrf.mxu0 }
 0x1df   :  { %v10508_v32 = vadd.f32 %v8113_v30, %v2720_v4  ;;  %v10510_v9 = vpop.f32.mrf.mxu1 }
 0x1e0   :  { %v8066_v11 = vpop.f32.mrf.mxu0 }
 0x1e1   :  { %v2734_v43 = vadd.f32 %v8066_v11, %v10403_v3  ;;  %v8116_v48 = vpop.f32.mrf.mxu1 }
 0x1e2   :  { %v10513_v20 = vpop.f32.mrf.mxu0 }
 0x1e3   :  { %v10515_v17 = vadd.f32 %v8116_v48, %v2734_v43  ;;  %v10517_v16 = vpop.f32.mrf.mxu1 }
 0x1e4   :  { %v8069_v24 = vpop.f32.mrf.mxu0 }
 0x1e5   :  { %v2748_v27 = vadd.f32 %v8069_v24, %v10410_v8  ;;  %v8119_v44 = vpop.f32.mrf.mxu1 }
 0x1e6   :  { %v10520_v29 = vpop.f32.mrf.mxu0 }
 0x1e7   :  { %v10522_v4 = vadd.f32 %v8119_v44, %v2748_v27  ;;  %v10524_v30 = vpop.f32.mrf.mxu1 }
 0x1e8   :  { %v8072_v18 = vpop.f32.mrf.mxu0 }
 0x1e9   :  { %v2762_v11 = vadd.f32 %v8072_v18, %v10417_v55  ;;  %v8122_v3 = vpop.f32.mrf.mxu1 }
 0x1ea   :  { %v10527_v63 = vpop.f32.mrf.mxu0 }
 0x1eb   :  { %v10529_v43 = vadd.f32 %v8122_v3, %v2762_v11  ;;  %v10531_v48 = vpop.f32.mrf.mxu1 }
 0x1ec   :  { %v10533_v5 = vpop.f32.mrf.mxu0 }
 0x1ed   :  { %v10535_v24 = vpop.f32.mrf.mxu1 }
 0x1ee   :  { %v10537_v8 = vpop.f32.mrf.mxu0 }
 0x1ef   :  { %v10539_v27 = vpop.f32.mrf.mxu1 }
 0x1f0   :  { %v8078_v44 = vpop.f32.mrf.mxu0 }
 0x1f1   :  { %v2790_v52 = vadd.f32 %v8078_v44, %v10431_v14  ;;  %v8128_v50 = vpop.f32.mrf.mxu1 }
 0x1f2   :  { %v10542_v18 = vpop.f32.mrf.mxu0 }
 0x1f3   :  { %v10544_v55 = vadd.f32 %v8128_v50, %v2790_v52  ;;  %v10546_v11 = vpop.f32.mrf.mxu1 }
 0x1f4   :  { %v8081_v3 = vpop.f32.mrf.mxu0 }
 0x1f5   :  { %v2804_v53 = vadd.f32 %v8081_v3, %v10438_v59  ;;  %v8131_v47 = vpop.f32.mrf.mxu1 }
 0x1f6   :  { %v10549_v61 = vpop.f32.mrf.mxu0 }
 0x1f7   :  { %v10551_v49 = vadd.f32 %v8131_v47, %v2804_v53  ;;  %v10553_v23 = vpop.f32.mrf.mxu1 }
 0x1f8   :  { %v8084_v62 = vpop.f32.mrf.mxu0 }
 0x1f9   :  { %v2818_v14 = vadd.f32 %v8084_v62, %v10445_v15  ;;  %v8134_v44 = vpop.f32.mrf.mxu1 }
 0x1fa   :  { %v10556_v51 = vpop.f32.mrf.mxu0 }
 0x1fb   :  { %13363 = vst [vmem:[#allocation94_spill] sm:$0xff] %v10556_v51  ;;  %v10558_v50 = vadd.f32 %v8134_v44, %v2818_v14  ;;  %v10560_v52 = vpop.f32.mrf.mxu1 }
 0x1fc   :  { %13365 = vst [vmem:[#allocation96_spill] sm:$0xff] %v10560_v52  ;;  %v8087_v7 = vpop.f32.mrf.mxu0 }
 0x1fd   :  { %13364 = vst [vmem:[#allocation98_spill] sm:$0xff] %v10558_v50  ;;  %v2832_v59 = vadd.f32 %v8087_v7, %v10452_v40  ;;  %v8137_v3 = vpop.f32.mrf.mxu1 }
 0x1fe   :  { %v10563_v33 = vpop.f32.mrf.mxu0 }
 0x1ff   :  { %13366 = vst [vmem:[#allocation101_spill] sm:$0xff] %v10563_v33  ;;  %v10565_v47 = vadd.f32 %v8137_v3, %v2832_v59  ;;  %v10567_v53 = vpop.f32.mrf.mxu1 }
 0x200   :  { %13368 = vst [vmem:[#allocation104_spill] sm:$0xff] %v10567_v53  ;;  %v8090_v36 = vpop.f32.mrf.mxu0 }
 0x201   :  { %13367 = vst [vmem:[#allocation99_spill] sm:$0xff] %v10565_v47  ;;  %v2846_v15 = vadd.f32 %v8090_v36, %v10459_v19  ;;  %v8140_v62 = vpop.f32.mrf.mxu1 }
 0x202   :  { %v10570_v31 = vpop.f32.mrf.mxu0 }
 0x203   :  { %13369 = vst [vmem:[#allocation102_spill] sm:$0xff] %v10570_v31  ;;  %v10572_v14 = vadd.f32 %v8140_v62, %v2846_v15  ;;  %v10574_v44 = vpop.f32.mrf.mxu1 }
 0x204   :  { %13371 = vst [vmem:[#allocation105_spill] sm:$0xff] %v10574_v44  ;;  %v8093_v52 = vpop.f32.mrf.mxu0 }
 0x205   :  { %13370 = vst [vmem:[#allocation107_spill] sm:$0xff] %v10572_v14  ;;  %v2860_v7 = vadd.f32 %v8093_v52, %v10466_v45  ;;  %v8143_v40 = vpop.f32.mrf.mxu1 }
 0x206   :  { %v10577_v50 = vpop.f32.mrf.mxu0 }
 0x207   :  { %13372 = vst [vmem:[#allocation108_spill] sm:$0xff] %v10577_v50  ;;  %v10579_v59 = vadd.f32 %v8143_v40, %v2860_v7  ;;  %v10581_v3 = vpop.f32.mrf.mxu1 }
 0x208   :  { %13374 = vst [vmem:[#allocation6_spill] sm:$0xff] %v10581_v3  ;;  %v8096_v51 = vpop.f32.mrf.mxu0 }
 0x209   :  { %13373 = vst [vmem:[#allocation5_spill] sm:$0xff] %v10579_v59  ;;  %v2874_v19 = vadd.f32 %v8096_v51, %v10473_v41  ;;  %v8146_v36 = vpop.f32.mrf.mxu1 }
 0x20a   :  { %v10584_v53 = vpop.f32.mrf.mxu0 }
 0x20b   :  { %13375 = vst [vmem:[#allocation7_spill] sm:$0xff] %v10584_v53  ;;  %v10586_v15 = vadd.f32 %v8146_v36, %v2874_v19  ;;  %v10588_v62 = vpop.f32.mrf.mxu1 }
 0x20c   :  { %13377 = vst [vmem:[#allocation9_spill] sm:$0xff] %v10588_v62  ;;  %v8099_v47 = vpop.f32.mrf.mxu0 }
 0x20d   :  { %13376 = vst [vmem:[#allocation8_spill] sm:$0xff] %v10586_v15  ;;  %v2888_v45 = vadd.f32 %v8099_v47, %v10480_v2  ;;  %v8149_v52 = vpop.f32.mrf.mxu1 }
 0x20e   :  { %v10591_v33 = vpop.f32.mrf.mxu0 }
 0x20f   :  { %13378 = vst [vmem:[#allocation10_spill] sm:$0xff] %v10591_v33  ;;  %v10593_v7 = vadd.f32 %v8149_v52, %v2888_v45  ;;  %v10595_v40 = vpop.f32.mrf.mxu1  ;;  %v2125_v33 = vadd.f32 %v10366_v25, %v10408_v28 }
 0x210   :  { %13380 = vst [vmem:[#allocation20_spill] sm:$0xff] %v10595_v40  ;;  %v8154_v44 = vpop.f32.mrf.mxu0  ;;  %v2165_v40 = vadd.f32 %v10366_v25, %v10422_v38 }
 0x211   :  { %13379 = vst [vmem:[#allocation11_spill] sm:$0xff] %v10593_v7  ;;  %v3290_v51 = vadd.f32 %v8154_v44, %v10487_v21  ;;  %v8204_v41 = vpop.f32.mrf.mxu1  ;;  %v2471_v38 = vadd.f32 %v10412_v12, %v2125_v33 }
 0x212   :  { %v10598_v14 = vpop.f32.mrf.mxu0 }
 0x213   :  { %13381 = vst [vmem:[#allocation21_spill] sm:$0xff] %v10598_v14  ;;  %v10600_v19 = vadd.f32 %v8204_v41, %v3290_v51  ;;  %v10602_v36 = vpop.f32.mrf.mxu1  ;;  %v2185_v14 = vadd.f32 %v10366_v25, %v10429_v6  ;;  %v2105_v6 = vadd.f32 %v10366_v25, %v10401_v10 }
 0x214   :  { %13383 = vst [vmem:[#allocation25_spill] sm:$0xff] %v10602_v36  ;;  %v8157_v31 = vpop.f32.mrf.mxu0 }
 0x215   :  { %13382 = vst [vmem:[#allocation22_spill] sm:$0xff] %v10600_v19  ;;  %v3302_v2 = vadd.f32 %v8157_v31, %v10494_v42  ;;  %v8207_v47 = vpop.f32.mrf.mxu1  ;;  %v2145_v42 = vadd.f32 %v10366_v25, %v10415_v60 }
 0x216   :  { %v10605_v3 = vpop.f32.mrf.mxu0 }
 0x217   :  { %13384 = vst [vmem:[#allocation26_spill] sm:$0xff] %v10605_v3  ;;  %v10607_v45 = vadd.f32 %v8207_v47, %v3302_v2  ;;  %v10609_v52 = vpop.f32.mrf.mxu1  ;;  %v2483_v53 = vadd.f32 %v10419_v22, %v2145_v42  ;;  %v2776_v22 = vadd.f32 %v10533_v5, %v10424_v46  ;;  %v2741_v5 = vadd.f32 %v10520_v29, %v2471_v38 }
 0x218   :  { %13386 = vst [vmem:[#allocation35_spill] sm:$0xff] %v10609_v52  ;;  %v10611_v59 = vpop.f32.mrf.mxu0 }
 0x219   :  { %13385 = vst [vmem:[#allocation32_spill] sm:$0xff] %v10607_v45  ;;  %v10613_v21 = vpop.f32.mrf.mxu1  ;;  %v2755_v60 = vadd.f32 %v10527_v63, %v2483_v53  ;;  %v2495_v45 = vadd.f32 %v10426_v58, %v2165_v40  ;;  %v2205_v58 = vadd.f32 %v10366_v25, %v10436_v26  ;;  %v3082_v33 = vadd.f32 %v10535_v24, %v2776_v22 }
 0x21a   :  { %v10615_v44 = vpop.f32.mrf.mxu0 }
 0x21b   :  { %13387 = vst [vmem:[#allocation40_spill] sm:$0xff] %v10615_v44  ;;  %v10617_v51 = vpop.f32.mrf.mxu1  ;;  %v2769_v28 = vadd.f32 %v10537_v8, %v2495_v45  ;;  %v2507_v44 = vadd.f32 %v10433_v0, %v2185_v14  ;;  %v2519_v29 = vadd.f32 %v10440_v54, %v2205_v58 }
 0x21c   :  { %13388 = vst [vmem:[#allocation47_spill] sm:$0xff] %v10617_v51  ;;  %v10619_v41 = vpop.f32.mrf.mxu0  ;;  %v3058_v51 = vadd.f32 %v10531_v48, %v2755_v60  ;;  %v3042_v60 = vadd.f32 %v10524_v30, %v2741_v5 }
 0x21d   :  { %v10621_v50 = vpop.f32.mrf.mxu1  ;;  %v3074_v10 = vadd.f32 %v10539_v27, %v2769_v28  ;;  %v2797_v27 = vadd.f32 %v10549_v61, %v2519_v29 }
 0x21e   :  { %v10623_v31 = vpop.f32.mrf.mxu0 }
 0x21f   :  { %v10627_v2 = vpop.f32.mrf.mxu1 }
 0x220   :  { %v8166_v47 = vpop.f32.mrf.mxu0 }
 0x221   :  { %v10629_v62 = vpop.f32.mrf.mxu1 }
 0x222   :  { %v10631_v15 = vpop.f32.mrf.mxu0 }
 0x223   :  { %v10636_v7 = vpop.f32.mrf.mxu1 }
 0x224   :  { %v8169_v36 = vpop.f32.mrf.mxu0 }
 0x225   :  { %v8219_v19 = vpop.f32.mrf.mxu1  ;;  %v3350_v12 = vadd.f32 %v8169_v36, %v10522_v4  ;;  %v2459_v4 = vadd.f32 %v10405_v56, %v2105_v6 }
 0x226   :  { %v3343_v52 = vpop.f32.mrf.mxu0 }
 0x227   :  { %v3601_v42 = vpop.f32.mrf.mxu1  ;;  %v3608_v36 = vadd.f32 %v8219_v19, %v3350_v12  ;;  %v2085_v19 = vadd.f32 %v10366_v25, %v10394_v13  ;;  %v2727_v6 = vadd.f32 %v10513_v20, %v2459_v4 }
 0x228   :  { %v8172_v3 = vpop.f32.mrf.mxu0 }
 0x229   :  { %v3362_v63 = vadd.f32 %v8172_v3, %v10529_v43  ;;  %v8222_v53 = vpop.f32.mrf.mxu1  ;;  %v2783_v43 = vadd.f32 %v10542_v18, %v2507_v44  ;;  %v3344_v44 = vadd.f32 %v3343_v52, %v3042_v60  ;;  %v3817_v5 = vsel %vm3734_vm2, %v3608_v36, 0 }
 0x22a   :  { %v3355_v46 = vpop.f32.mrf.mxu0 }
 0x22b   :  { %v3620_v48 = vadd.f32 %v8222_v53, %v3362_v63  ;;  %v3356_v8 = vadd.f32 %v3355_v46, %v3058_v51  ;;  %v3613_v40 = vpop.f32.mrf.mxu1  ;;  %v3090_v18 = vadd.f32 %v10546_v11, %v2783_v43  ;;  %v3338_v11 = vadd.f32 %v8166_v47, %v10515_v17 }
 0x22c   :  { %v8175_v3 = vpop.f32.mrf.mxu0  ;;  %v3106_v47 = vadd.f32 %v10553_v23, %v2797_v27 }
 0x22d   :  { %v3823_v0 = vsel %vm3734_vm2, %v3620_v48, 0  ;;  %v3614_v14 = vadd.f32 %v3613_v40, %v3356_v8  ;;  %v3374_v45 = vadd.f32 %v8175_v3, %v3082_v33  ;;  %v8225_v26 = vpop.f32.mrf.mxu1  ;;  %v3602_v40 = vadd.f32 %v3601_v42, %v3344_v44 }
 0x22e   :  { %v3367_v24 = vpop.f32.mrf.mxu0  ;;  %v10666_v28 = vand.u32 4294901760, %v3823_v0  ;;  %v3596_v23 = vadd.f32 %v10629_v62, %v3338_v11  ;;  %v10706_v42 = vand.u32 4294901760, %v3817_v5  ;;  %v2447_v62 = vadd.f32 %v10398_v34, %v2085_v19 }
 0x22f   :  { %v3632_v51 = vadd.f32 %v8225_v26, %v3374_v45  ;;  %v3368_v22 = vadd.f32 %v3367_v24, %v3074_v10  ;;  %v3625_v38 = vpop.f32.mrf.mxu1  ;;  %v3820_v53 = vsel %vm3734_vm2, %v3614_v14, 0 }
 0x230   :  { %v8178_v63 = vpop.f32.mrf.mxu0  ;;  %v10684_v8 = vand.u32 4294901760, %v3820_v53  ;;  %v2713_v44 = vadd.f32 %v10506_v35, %v2447_v62  ;;  %v3811_v34 = vsel %vm3734_vm2, %v3596_v23, 0  ;;  %v2065_v35 = vadd.f32 %v10366_v25, %v10387_v1  ;;  %v13403_v62 = vld [vmem:[#allocation40_spill] sm:$0xff] }
 0x231   :  { %v3829_v54 = vsel %vm3734_vm2, %v3632_v51, 0  ;;  %v3626_v30 = vadd.f32 %v3625_v38, %v3368_v22  ;;  %v3386_v58 = vadd.f32 %v8178_v63, %v10544_v55  ;;  %v8228_v56 = vpop.f32.mrf.mxu1  ;;  %v10682_v55 = vsub.f32 %v3823_v0, %v10666_v28 }
 0x232   :  { %v10675_v61 = vand.u32 4294901760, %v3829_v54  ;;  %v3379_v52 = vpop.f32.mrf.mxu0  ;;  %v3026_v0 = vadd.f32 %v10517_v16, %v2727_v6  ;;  %v10711_v24 = vsub.f32 %v3820_v53, %v10684_v8  ;;  %v3814_v22 = vsel %vm3734_vm2, %v3602_v40, 0  ;;  %v13399_v40 = vld [vmem:[#allocation66_spill] sm:$0xff] }
 0x233   :  { %v3826_v46 = vsel %vm3734_vm2, %v3626_v30, 0  ;;  %v3380_v33 = vadd.f32 %v3379_v52, %v3090_v18  ;;  %v10679_v12 = vadd.f32 %v8228_v56, %v3386_v58  ;;  %v3637_v48 = vpop.f32.mrf.mxu1  ;;  %v10719_v36 = vand.u32 4294901760, %v10682_v55 }
 0x234   :  { %v10687_v20 = vsub.f32 %v3829_v54, %v10675_v61  ;;  %v10689_v13 = vand.u32 4294901760, %v3826_v46  ;;  %v8181_v17 = vpop.f32.mrf.mxu0  ;;  %8250 = vmatprep.subr.mxu0 %v10675_v61  ;;  %v3332_v51 = vadd.f32 %v10631_v15, %v3026_v0  ;;  %v3326_v63 = vadd.f32 %v10619_v41, %v10508_v32 }
 0x235   :  { %13389 = vst [vmem:[#allocation49_spill] sm:$0xff] %v10679_v12  ;;  %v3398_v43 = vadd.f32 %v8181_v17, %v10551_v49  ;;  %v10694_v3 = vadd.f32 %v3637_v48, %v3380_v33  ;;  %8251 = vmatpush3.xpose.msra.mxu0 %v10675_v61  ;;  %v8231_v10 = vpop.f32.mrf.mxu1  ;;  %13394 = vst [vmem:[#allocation65_spill] sm:$0xff] %v10719_v36  ;;  %v10735_v15 = vsub.f32 %v3817_v5, %v10706_v42  ;;  %v13433_v12 = vld [vmem:[#allocation63_spill] sm:$0xff] }
 0x236   :  { %v10699_v14 = vsub.f32 %v3826_v46, %v10689_v13  ;;  %v3391_v45 = vpop.f32.mrf.mxu0  ;;  %8252 = vmatprep.subr.mxu0 %v10689_v13  ;;  %v10703_v26 = vand.u32 4294901760, %v10687_v20  ;;  %v10737_v53 = vand.u32 4294901760, %v3814_v22  ;;  %v4090_v30 = vsub.f32 %v10682_v55, %v10719_v36 }
 0x237   :  { %13390 = vst [vmem:[#allocation52_spill] sm:$0xff] %v10694_v3  ;;  %v3392_v49 = vadd.f32 %v3391_v45, %v3106_v47  ;;  %v10708_v29 = vadd.f32 %v8231_v10, %v3398_v43  ;;  %v3649_v60 = vpop.f32.mrf.mxu1  ;;  %v10742_v58 = vand.u32 4294901760, %v10711_v24  ;;  %v3590_v32 = vadd.f32 %v10636_v7, %v3332_v51 }
 0x238   :  { %13391 = vst [vmem:[#allocation54_spill] sm:$0xff] %v10703_v26  ;;  %v4076_v16 = vsub.f32 %v10687_v20, %v10703_v26  ;;  %v10716_v4 = vand.u32 4294901760, %v10699_v14  ;;  %v3010_v41 = vadd.f32 %v10510_v9, %v2713_v44  ;;  %v3584_v56 = vadd.f32 %v10621_v50, %v3326_v63 }
 0x239   :  { %13392 = vst [vmem:[#allocation58_spill] sm:$0xff] %v10708_v29  ;;  %v10724_v38 = vadd.f32 %v3649_v60, %v3392_v49  ;;  %8253 = vmatpush3.xpose.msra.mxu0 %v10689_v13  ;;  %13396 = vst [vmem:[#allocation76_spill] sm:$0xff] %v10742_v58  ;;  %v10751_v19 = vand.u32 4294901760, %v3811_v34  ;;  %v10754_v6 = vsub.f32 %v3814_v22, %v10737_v53  ;;  %v4091_v11 = vand.u32 4294901760, %v4090_v30  ;;  %v13402_v60 = vld [vmem:[#allocation61_spill] sm:$0xff] }
 0x23a   :  { %13393 = vst [vmem:[#allocation62_spill] sm:$0xff] %v10716_v4  ;;  %8254 = vmatprep.subr.mxu0 %v10666_v28  ;;  %v4077_v18 = vand.u32 4294901760, %v4076_v16  ;;  %v4083_v27 = vsub.f32 %v10699_v14, %v10716_v4  ;;  %v4097_v1 = vsub.f32 %v10711_v24, %v10742_v58  ;;  %v10759_v7 = vand.u32 4294901760, %v10735_v15 }
 0x23b   :  { %13395 = vst [vmem:[#allocation68_spill] sm:$0xff] %v10724_v38  ;;  %v2435_v52 = vadd.f32 %v10391_v57, %v2065_v35  ;;  %v3320_v5 = vadd.f32 %v10623_v31, %v3010_v41  ;;  %v3808_v9 = vsel %vm3734_vm2, %v3590_v32, 0  ;;  %v3314_v46 = vadd.f32 %v10611_v59, %v10501_v39  ;;  %v13400_v39 = vld [vmem:[#allocation95_spill] sm:$0xff]  ;;  %v13406_v35 = vld [vmem:[#allocation60_spill] sm:$0xff] }
 0x23c   :  { %8306 = vmatprep.subr.mxu1 %v4077_v18  ;;  %v4084_v54 = vand.u32 4294901760, %v4083_v27  ;;  %13397 = vst [vmem:[#allocation109_spill] sm:$0xff] %v10759_v7  ;;  %v3805_v33 = vsel %vm3734_vm2, %v3584_v56, 0  ;;  %v10771_v48 = vsub.f32 %v3811_v34, %v10751_v19  ;;  %v10773_v57 = vand.u32 4294901760, %v3808_v9  ;;  %v13407_v41 = vld [vmem:[#allocation47_spill] sm:$0xff] }
 0x23d   :  { %8255 = vmatpush3.xpose.msra.mxu0 %v10666_v28  ;;  %8307 = vmatpush3.xpose.msra.mxu1 %v4077_v18  ;;  %v2699_v50 = vadd.f32 %v10499_v37, %v2435_v52  ;;  %v4098_v31 = vand.u32 4294901760, %v4097_v1  ;;  %v4104_v17 = vsub.f32 %v10735_v15, %v10759_v7  ;;  %v10778_v47 = vand.u32 4294901760, %v10754_v6 }
 0x23e   :  { %8256 = vmatprep.subr.mxu0 %v10684_v8  ;;  %8308 = vmatprep.subr.mxu1 %v4084_v54  ;;  %v2045_v37 = vadd.f32 %v10366_v25, %v13399_v40  ;;  %v3578_v43 = vadd.f32 %v10627_v2, %v3320_v5  ;;  %v3572_v10 = vadd.f32 %v10613_v21, %v3314_v46  ;;  %v10787_v0 = vand.u32 4294901760, %v3805_v33  ;;  %v13404_v21 = vld [vmem:[#allocation93_spill] sm:$0xff] }
 0x23f   :  { %13398 = vst [vmem:[#allocation110_spill] sm:$0xff] %v10778_v47  ;;  %v2994_v59 = vadd.f32 %v13400_v39, %v2699_v50  ;;  %v10790_v45 = vsub.f32 %v3808_v9, %v10773_v57  ;;  %v4105_v23 = vand.u32 4294901760, %v4104_v17  ;;  %v4111_v49 = vsub.f32 %v10754_v6, %v10778_v47  ;;  %v13410_v46 = vld [vmem:[#allocation57_spill] sm:$0xff]  ;;  %v13413_v39 = vld [vmem:[#allocation32_spill] sm:$0xff] }
 0x240   :  { %v10795_v2 = vand.u32 4294901760, %v10771_v48  ;;  %v2423_v16 = vadd.f32 %v13402_v60, %v2045_v37  ;;  %v3802_v22 = vsel %vm3734_vm2, %v3578_v43, 0  ;;  %v3799_v27 = vsel %vm3734_vm2, %v3572_v10, 0  ;;  %v13412_v37 = vld [vmem:[#allocation87_spill] sm:$0xff] }
 0x241   :  { %8257 = vmatpush3.xpose.msra.mxu0 %v10684_v8  ;;  %8309 = vmatpush3.xpose.msra.mxu1 %v4084_v54  ;;  %v3308_v51 = vadd.f32 %v13403_v62, %v2994_v59  ;;  %v10805_v44 = vsub.f32 %v3805_v33, %v10787_v0  ;;  %v10807_v63 = vand.u32 4294901760, %v3802_v22  ;;  %v4112_v34 = vand.u32 4294901760, %v4111_v49  ;;  %v13415_v62 = vld [vmem:[#allocation35_spill] sm:$0xff] }
 0x242   :  { %8258 = vmatprep.subr.mxu0 %v10706_v42  ;;  %8310 = vmatprep.subr.mxu1 %v4091_v11  ;;  %13401 = vst [vmem:[#allocation66_spill] sm:$0xff] %v10795_v2  ;;  %v2685_v18 = vadd.f32 %v13404_v21, %v2423_v16  ;;  %v4118_v54 = vsub.f32 %v10771_v48, %v10795_v2  ;;  %v10812_v30 = vand.u32 4294901760, %v10790_v45  ;;  %v10820_v52 = vand.u32 4294901760, %v3799_v27 }
 0x243   :  { %v2025_v32 = vadd.f32 %v10366_v25, %v13406_v35  ;;  %v3566_v56 = vadd.f32 %v13407_v41, %v3308_v51  ;;  %v10823_v5 = vsub.f32 %v3802_v22, %v10807_v63  ;;  %v10828_v25 = vand.u32 4294901760, %v10805_v44  ;;  %v13416_v22 = vld [vmem:[#allocation88_spill] sm:$0xff] }
 0x244   :  { %13405 = vst [vmem:[#allocation95_spill] sm:$0xff] %v10812_v30  ;;  %v4119_v9 = vand.u32 4294901760, %v4118_v54  ;;  %v4125_v50 = vsub.f32 %v10790_v45, %v10812_v30  ;;  %v3793_v59 = vsel %vm3734_vm2, %v13413_v39, 0  ;;  %v10839_v10 = vsub.f32 %v3799_v27, %v10820_v52  ;;  %v13423_v39 = vld [vmem:[#allocation48_spill] sm:$0xff] }
 0x245   :  { %8259 = vmatpush3.xpose.msra.mxu0 %v10706_v42  ;;  %8311 = vmatpush3.xpose.msra.mxu1 %v4091_v11  ;;  %v13408_v11 = vld [vmem:[#allocation90_spill] sm:$0xff]  ;;  %13409 = vst [vmem:[#allocation61_spill] sm:$0xff] %v10828_v25  ;;  %v2411_v33 = vadd.f32 %v13410_v46, %v2025_v32  ;;  %v3796_v40 = vsel %vm3734_vm2, %v3566_v56, 0  ;;  %v4132_v60 = vsub.f32 %v10805_v44, %v10828_v25  ;;  %v10846_v16 = vand.u32 4294901760, %v10823_v5  ;;  %v13418_v32 = vld [vmem:[#allocation21_spill] sm:$0xff] }
 0x246   :  { %8260 = vmatprep.subr.mxu0 %v10737_v53  ;;  %8312 = vmatprep.subr.mxu1 %v4098_v31  ;;  %v2978_v1 = vadd.f32 %v13408_v11, %v2685_v18  ;;  %v4126_v49 = vand.u32 4294901760, %v4125_v50  ;;  %v10852_v18 = vand.u32 4294901760, %v3793_v59  ;;  %v10860_v35 = vand.u32 4294901760, %v10839_v10  ;;  %v13419_v11 = vld [vmem:[#allocation22_spill] sm:$0xff] }
 0x247   :  { %v2671_v43 = vadd.f32 %v13412_v37, %v2411_v33  ;;  %13414 = vst [vmem:[#allocation40_spill] sm:$0xff] %v10846_v16  ;;  %v4139_v54 = vsub.f32 %v10823_v5, %v10846_v16  ;;  %v13422_v37 = vld [vmem:[#allocation41_spill] sm:$0xff]  ;;  %v13441_v16 = vld [vmem:[#allocation64_spill] sm:$0xff] }
 0x248   :  { %13417 = vst [vmem:[#allocation93_spill] sm:$0xff] %v10860_v35  ;;  %v4146_v33 = vsub.f32 %v10839_v10, %v10860_v35 }
 0x249   :  { %8261 = vmatpush3.xpose.msra.mxu0 %v10737_v53  ;;  %8313 = vmatpush3.xpose.msra.mxu1 %v4098_v31  ;;  %v13411_v31 = vld [vmem:[#allocation26_spill] sm:$0xff]  ;;  %v2962_v21 = vadd.f32 %v13416_v22, %v2671_v43  ;;  %v4140_v46 = vand.u32 4294901760, %v4139_v54  ;;  %v3739_v43 = vsel %vm3734_vm2, %v13422_v37, 0 }
 0x24a   :  { %8262 = vmatprep.subr.mxu0 %v10751_v19  ;;  %8314 = vmatprep.subr.mxu1 %v4105_v23  ;;  %v3296_v17 = vadd.f32 %v13411_v31, %v2978_v1  ;;  %v3787_v1 = vsel %vm3734_vm2, %v13419_v11, 0  ;;  %v13426_v54 = vld [vmem:[#allocation42_spill] sm:$0xff] }
 0x24b   :  { %v3284_v41 = vadd.f32 %v13418_v32, %v2962_v21  ;;  %v10895_v21 = vand.u32 4294901760, %v3739_v43  ;;  %v3745_v32 = vsel %vm3734_vm2, %v13426_v54, 0 }
 0x24c   :  { %v3554_v51 = vadd.f32 %v13415_v62, %v3296_v17  ;;  %v13421_v17 = vld [vmem:[#allocation25_spill] sm:$0xff]  ;;  %v4147_v62 = vand.u32 4294901760, %v4146_v33  ;;  %v10920_v54 = vand.u32 4294901760, %v3745_v32 }
 0x24d   :  { %8263 = vmatpush3.xpose.msra.mxu0 %v10751_v19  ;;  %8315 = vmatpush3.xpose.msra.mxu1 %v4105_v23  ;;  %v10841_v23 = vand.u32 4294901760, %v3796_v40 }
 0x24e   :  { %8264 = vmatprep.subr.mxu0 %v10773_v57  ;;  %8316 = vmatprep.subr.mxu1 %v4112_v34  ;;  %v3790_v56 = vsel %vm3734_vm2, %v3554_v51, 0 }
 0x24f   :  { %v10855_v27 = vsub.f32 %v3796_v40, %v10841_v23  ;;  %v10871_v50 = vand.u32 4294901760, %v3790_v56  ;;  %v3542_v40 = vadd.f32 %v13421_v17, %v3284_v41 }
 0x251   :  { %8265 = vmatpush3.xpose.msra.mxu0 %v10773_v57  ;;  %8317 = vmatpush3.xpose.msra.mxu1 %v4112_v34  ;;  %v4133_v34 = vand.u32 4294901760, %v4132_v60  ;;  %v10876_v31 = vand.u32 4294901760, %v10855_v27  ;;  %v10888_v60 = vsub.f32 %v3790_v56, %v10871_v50  ;;  %v13427_v56 = vld [vmem:[#allocation55_spill] sm:$0xff] }
 0x252   :  { %8266 = vmatprep.subr.mxu0 %v10787_v0  ;;  %8318 = vmatprep.subr.mxu1 %v4119_v9  ;;  %v3748_v11 = vsel %vm3734_vm2, %v13427_v56, 0  ;;  %v13431_v56 = vld [vmem:[#allocation50_spill] sm:$0xff] }
 0x253   :  { %13420 = vst [vmem:[#allocation60_spill] sm:$0xff] %v10876_v31  ;;  %v4153_v51 = vsub.f32 %v10855_v27, %v10876_v31  ;;  %v10914_v37 = vand.u32 4294901760, %v10888_v60  ;;  %v10928_v3 = vand.u32 4294901760, %v3748_v11 }
 0x255   :  { %8267 = vmatpush3.xpose.msra.mxu0 %v10787_v0  ;;  %8319 = vmatpush3.xpose.msra.mxu1 %v4119_v9  ;;  %v10869_v9 = vsub.f32 %v3793_v59, %v10852_v18  ;;  %v3742_v59 = vsel %vm3734_vm2, %v13423_v39, 0  ;;  %13429 = vst [vmem:[#allocation26_spill] sm:$0xff] %v10914_v37  ;;  %v10917_v39 = vsub.f32 %v3739_v43, %v10895_v21  ;;  %v3754_v43 = vsel %vm3734_vm2, %v13433_v12, 0  ;;  %v13435_v12 = vld [vmem:[#allocation59_spill] sm:$0xff] }
 0x256   :  { %8268 = vmatprep.subr.mxu0 %v10807_v63  ;;  %8320 = vmatprep.subr.mxu1 %v4126_v49  ;;  %v10902_v41 = vand.u32 4294901760, %v3742_v59  ;;  %v4167_v29 = vsub.f32 %v10888_v60, %v10914_v37  ;;  %v10953_v37 = vsub.f32 %v3748_v11, %v10928_v3 }
 0x257   :  { %v10893_v22 = vand.u32 4294901760, %v10869_v9  ;;  %13430 = vst [vmem:[#allocation87_spill] sm:$0xff] %v10917_v39 }
 0x259   :  { %8269 = vmatpush3.xpose.msra.mxu0 %v10807_v63  ;;  %8321 = vmatpush3.xpose.msra.mxu1 %v4126_v49  ;;  %v10885_v49 = vand.u32 4294901760, %v3787_v1  ;;  %13425 = vst [vmem:[#allocation90_spill] sm:$0xff] %v10893_v22 }
 0x25a   :  { %8270 = vmatprep.subr.mxu0 %v10820_v52  ;;  %8322 = vmatprep.subr.mxu1 %v4133_v34 }
 0x25b   :  { %13424 = vst [vmem:[#allocation47_spill] sm:$0xff] %v10885_v49  ;;  %v10907_v33 = vsub.f32 %v3787_v1, %v10885_v49  ;;  %v3751_v1 = vsel %vm3734_vm2, %v13431_v56, 0 }
 0x25c   :  { %v10941_v31 = vand.u32 4294901760, %v3751_v1 }
 0x25d   :  { %8271 = vmatpush3.xpose.msra.mxu0 %v10820_v52  ;;  %8323 = vmatpush3.xpose.msra.mxu1 %v4133_v34  ;;  %v3784_v34 = vsel %vm3734_vm2, %v3542_v40, 0  ;;  %v4154_v40 = vand.u32 4294901760, %v4153_v51  ;;  %v10926_v51 = vsub.f32 %v3742_v59, %v10902_v41  ;;  %v10938_v56 = vand.u32 4294901760, %v10907_v33 }
 0x25e   :  { %8272 = vmatprep.subr.mxu0 %v10841_v23  ;;  %8324 = vmatprep.subr.mxu1 %v4140_v46  ;;  %v10909_v17 = vand.u32 4294901760, %v3784_v34  ;;  %v10945_v59 = vsub.f32 %v3745_v32, %v10920_v54  ;;  %v10967_v2 = vsub.f32 %v3751_v1, %v10941_v31 }
 0x25f   :  { %13432 = vst [vmem:[#allocation32_spill] sm:$0xff] %v10926_v51  ;;  %13434 = vst [vmem:[#allocation35_spill] sm:$0xff] %v10938_v56  ;;  %v4174_v32 = vsub.f32 %v10907_v33, %v10938_v56  ;;  %v3763_v56 = vsel %vm3734_vm2, %v13441_v16, 0  ;;  %v13442_v1 = vand.u32 4294901760, %v10926_v51 }
 0x260   :  { %13428 = vst [vmem:[#allocation57_spill] sm:$0xff] %v10909_v17  ;;  %v10933_v38 = vsub.f32 %v3784_v34, %v10909_v17  ;;  %v3757_v34 = vsel %vm3734_vm2, %v13435_v12, 0  ;;  %v13438_v12 = vand.u32 4294901760, %v10917_v39  ;;  %13439 = vst [vmem:[#allocation21_spill] sm:$0xff] %v10967_v2  ;;  %v10993_v4 = vand.u32 4294901760, %v3763_v56 }
 0x261   :  { %8273 = vmatpush3.xpose.msra.mxu0 %v10841_v23  ;;  %8325 = vmatpush3.xpose.msra.mxu1 %v4140_v46  ;;  %v4160_v46 = vsub.f32 %v10869_v9, %v10893_v22  ;;  %v13436_v22 = vld [vmem:[#allocation74_spill] sm:$0xff]  ;;  %v10969_v11 = vand.u32 4294901760, %v3757_v34  ;;  %v4175_v58 = vand.u32 4294901760, %v4174_v32  ;;  %v13444_v32 = vand.u32 4294901760, %v10945_v59 }
 0x262   :  { %8274 = vmatprep.subr.mxu0 %v10852_v18  ;;  %8326 = vmatprep.subr.mxu1 %v4147_v62  ;;  %v3760_v35 = vsel %vm3734_vm2, %v13436_v22, 0  ;;  %v10961_v25 = vand.u32 4294901760, %v10933_v38  ;;  %v3925_v30 = vsub.f32 %v10917_v39, %v13438_v12  ;;  %v3935_v12 = vsub.f32 %v10926_v51, %v13442_v1 }
 0x263   :  { %v10978_v47 = vand.u32 4294901760, %v3760_v35  ;;  %v10991_v36 = vsub.f32 %v3757_v34, %v10969_v11  ;;  %v13445_v34 = vld [vmem:[#allocation77_spill] sm:$0xff] }
 0x264   :  { %13437 = vst [vmem:[#allocation88_spill] sm:$0xff] %v10961_v25  ;;  %v3926_v1 = vand.u32 4294901760, %v3925_v30  ;;  %v13446_v30 = vand.u32 4294901760, %v10953_v37 }
 0x265   :  { %8275 = vmatpush3.xpose.msra.mxu0 %v10852_v18  ;;  %8327 = vmatpush3.xpose.msra.mxu1 %v4147_v62  ;;  %v4161_v62 = vand.u32 4294901760, %v4160_v46  ;;  %v10949_v46 = vand.u32 4294901760, %v3754_v43  ;;  %v10997_v7 = vsub.f32 %v3760_v35, %v10978_v47 }
 0x266   :  { %8276 = vmatprep.subr.mxu0 %v10871_v50  ;;  %8328 = vmatprep.subr.mxu1 %v4154_v40  ;;  %v3955_v35 = vsub.f32 %v10953_v37, %v13446_v30 }
 0x267   :  { %v10974_v22 = vsub.f32 %v3754_v43, %v10949_v46  ;;  %v4181_v43 = vsub.f32 %v10933_v38, %v10961_v25  ;;  %v3769_v25 = vsel %vm3734_vm2, %v13445_v34, 0  ;;  %v13448_v34 = vand.u32 4294901760, %v10967_v2 }
 0x268   :  { %v11020_v16 = vand.u32 4294901760, %v3769_v25 }
 0x269   :  { %8277 = vmatpush3.xpose.msra.mxu0 %v10871_v50  ;;  %8329 = vmatpush3.xpose.msra.mxu1 %v4154_v40  ;;  %v4168_v40 = vand.u32 4294901760, %v4167_v29  ;;  %13440 = vst [vmem:[#allocation22_spill] sm:$0xff] %v10974_v22  ;;  %v4182_v26 = vand.u32 4294901760, %v4181_v43 }
 0x26a   :  { %8278 = vmatprep.subr.mxu0 %v10885_v49  ;;  %8330 = vmatprep.subr.mxu1 %v4161_v62 }
 0x26d   :  { %8279 = vmatpush3.xpose.msra.mxu0 %v10885_v49  ;;  %8331 = vmatpush3.xpose.msra.mxu1 %v4161_v62  ;;  %v13443_v62 = vld [vmem:[#allocation82_spill] sm:$0xff] }
 0x26e   :  { %8280 = vmatprep.subr.mxu0 %v10909_v17  ;;  %8332 = vmatprep.subr.mxu1 %v4168_v40  ;;  %v3766_v29 = vsel %vm3734_vm2, %v13443_v62, 0  ;;  %v3945_v62 = vsub.f32 %v10945_v59, %v13444_v32  ;;  %v11015_v32 = vsub.f32 %v3763_v56, %v10993_v4 }
 0x26f   :  { %v11006_v51 = vand.u32 4294901760, %v3766_v29 }
 0x270   :  { %v3946_v30 = vand.u32 4294901760, %v3945_v62 }
 0x271   :  { %8281 = vmatpush3.xpose.msra.mxu0 %v10909_v17  ;;  %8333 = vmatpush3.xpose.msra.mxu1 %v4168_v40  ;;  %v3936_v17 = vand.u32 4294901760, %v3935_v12  ;;  %v13447_v40 = vld [vmem:[#allocation86_spill] sm:$0xff]  ;;  %v3965_v12 = vsub.f32 %v10967_v2, %v13448_v34  ;;  %v11028_v56 = vsub.f32 %v3766_v29, %v11006_v51  ;;  %v3956_v34 = vand.u32 4294901760, %v3955_v35 }
 0x272   :  { %8334 = vmatprep.subr.mxu1 %v4175_v58  ;;  %8362 = vmatprep.subr.mxu0 %v10687_v20  ;;  %v3772_v39 = vsel %vm3734_vm2, %v13447_v40, 0  ;;  %v4004_v2 = vand.u32 4294901760, %v11015_v32  ;;  %v13452_v29 = vand.u32 4294901760, %v10991_v36 }
 0x273   :  { %v11032_v49 = vand.u32 4294901760, %v3772_v39 }
 0x274   :  { %8283 = vmatmul.mubr.f32.vlgmr.msra.gmra.mxu0 %v3926_v1  ;;  %v13449_v1 = vand.u32 4294901760, %v10974_v22  ;;  %v3985_v40 = vsub.f32 %v10991_v36, %v13452_v29 }
 0x275   :  { %8285 = vmatprep.mubr.f32.mxu0 %v3936_v17  ;;  %8335 = vmatpush3.xpose.msra.mxu1 %v4175_v58  ;;  %v13450_v58 = vld [vmem:[#allocation84_spill] sm:$0xff] }
 0x276   :  { %8363 = vmatpush3.xpose.msra.mxu0 %v10687_v20  ;;  %8336 = vmatprep.subr.mxu1 %v4182_v26  ;;  %v3975_v43 = vsub.f32 %v10974_v22, %v13449_v1  ;;  %v3775_v17 = vsel %vm3734_vm2, %v13450_v58, 0  ;;  %v13451_v20 = vld [vmem:[#allocation91_spill] sm:$0xff]  ;;  %v3966_v1 = vand.u32 4294901760, %v3965_v12  ;;  %v11042_v58 = vsub.f32 %v3769_v25, %v11020_v16  ;;  %v13454_v12 = vld [vmem:[#allocation89_spill] sm:$0xff] }
 0x277   :  { %8364 = vmatprep.subr.mxu0 %v10699_v14  ;;  %v3778_v62 = vsel %vm3734_vm2, %v13451_v20, 0  ;;  %v11044_v22 = vand.u32 4294901760, %v3775_v17  ;;  %v3781_v20 = vsel %vm3734_vm2, %v13454_v12, 0  ;;  %v12951_v25 = vand.u32 4294901760, %v11028_v56 }
 0x278   :  { %8286 = vmatmul.mubr.f32.gmra.mxu0 %v3946_v30  ;;  %v3976_v35 = vand.u32 4294901760, %v3975_v43  ;;  %v13453_v30 = vand.u32 4294901760, %v10997_v7  ;;  %v11056_v29 = vand.u32 4294901760, %v3778_v62  ;;  %v4024_v43 = vand.u32 4294901760, %v11042_v58 }
 0x279   :  { %8288 = vmatprep.mubr.f32.mxu0 %v3956_v34  ;;  %8337 = vmatpush3.xpose.msra.mxu1 %v4182_v26  ;;  %v11052_v26 = vsub.f32 %v3772_v39, %v11032_v49  ;;  %v11064_v39 = vsub.f32 %v3775_v17, %v11044_v22  ;;  %v4015_v17 = vsub.f32 %v11028_v56, %v12951_v25 }
 0x27a   :  { %8365 = vmatpush3.xpose.msra.mxu0 %v10699_v14  ;;  %8418 = vmatprep.subr.mxu1 %v10675_v61  ;;  %v3995_v34 = vsub.f32 %v10997_v7, %v13453_v30  ;;  %v3986_v14 = vand.u32 4294901760, %v3985_v40  ;;  %v11066_v30 = vand.u32 4294901760, %v3781_v20  ;;  %v4025_v25 = vsub.f32 %v11042_v58, %v4024_v43 }
 0x27b   :  { %8366 = vmatprep.subr.mxu0 %v10682_v55 }
 0x27c   :  { %8289 = vmatmul.mubr.f32.gmra.mxu0 %v3966_v1  ;;  %8339 = vmatmul.mubr.f32.vlgmr.msra.gmra.mxu1 %v10895_v21  ;;  %v4005_v1 = vsub.f32 %v11015_v32, %v4004_v2  ;;  %v3996_v40 = vand.u32 4294901760, %v3995_v34  ;;  %v11086_v12 = vsub.f32 %v3781_v20, %v11066_v30 }
 0x27d   :  { %8291 = vmatprep.mubr.f32.mxu0 %v3976_v35  ;;  %8341 = vmatprep.mubr.f32.mxu1 %v10902_v41  ;;  %v11074_v35 = vsub.f32 %v3778_v62, %v11056_v29  ;;  %v4044_v62 = vand.u32 4294901760, %v11064_v39 }
 0x27e   :  { %8367 = vmatpush3.xpose.msra.mxu0 %v10682_v55  ;;  %8419 = vmatpush3.xpose.msra.mxu1 %v10675_v61  ;;  %v4034_v55 = vand.u32 4294901760, %v11052_v26  ;;  %v4006_v34 = vand.u32 4294901760, %v4005_v1  ;;  %v4026_v1 = vand.u32 4294901760, %v4025_v25 }
 0x27f   :  { %8368 = vmatprep.subr.mxu0 %v10711_v24  ;;  %8420 = vmatprep.subr.mxu1 %v10689_v13  ;;  %v4054_v20 = vand.u32 4294901760, %v11074_v35 }
 0x280   :  { %8292 = vmatmul.mubr.f32.gmra.mxu0 %v3986_v14  ;;  %8342 = vmatmul.mubr.f32.gmra.mxu1 %v10920_v54  ;;  %v4016_v14 = vand.u32 4294901760, %v4015_v17  ;;  %v4045_v17 = vsub.f32 %v11064_v39, %v4044_v62 }
 0x281   :  { %8294 = vmatprep.mubr.f32.mxu0 %v3996_v40  ;;  %8344 = vmatprep.mubr.f32.mxu1 %v10928_v3  ;;  %v4035_v40 = vsub.f32 %v11052_v26, %v4034_v55 }
 0x282   :  { %8369 = vmatpush3.xpose.msra.mxu0 %v10711_v24  ;;  %8421 = vmatpush3.xpose.msra.mxu1 %v10689_v13  ;;  %v4064_v24 = vand.u32 4294901760, %v11086_v12 }
 0x283   :  { %8370 = vmatprep.subr.mxu0 %v10735_v15  ;;  %8422 = vmatprep.subr.mxu1 %v10666_v28 }
 0x284   :  { %8295 = vmatmul.mubr.f32.gmra.mxu0 %v4006_v34  ;;  %8345 = vmatmul.mubr.f32.gmra.mxu1 %v10941_v31  ;;  %v4036_v34 = vand.u32 4294901760, %v4035_v40  ;;  %v4065_v25 = vsub.f32 %v11086_v12, %v4064_v24 }
 0x285   :  { %8297 = vmatprep.mubr.f32.mxu0 %v4016_v14  ;;  %8347 = vmatprep.mubr.f32.mxu1 %v10949_v46  ;;  %v4055_v14 = vsub.f32 %v11074_v35, %v4054_v20 }
 0x286   :  { %8371 = vmatpush3.xpose.msra.mxu0 %v10735_v15  ;;  %8423 = vmatpush3.xpose.msra.mxu1 %v10666_v28  ;;  %v4046_v15 = vand.u32 4294901760, %v4045_v17 }
 0x287   :  { %8372 = vmatprep.subr.mxu0 %v10754_v6  ;;  %8424 = vmatprep.subr.mxu1 %v10684_v8  ;;  %v4056_v40 = vand.u32 4294901760, %v4055_v14  ;;  %v13463_v14 = vld [vmem:[#allocation65_spill] sm:$0xff] }
 0x288   :  { %8298 = vmatmul.mubr.f32.gmra.mxu0 %v4026_v1  ;;  %8348 = vmatmul.mubr.f32.gmra.mxu1 %v10969_v11  ;;  %v13455_v1 = vld [vmem:[#allocation28_spill] sm:$0xff] }
 0x289   :  { %8300 = vmatprep.mubr.f32.mxu0 %v4036_v34  ;;  %8350 = vmatprep.mubr.f32.mxu1 %v10978_v47 }
 0x28a   :  { %8373 = vmatpush3.xpose.msra.mxu0 %v10754_v6  ;;  %8425 = vmatpush3.xpose.msra.mxu1 %v10684_v8  ;;  %v4066_v6 = vand.u32 4294901760, %v4065_v25 }
 0x28b   :  { %8374 = vmatprep.subr.mxu0 %v10771_v48  ;;  %8426 = vmatprep.subr.mxu1 %v10706_v42 }
 0x28c   :  { %8301 = vmatmul.mubr.f32.gmra.mxu0 %v4046_v15  ;;  %8351 = vmatmul.mubr.f32.gmra.mxu1 %v10993_v4  ;;  %v13464_v15 = vld [vmem:[#allocation21_spill] sm:$0xff] }
 0x28d   :  { %8303 = vmatprep.mubr.f32.mxu0 %v4056_v40  ;;  %8353 = vmatprep.mubr.f32.mxu1 %v11006_v51  ;;  %v13466_v40 = vld [vmem:[#allocation22_spill] sm:$0xff] }
 0x28e   :  { %8375 = vmatpush3.xpose.msra.mxu0 %v10771_v48  ;;  %8427 = vmatpush3.xpose.msra.mxu1 %v10706_v42  ;;  %v13456_v48 = vand.u32 4294901760, %v13455_v1 }
 0x28f   :  { %8376 = vmatprep.subr.mxu0 %v10790_v45  ;;  %8428 = vmatprep.subr.mxu1 %v10737_v53 }
 0x290   :  { %8304 = vmatmul.mubr.f32.gmra.mxu0 %v4066_v6  ;;  %8354 = vmatmul.mubr.f32.gmra.mxu1 %v11020_v16 }
 0x291   :  { %8356 = vmatprep.mubr.f32.mxu1 %v11032_v49  ;;  %8394 = vmatprep.mubr.f32.mxu0 %v13455_v1 }
 0x292   :  { %8377 = vmatpush3.xpose.msra.mxu0 %v10790_v45  ;;  %8429 = vmatpush3.xpose.msra.mxu1 %v10737_v53  ;;  %v13457_v45 = vld [vmem:[#allocation47_spill] sm:$0xff] }
 0x293   :  { %8378 = vmatprep.subr.mxu0 %v10805_v44  ;;  %8430 = vmatprep.subr.mxu1 %v10751_v19 }
 0x294   :  { %8357 = vmatmul.mubr.f32.gmra.mxu1 %v11044_v22 }
 0x295   :  { %8359 = vmatprep.mubr.f32.mxu1 %v11056_v29 }
 0x296   :  { %8379 = vmatpush3.xpose.msra.mxu0 %v10805_v44  ;;  %8431 = vmatpush3.xpose.msra.mxu1 %v10751_v19  ;;  %v13458_v44 = vld [vmem:[#allocation54_spill] sm:$0xff] }
 0x297   :  { %8380 = vmatprep.subr.mxu0 %v10823_v5  ;;  %8432 = vmatprep.subr.mxu1 %v10773_v57 }
 0x298   :  { %8360 = vmatmul.mubr.f32.gmra.mxu1 %v11066_v30 }
 0x299   :  { %8450 = vmatprep.mubr.f32.mxu1 %v13456_v48 }
 0x29a   :  { %8381 = vmatpush3.xpose.msra.mxu0 %v10823_v5  ;;  %8433 = vmatpush3.xpose.msra.mxu1 %v10773_v57  ;;  %v11171_v5 = vpop.f32.mrf.mxu0 }
 0x29b   :  { %8382 = vmatprep.subr.mxu0 %v10839_v10  ;;  %8434 = vmatprep.subr.mxu1 %v10787_v0 }
 0x29e   :  { %8383 = vmatpush3.xpose.msra.mxu0 %v10839_v10  ;;  %8435 = vmatpush3.xpose.msra.mxu1 %v10787_v0  ;;  %v13459_v10 = vld [vmem:[#allocation87_spill] sm:$0xff] }
 0x29f   :  { %8384 = vmatprep.subr.mxu0 %v10855_v27  ;;  %8436 = vmatprep.subr.mxu1 %v10807_v63  ;;  %v13465_v25 = vand.u32 4294901760, %v13459_v10 }
 0x2a2   :  { %8385 = vmatpush3.xpose.msra.mxu0 %v10855_v27  ;;  %8437 = vmatpush3.xpose.msra.mxu1 %v10807_v63  ;;  %v13460_v27 = vld [vmem:[#allocation32_spill] sm:$0xff] }
 0x2a3   :  { %8386 = vmatprep.subr.mxu0 %v10869_v9  ;;  %8438 = vmatprep.subr.mxu1 %v10820_v52  ;;  %v13467_v6 = vand.u32 4294901760, %v13460_v27 }
 0x2a6   :  { %8387 = vmatpush3.xpose.msra.mxu0 %v10869_v9  ;;  %8439 = vmatpush3.xpose.msra.mxu1 %v10820_v52  ;;  %v13461_v9 = vld [vmem:[#allocation57_spill] sm:$0xff] }
 0x2a7   :  { %8388 = vmatprep.subr.mxu0 %v10888_v60  ;;  %8440 = vmatprep.subr.mxu1 %v10841_v23 }
 0x2aa   :  { %8389 = vmatpush3.xpose.msra.mxu0 %v10888_v60  ;;  %8441 = vmatpush3.xpose.msra.mxu1 %v10841_v23  ;;  %v11178_v60 = vpop.f32.mrf.mxu0 }
 0x2ab   :  { %8390 = vmatprep.subr.mxu0 %v10907_v33  ;;  %8442 = vmatprep.subr.mxu1 %v10852_v18 }
 0x2ac   :  { %v11188_v17 = vpop.f32.mrf.mxu0 }
 0x2ae   :  { %8391 = vmatpush3.xpose.msra.mxu0 %v10907_v33  ;;  %8443 = vmatpush3.xpose.msra.mxu1 %v10852_v18  ;;  %v13462_v33 = vld [vmem:[#allocation62_spill] sm:$0xff]  ;;  %v11201_v1 = vpop.f32.mrf.mxu0 }
 0x2af   :  { %8392 = vmatprep.subr.mxu0 %v10933_v38  ;;  %8444 = vmatprep.subr.mxu1 %v10871_v50 }
 0x2b2   :  { %8393 = vmatpush3.xpose.msra.mxu0 %v10933_v38  ;;  %8445 = vmatpush3.xpose.msra.mxu1 %v10871_v50  ;;  %v11180_v38 = vpop.f32.mrf.mxu1 }
 0x2b3   :  { %8446 = vmatprep.subr.mxu1 %v13457_v45  ;;  %8474 = vmatprep.subr.mxu0 %v13458_v44 }
 0x2b4   :  { %v11190_v34 = vpop.f32.mrf.mxu1 }
 0x2b5   :  { %8395 = vmatmul.mubr.f32.vlgmr.msra.gmra.mxu0 %v13459_v10  ;;  %v13469_v10 = vand.u32 4294901760, %v10945_v59 }
 0x2b6   :  { %8397 = vmatprep.mubr.f32.mxu0 %v13460_v27  ;;  %8447 = vmatpush3.xpose.msra.mxu1 %v13457_v45  ;;  %v11203_v48 = vpop.f32.mrf.mxu1  ;;  %v13470_v27 = vand.u32 4294901760, %v10953_v37 }
 0x2b7   :  { %8475 = vmatpush3.xpose.msra.mxu0 %v13458_v44  ;;  %8448 = vmatprep.subr.mxu1 %v13461_v9  ;;  %v13468_v44 = vld [vmem:[#allocation76_spill] sm:$0xff] }
 0x2b8   :  { %8476 = vmatprep.subr.mxu0 %v13462_v33 }
 0x2b9   :  { %8398 = vmatmul.mubr.f32.gmra.mxu0 %v10945_v59  ;;  %v13472_v59 = vand.u32 4294901760, %v13464_v15 }
 0x2ba   :  { %8400 = vmatprep.mubr.f32.mxu0 %v10953_v37  ;;  %8449 = vmatpush3.xpose.msra.mxu1 %v13461_v9  ;;  %v13473_v37 = vand.u32 4294901760, %v13466_v40 }
 0x2bb   :  { %8477 = vmatpush3.xpose.msra.mxu0 %v13462_v33  ;;  %8530 = vmatprep.subr.mxu1 %v10675_v61  ;;  %v11217_v33 = vpop.f32.mrf.mxu1 }
 0x2bc   :  { %8478 = vmatprep.subr.mxu0 %v13463_v14 }
 0x2bd   :  { %8401 = vmatmul.mubr.f32.gmra.mxu0 %v13464_v15  ;;  %8451 = vmatmul.mubr.f32.vlgmr.msra.gmra.mxu1 %v13465_v25  ;;  %v11231_v25 = vpop.f32.mrf.mxu1  ;;  %v13475_v15 = vand.u32 4294901760, %v10991_v36 }
 0x2be   :  { %8403 = vmatprep.mubr.f32.mxu0 %v13466_v40  ;;  %8453 = vmatprep.mubr.f32.mxu1 %v13467_v6  ;;  %v13474_v6 = vld [vmem:[#allocation110_spill] sm:$0xff]  ;;  %v13476_v40 = vand.u32 4294901760, %v10997_v7 }
 0x2bf   :  { %8479 = vmatpush3.xpose.msra.mxu0 %v13463_v14  ;;  %8531 = vmatpush3.xpose.msra.mxu1 %v10675_v61  ;;  %v11215_v61 = vpop.f32.mrf.mxu0  ;;  %v13471_v14 = vld [vmem:[#allocation109_spill] sm:$0xff] }
 0x2c0   :  { %8480 = vmatprep.subr.mxu0 %v13468_v44  ;;  %8532 = vmatprep.subr.mxu1 %v10689_v13 }
 0x2c1   :  { %8404 = vmatmul.mubr.f32.gmra.mxu0 %v10991_v36  ;;  %8454 = vmatmul.mubr.f32.gmra.mxu1 %v13469_v10  ;;  %v13477_v10 = vld [vmem:[#allocation66_spill] sm:$0xff]  ;;  %v13478_v36 = vand.u32 4294901760, %v11028_v56 }
 0x2c2   :  { %8406 = vmatprep.mubr.f32.mxu0 %v10997_v7  ;;  %8456 = vmatprep.mubr.f32.mxu1 %v13470_v27  ;;  %v13479_v27 = vld [vmem:[#allocation95_spill] sm:$0xff] }
 0x2c3   :  { %8481 = vmatpush3.xpose.msra.mxu0 %v13468_v44  ;;  %8533 = vmatpush3.xpose.msra.mxu1 %v10689_v13  ;;  %v11229_v13 = vpop.f32.mrf.mxu0  ;;  %v11245_v44 = vpop.f32.mrf.mxu1 }
 0x2c4   :  { %8482 = vmatprep.subr.mxu0 %v13471_v14  ;;  %8534 = vmatprep.subr.mxu1 %v10666_v28 }
 0x2c5   :  { %8407 = vmatmul.mubr.f32.gmra.mxu0 %v11015_v32  ;;  %8457 = vmatmul.mubr.f32.gmra.mxu1 %v13472_v59  ;;  %v11259_v7 = vpop.f32.mrf.mxu1  ;;  %v13486_v59 = vld [vmem:[#allocation10_spill] sm:$0xff] }
 0x2c6   :  { %8409 = vmatprep.mubr.f32.mxu0 %v11028_v56  ;;  %8459 = vmatprep.mubr.f32.mxu1 %v13473_v37  ;;  %v13481_v56 = vld [vmem:[#allocation61_spill] sm:$0xff] }
 0x2c7   :  { %8483 = vmatpush3.xpose.msra.mxu0 %v13471_v14  ;;  %8535 = vmatpush3.xpose.msra.mxu1 %v10666_v28  ;;  %v11243_v28 = vpop.f32.mrf.mxu0  ;;  %v11271_v32 = vpop.f32.mrf.mxu1  ;;  %v13483_v14 = vld [vmem:[#allocation40_spill] sm:$0xff] }
 0x2c8   :  { %8484 = vmatprep.subr.mxu0 %v13474_v6  ;;  %8536 = vmatprep.subr.mxu1 %v10684_v8 }
 0x2c9   :  { %8410 = vmatmul.mubr.f32.gmra.mxu0 %v11042_v58  ;;  %8460 = vmatmul.mubr.f32.gmra.mxu1 %v13475_v15  ;;  %v13482_v58 = vld [vmem:[#allocation85_spill] sm:$0xff] }
 0x2ca   :  { %8412 = vmatprep.mubr.f32.mxu0 %v11052_v26  ;;  %8462 = vmatprep.mubr.f32.mxu1 %v13476_v40  ;;  %v13489_v40 = vld [vmem:[#allocation60_spill] sm:$0xff] }
 0x2cb   :  { %8485 = vmatpush3.xpose.msra.mxu0 %v13474_v6  ;;  %8537 = vmatpush3.xpose.msra.mxu1 %v10684_v8  ;;  %v11257_v8 = vpop.f32.mrf.mxu0  ;;  %v13487_v6 = vld [vmem:[#allocation11_spill] sm:$0xff] }
 0x2cc   :  { %8486 = vmatprep.subr.mxu0 %v13477_v10  ;;  %8538 = vmatprep.subr.mxu1 %v10706_v42 }
 0x2cd   :  { %8413 = vmatmul.mubr.f32.gmra.mxu0 %v11064_v39  ;;  %8463 = vmatmul.mubr.f32.gmra.mxu1 %v4004_v2  ;;  %v13480_v2 = vld [vmem:[#allocation24_spill] sm:$0xff] }
 0x2ce   :  { %8415 = vmatprep.mubr.f32.mxu0 %v11074_v35  ;;  %8465 = vmatprep.mubr.f32.mxu1 %v13478_v36  ;;  %v13490_v36 = vld [vmem:[#allocation20_spill] sm:$0xff] }
 0x2cf   :  { %8487 = vmatpush3.xpose.msra.mxu0 %v13477_v10  ;;  %8539 = vmatpush3.xpose.msra.mxu1 %v10706_v42  ;;  %v8196_v42 = vpop.f32.mrf.mxu0 }
 0x2d0   :  { %8488 = vmatprep.subr.mxu0 %v13479_v27  ;;  %8540 = vmatprep.subr.mxu1 %v10737_v53 }
 0x2d1   :  { %8416 = vmatmul.mubr.f32.gmra.mxu0 %v11086_v12  ;;  %8466 = vmatmul.mubr.f32.gmra.mxu1 %v4024_v43  ;;  %v3451_v43 = vpop.f32.mrf.mxu0  ;;  %v13488_v12 = vld [vmem:[#allocation80_spill] sm:$0xff] }
 0x2d2   :  { %8468 = vmatprep.mubr.f32.mxu1 %v4034_v55  ;;  %8506 = vmatprep.mubr.f32.mxu0 %v13480_v2  ;;  %v8246_v55 = vpop.f32.mrf.mxu1 }
 0x2d3   :  { %8489 = vmatpush3.xpose.msra.mxu0 %v13479_v27  ;;  %8541 = vmatpush3.xpose.msra.mxu1 %v10737_v53  ;;  %v11284_v53 = vld [vmem:[%s12727_s4] ss:$0 sm:$0xff]  ;;  %v8199_v35 = vpop.f32.mrf.mxu0  ;;  %s9076_s4 = smov [#allocation2]  }
 0x2d4   :  { %8490 = vmatprep.subr.mxu0 %v13481_v56  ;;  %8542 = vmatprep.subr.mxu1 %v10751_v19  ;;  %v2325_v26 = vadd.f32 %v11284_v53, %v13482_v58  ;;  %v3470_v15 = vadd.f32 %v8199_v35, %v13487_v6  ;;  %s6857_s11 = sshll.u32 %s9076_s4, 4  ;;  %s6858_s11 = int_to_ptr.vmem [resolvable:$true] %s6857_s11 }
 0x2d5   :  { %8469 = vmatmul.mubr.f32.gmra.mxu1 %v4044_v62  ;;  %v3709_v62 = vpop.f32.mrf.mxu1  ;;  %v3463_v10 = vpop.f32.mrf.mxu0  ;;  %s9054_s12 = scalar_lea.vmem %s6858_s11, 4096  ;;  %p9059_p1 = scmp.lt.s32.totalorder %s6858_s11, %s6858_s11 }
 0x2d6   :  { %8471 = vmatprep.mubr.f32.mxu1 %v4054_v20  ;;  %v13485_v20 = vld [vmem:[#allocation93_spill] sm:$0xff]  ;;  %p9055_p0 = scmp.ne.s32.totalorder %s6858_s11, %s9054_s12  ;;  %p9060_p2 = scmp.lt.s32.totalorder %s9054_s12, %s9054_s12 }
 0x2d7   :  { %8491 = vmatpush3.xpose.msra.mxu0 %v13481_v56  ;;  %8543 = vmatpush3.xpose.msra.mxu1 %v10751_v19  ;;  %v13484_v19 = vld [vmem:[#allocation83_spill] sm:$0xff]  ;;  %v13491_v56 = vld [vmem:[#allocation81_spill] sm:$0xff] }
 0x2d8   :  { %8492 = vmatprep.subr.mxu0 %v13483_v14  ;;  %8544 = vmatprep.subr.mxu1 %v10773_v57  ;;  %v2591_v39 = vadd.f32 %v13484_v19, %v2325_v26  ;;  %v13493_v19 = vld [vmem:[#allocation7_spill] sm:$0xff]  ;;  %p9061_p3 = por %p9060_p2, %p9059_p1 }
 0x2d9   :  { %8472 = vmatmul.mubr.f32.gmra.mxu1 %v4064_v24  ;;  %v2305_v24 = vadd.f32 %v11284_v53, %v13488_v12  ;;  %v13497_v12 = vld [vmem:[#allocation9_spill] sm:$0xff] }
 0x2da   :  { %8562 = vmatprep.mubr.f32.mxu1 %v13480_v2  ;;  %v2881_v37 = vadd.f32 %v13486_v59, %v2591_v39  ;;  %p9062_p4 = pnand %p9061_p3, %p9055_p0 }
 0x2db   :  { %8493 = vmatpush3.xpose.msra.mxu0 %v13483_v14  ;;  %8545 = vmatpush3.xpose.msra.mxu1 %v10773_v57  ;;  %v8249_v57 = vpop.f32.mrf.mxu1  ;;  %v2579_v58 = vadd.f32 %v13491_v56, %v2305_v24 }
 0x2dc   :  { %8494 = vmatprep.subr.mxu0 %v13485_v20  ;;  %8546 = vmatprep.subr.mxu1 %v10787_v0  ;;  %v3202_v27 = vadd.f32 %v13490_v36, %v2881_v37  ;;  %v3728_v2 = vadd.f32 %v8249_v57, %v3470_v15  ;;  %v13496_v15 = vld [vmem:[#allocation26_spill] sm:$0xff] }
 0x2dd   :  { %v3721_v14 = vpop.f32.mrf.mxu1  ;;  %v2867_v39 = vadd.f32 %v13493_v19, %v2579_v58 }
 0x2de   :  { %v3464_v26 = vadd.f32 %v3463_v10, %v3202_v27  ;;  %v5387_v35 = vsel %vm3734_vm2, %v3728_v2, 0  ;;  %v13500_v2 = vld [vmem:[#allocation108_spill] sm:$0xff] }
 0x2df   :  { %8495 = vmatpush3.xpose.msra.mxu0 %v13485_v20  ;;  %8547 = vmatpush3.xpose.msra.mxu1 %v10787_v0  ;;  %v13492_v0 = vld [vmem:[#allocation90_spill] sm:$0xff]  ;;  %v13494_v20 = vld [vmem:[#allocation79_spill] sm:$0xff]  ;;  %v3186_v24 = vadd.f32 %v13497_v12, %v2867_v39  ;;  %v11322_v57 = vand.u32 4294901760, %v5387_v35  ;;  %v13503_v39 = vld [vmem:[#allocation88_spill] sm:$0xff] }
 0x2e0   :  { %8496 = vmatprep.subr.mxu0 %v13489_v40  ;;  %8548 = vmatprep.subr.mxu1 %v10807_v63  ;;  %v2285_v59 = vadd.f32 %v11284_v53, %v13494_v20  ;;  %v3722_v6 = vadd.f32 %v3721_v14, %v3464_v26  ;;  %v13501_v26 = vld [vmem:[#allocation5_spill] sm:$0xff]  ;;  %v13508_v12 = vld [vmem:[#allocation92_spill] sm:$0xff] }
 0x2e1   :  { %v3452_v10 = vadd.f32 %v3451_v43, %v3186_v24  ;;  %v11332_v58 = vsub.f32 %v5387_v35, %v11322_v57  ;;  %v13504_v35 = vld [vmem:[#allocation6_spill] sm:$0xff] }
 0x2e2   :  { %v5384_v27 = vsel %vm3734_vm2, %v3722_v6, 0 }
 0x2e3   :  { %8497 = vmatpush3.xpose.msra.mxu0 %v13489_v40  ;;  %8549 = vmatpush3.xpose.msra.mxu1 %v10807_v63  ;;  %v13495_v63 = vld [vmem:[#allocation8_spill] sm:$0xff]  ;;  %v11336_v14 = vand.u32 4294901760, %v5384_v27  ;;  %v3710_v19 = vadd.f32 %v3709_v62, %v3452_v10  ;;  %v13506_v62 = vld [vmem:[#allocation71_spill] sm:$0xff] }
 0x2e4   :  { %8498 = vmatprep.subr.mxu0 %v13492_v0  ;;  %8550 = vmatprep.subr.mxu1 %v10820_v52  ;;  %v3458_v37 = vadd.f32 %v8196_v42, %v13495_v63  ;;  %v13498_v40 = vld [vmem:[#allocation72_spill] sm:$0xff]  ;;  %v13499_v42 = vld [vmem:[#allocation35_spill] sm:$0xff] }
 0x2e5   :  { %v13510_v10 = vld [vmem:[#allocation107_spill] sm:$0xff] }
 0x2e6   :  { %v3716_v36 = vadd.f32 %v8246_v55, %v3458_v37 }
 0x2e7   :  { %8499 = vmatpush3.xpose.msra.mxu0 %v13492_v0  ;;  %8551 = vmatpush3.xpose.msra.mxu1 %v10820_v52  ;;  %v2567_v52 = vadd.f32 %v13498_v40, %v2285_v59  ;;  %v3446_v0 = vadd.f32 %v11243_v28, %v13501_v26  ;;  %v11347_v28 = vand.u32 4294901760, %v11332_v58  ;;  %v13509_v40 = vld [vmem:[#allocation102_spill] sm:$0xff] }
 0x2e8   :  { %8500 = vmatprep.subr.mxu0 %v13496_v15  ;;  %8552 = vmatprep.subr.mxu1 %v10841_v23  ;;  %v5381_v55 = vsel %vm3734_vm2, %v3716_v36, 0  ;;  %v3434_v36 = vadd.f32 %v11215_v61, %v13510_v10  ;;  %v13512_v61 = vld [vmem:[#allocation75_spill] sm:$0xff] }
 0x2e9   :  { %v2853_v56 = vadd.f32 %v13500_v2, %v2567_v52  ;;  %13505 = vst [vmem:[#allocation25_spill] sm:$0xff] %v11347_v28  ;;  %v3704_v59 = vadd.f32 %v11259_v7, %v3446_v0  ;;  %v11350_v63 = vand.u32 4294901760, %v5381_v55  ;;  %v13507_v7 = vld [vmem:[#allocation73_spill] sm:$0xff]  ;;  %v13513_v0 = vld [vmem:[#allocation100_spill] sm:$0xff] }
 0x2ea   :  { %v1590_v24 = vadd.f32 %v13508_v12, %v13507_v7  ;;  %v13518_v7 = vld [vmem:[#allocation99_spill] sm:$0xff] }
 0x2eb   :  { %8501 = vmatpush3.xpose.msra.mxu0 %v13496_v15  ;;  %8553 = vmatpush3.xpose.msra.mxu1 %v10841_v23  ;;  %v13502_v23 = vld [vmem:[#allocation78_spill] sm:$0xff]  ;;  %v3170_v20 = vadd.f32 %v13504_v35, %v2853_v56  ;;  %v5378_v15 = vsel %vm3734_vm2, %v3710_v19, 0  ;;  %v2245_v56 = vadd.f32 %v11284_v53, %v13512_v61  ;;  %v3422_v12 = vadd.f32 %v11188_v17, %v13518_v7 }
 0x2ec   :  { %8502 = vmatprep.subr.mxu0 %v13499_v42  ;;  %8554 = vmatprep.subr.mxu1 %v10852_v18  ;;  %v2265_v43 = vadd.f32 %v11284_v53, %v13502_v23  ;;  %v1848_v23 = vadd.f32 %v13513_v0, %v1590_v24 }
 0x2ed   :  { %v3440_v6 = vadd.f32 %v11257_v8, %v3170_v20  ;;  %v5375_v8 = vsel %vm3734_vm2, %v3704_v59, 0  ;;  %v13516_v59 = vld [vmem:[#allocation70_spill] sm:$0xff] }
 0x2ee   :  { %v2555_v37 = vadd.f32 %v13506_v62, %v2265_v43  ;;  %v13514_v43 = vld [vmem:[#allocation105_spill] sm:$0xff]  ;;  %v11390_v19 = vand.u32 4294901760, %v5375_v8 }
 0x2ef   :  { %8503 = vmatpush3.xpose.msra.mxu0 %v13499_v42  ;;  %8555 = vmatpush3.xpose.msra.mxu1 %v10852_v18  ;;  %v11353_v18 = vsub.f32 %v5384_v27, %v11336_v14  ;;  %v11372_v27 = vsub.f32 %v5381_v55, %v11350_v63  ;;  %v11374_v42 = vand.u32 4294901760, %v5378_v15  ;;  %v3698_v26 = vadd.f32 %v11271_v32, %v3440_v6 }
 0x2f0   :  { %8504 = vmatprep.subr.mxu0 %v13503_v39  ;;  %8556 = vmatprep.subr.mxu1 %v10871_v50  ;;  %v2839_v52 = vadd.f32 %v13509_v40, %v2555_v37  ;;  %v5294_v6 = vsel %vm3734_vm2, %v1848_v23, 0  ;;  %v11414_v40 = vsub.f32 %v5375_v8, %v11390_v19 }
 0x2f1   :  { %v11379_v2 = vand.u32 4294901760, %v11353_v18  ;;  %v11394_v35 = vsub.f32 %v5378_v15, %v11374_v42  ;;  %v11401_v20 = vand.u32 4294901760, %v11372_v27  ;;  %v5372_v37 = vsel %vm3734_vm2, %v3698_v26, 0 }
 0x2f2   :  { %v3154_v55 = vadd.f32 %v13514_v43, %v2839_v52  ;;  %v11448_v23 = vand.u32 4294901760, %v11414_v40 }
 0x2f3   :  { %8505 = vmatpush3.xpose.msra.mxu0 %v13503_v39  ;;  %8557 = vmatpush3.xpose.msra.mxu1 %v10871_v50  ;;  %v5634_v50 = vsub.f32 %v11332_v58, %v11347_v28  ;;  %13511 = vst [vmem:[#allocation41_spill] sm:$0xff] %v11379_v2  ;;  %v5641_v32 = vsub.f32 %v11353_v18, %v11379_v2  ;;  %13515 = vst [vmem:[#allocation48_spill] sm:$0xff] %v11401_v20  ;;  %v11425_v17 = vand.u32 4294901760, %v11394_v35  ;;  %v13581_v28 = vld [vmem:[#allocation51_spill] sm:$0xff] }
 0x2f4   :  { %8558 = vmatprep.subr.mxu1 %v13457_v45  ;;  %8586 = vmatprep.subr.mxu0 %v11322_v57  ;;  %v3428_v62 = vadd.f32 %v11229_v13, %v3154_v55  ;;  %v11418_v13 = vand.u32 4294901760, %v5372_v37  ;;  %v5648_v10 = vsub.f32 %v11372_v27, %v11401_v20  ;;  %13523 = vst [vmem:[#allocation50_spill] sm:$0xff] %v11448_v23 }
 0x2f5   :  { %v5635_v39 = vand.u32 4294901760, %v5634_v50  ;;  %v5642_v52 = vand.u32 4294901760, %v5641_v32  ;;  %13519 = vst [vmem:[#allocation42_spill] sm:$0xff] %v11425_v17  ;;  %v5655_v0 = vsub.f32 %v11394_v35, %v11425_v17  ;;  %v13526_v32 = vld [vmem:[#allocation98_spill] sm:$0xff] }
 0x2f6   :  { %8507 = vmatmul.mubr.f32.vlgmr.msra.gmra.mxu0 %v10895_v21  ;;  %v3686_v8 = vadd.f32 %v11245_v44, %v3428_v62  ;;  %v11441_v44 = vsub.f32 %v5372_v37, %v11418_v13 }
 0x2f7   :  { %8509 = vmatprep.mubr.f32.mxu0 %v10902_v41  ;;  %8559 = vmatpush3.xpose.msra.mxu1 %v13457_v45  ;;  %v3692_v45 = vadd.f32 %v11231_v25, %v3434_v36  ;;  %v2543_v25 = vadd.f32 %v13516_v59, %v2245_v56  ;;  %v13520_v36 = vld [vmem:[#allocation69_spill] sm:$0xff]  ;;  %v3680_v56 = vadd.f32 %v11203_v48, %v3422_v12  ;;  %v13524_v48 = vld [vmem:[#allocation67_spill] sm:$0xff]  ;;  %v5656_v37 = vand.u32 4294901760, %v5655_v0 }
 0x2f8   :  { %8587 = vmatpush3.xpose.msra.mxu0 %v11322_v57  ;;  %8560 = vmatprep.subr.mxu1 %v13461_v9  ;;  %v2225_v50 = vadd.f32 %v11284_v53, %v13520_v36  ;;  %v5649_v53 = vand.u32 4294901760, %v5648_v10  ;;  %v3410_v59 = vadd.f32 %v11171_v5, %v13526_v32  ;;  %v11474_v5 = vand.u32 4294901760, %v11441_v44 }
 0x2f9   :  { %8588 = vmatprep.subr.mxu0 %v11336_v14  ;;  %v5369_v24 = vsel %vm3734_vm2, %v3692_v45, 0 }
 0x2fa   :  { %8510 = vmatmul.mubr.f32.gmra.mxu0 %v10920_v54  ;;  %v11436_v26 = vand.u32 4294901760, %v5369_v24  ;;  %v2531_v43 = vadd.f32 %v13524_v48, %v2225_v50  ;;  %13527 = vst [vmem:[#allocation63_spill] sm:$0xff] %v11474_v5 }
 0x2fb   :  { %8512 = vmatprep.mubr.f32.mxu0 %v10928_v3  ;;  %8561 = vmatpush3.xpose.msra.mxu1 %v13461_v9  ;;  %v13517_v9 = vld [vmem:[#allocation101_spill] sm:$0xff] }
 0x2fc   :  { %8589 = vmatpush3.xpose.msra.mxu0 %v11336_v14  ;;  %8642 = vmatprep.subr.mxu1 %v5635_v39  ;;  %v2825_v15 = vadd.f32 %v13517_v9, %v2543_v25  ;;  %v5363_v25 = vsel %vm3734_vm2, %v3680_v56, 0 }
 0x2fd   :  { %8590 = vmatprep.subr.mxu0 %v11350_v63  ;;  %v11482_v12 = vand.u32 4294901760, %v5363_v25 }
 0x2fe   :  { %8513 = vmatmul.mubr.f32.gmra.mxu0 %v10941_v31  ;;  %8563 = vmatmul.mubr.f32.vlgmr.msra.gmra.mxu1 %v10895_v21  ;;  %v11431_v21 = vand.u32 4294901760, %v5294_v6 }
 0x2ff   :  { %8515 = vmatprep.mubr.f32.mxu0 %v10949_v46  ;;  %8565 = vmatprep.mubr.f32.mxu1 %v10902_v41  ;;  %v13522_v41 = vld [vmem:[#allocation104_spill] sm:$0xff]  ;;  %v11505_v50 = vsub.f32 %v5363_v25, %v11482_v12  ;;  %v13535_v25 = vld [vmem:[#allocation103_spill] sm:$0xff] }
 0x300   :  { %8591 = vmatpush3.xpose.msra.mxu0 %v11350_v63  ;;  %8643 = vmatpush3.xpose.msra.mxu1 %v5635_v39  ;;  %13521 = vst [vmem:[#allocation55_spill] sm:$0xff] %v11431_v21  ;;  %v3138_v61 = vadd.f32 %v13522_v41, %v2825_v15  ;;  %v11455_v45 = vsub.f32 %v5294_v6, %v11431_v21  ;;  %v13528_v15 = vld [vmem:[#allocation96_spill] sm:$0xff] }
 0x301   :  { %8592 = vmatprep.subr.mxu0 %v11374_v42  ;;  %8644 = vmatprep.subr.mxu1 %v5642_v52  ;;  %v5662_v6 = vsub.f32 %v11414_v40, %v11448_v23  ;;  %v11532_v48 = vand.u32 4294901760, %v11505_v50 }
 0x302   :  { %8516 = vmatmul.mubr.f32.gmra.mxu0 %v10969_v11  ;;  %8566 = vmatmul.mubr.f32.gmra.mxu1 %v10920_v54  ;;  %v3416_v55 = vadd.f32 %v11201_v1, %v3138_v61  ;;  %v5366_v54 = vsel %vm3734_vm2, %v3686_v8, 0  ;;  %v11463_v1 = vsub.f32 %v5369_v24, %v11436_v26 }
 0x303   :  { %8518 = vmatprep.mubr.f32.mxu0 %v10978_v47  ;;  %8568 = vmatprep.mubr.f32.mxu1 %v10928_v3  ;;  %v13525_v3 = vld [vmem:[#allocation94_spill] sm:$0xff]  ;;  %v11467_v62 = vand.u32 4294901760, %v5366_v54  ;;  %v5663_v24 = vand.u32 4294901760, %v5662_v6  ;;  %13531 = vst [vmem:[#allocation64_spill] sm:$0xff] %v11532_v48 }
 0x304   :  { %8593 = vmatpush3.xpose.msra.mxu0 %v11374_v42  ;;  %8645 = vmatpush3.xpose.msra.mxu1 %v5642_v52  ;;  %v2811_v39 = vadd.f32 %v13525_v3, %v2531_v43  ;;  %v3674_v9 = vadd.f32 %v11217_v33, %v3416_v55  ;;  %v5669_v52 = vsub.f32 %v11441_v44, %v11474_v5  ;;  %v11494_v10 = vand.u32 4294901760, %v11463_v1 }
 0x305   :  { %8594 = vmatprep.subr.mxu0 %v11390_v19  ;;  %8646 = vmatprep.subr.mxu1 %v5649_v53  ;;  %v11487_v33 = vsub.f32 %v5366_v54, %v11467_v62 }
 0x306   :  { %8519 = vmatmul.mubr.f32.gmra.mxu0 %v10993_v4  ;;  %8569 = vmatmul.mubr.f32.gmra.mxu1 %v10941_v31  ;;  %v12952_v31 = vand.u32 4294901760, %v11455_v45  ;;  %v3122_v7 = vadd.f32 %v13528_v15, %v2811_v39  ;;  %13529 = vst [vmem:[#allocation59_spill] sm:$0xff] %v11494_v10  ;;  %v5360_v36 = vsel %vm3734_vm2, %v3674_v9, 0  ;;  %v5670_v8 = vand.u32 4294901760, %v5669_v52  ;;  %v13540_v52 = vld [vmem:[#allocation14_spill] sm:$0xff] }
 0x307   :  { %8521 = vmatprep.mubr.f32.mxu0 %v11006_v51  ;;  %8571 = vmatprep.mubr.f32.mxu1 %v10949_v46  ;;  %v3668_v46 = vadd.f32 %v11180_v38, %v3410_v59  ;;  %v5676_v41 = vsub.f32 %v11463_v1, %v11494_v10  ;;  %v11516_v61 = vand.u32 4294901760, %v11487_v33  ;;  %v5690_v39 = vsub.f32 %v11505_v50, %v11532_v48  ;;  %v13534_v59 = vld [vmem:[#allocation13_spill] sm:$0xff]  ;;  %v13567_v48 = vld [vmem:[#allocation38_spill] sm:$0xff] }
 0x308   :  { %8595 = vmatpush3.xpose.msra.mxu0 %v11390_v19  ;;  %8647 = vmatpush3.xpose.msra.mxu1 %v5649_v53  ;;  %v3404_v38 = vadd.f32 %v11178_v60, %v3122_v7  ;;  %v11509_v60 = vand.u32 4294901760, %v5360_v36  ;;  %v13538_v7 = vld [vmem:[#allocation68_spill] sm:$0xff] }
 0x309   :  { %8596 = vmatprep.subr.mxu0 %v11418_v13  ;;  %8648 = vmatprep.subr.mxu1 %v5656_v37  ;;  %13530 = vst [vmem:[#allocation74_spill] sm:$0xff] %v11516_v61  ;;  %v5683_v0 = vsub.f32 %v11487_v33, %v11516_v61  ;;  %v5691_v6 = vand.u32 4294901760, %v5690_v39  ;;  %v13547_v39 = vld [vmem:[#allocation15_spill] sm:$0xff] }
 0x30a   :  { %8522 = vmatmul.mubr.f32.gmra.mxu0 %v11020_v16  ;;  %8572 = vmatmul.mubr.f32.gmra.mxu1 %v10969_v11  ;;  %v5357_v11 = vsel %vm3734_vm2, %v3668_v46, 0  ;;  %v3662_v56 = vadd.f32 %v11190_v34, %v3404_v38  ;;  %v5677_v34 = vand.u32 4294901760, %v5676_v41  ;;  %v5348_v46 = vsel %vm3734_vm2, %v13538_v7, 0  ;;  %v13541_v38 = vld [vmem:[#allocation16_spill] sm:$0xff] }
 0x30b   :  { %8524 = vmatprep.mubr.f32.mxu0 %v11032_v49  ;;  %8574 = vmatprep.mubr.f32.mxu1 %v10978_v47  ;;  %v5473_v47 = vsub.f32 %v11455_v45, %v12952_v31  ;;  %v11521_v53 = vand.u32 4294901760, %v5357_v11  ;;  %v5684_v3 = vand.u32 4294901760, %v5683_v0  ;;  %v11579_v41 = vand.u32 4294901760, %v5348_v46  ;;  %v13545_v0 = vld [vmem:[#allocation97_spill] sm:$0xff] }
 0x30c   :  { %8597 = vmatpush3.xpose.msra.mxu0 %v11418_v13  ;;  %8649 = vmatpush3.xpose.msra.mxu1 %v5656_v37  ;;  %v5354_v43 = vsel %vm3734_vm2, %v3662_v56, 0 }
 0x30d   :  { %8598 = vmatprep.subr.mxu0 %v11436_v26  ;;  %8650 = vmatprep.subr.mxu1 %v5663_v24  ;;  %v11543_v54 = vand.u32 4294901760, %v5354_v43  ;;  %13543 = vst [vmem:[#allocation84_spill] sm:$0xff] %v11579_v41 }
 0x30e   :  { %8525 = vmatmul.mubr.f32.gmra.mxu0 %v11044_v22  ;;  %8575 = vmatmul.mubr.f32.gmra.mxu1 %v10993_v4  ;;  %v5474_v4 = vand.u32 4294901760, %v5473_v47  ;;  %v13542_v47 = vld [vmem:[#allocation49_spill] sm:$0xff] }
 0x30f   :  { %8527 = vmatprep.mubr.f32.mxu0 %v11056_v29  ;;  %8577 = vmatprep.mubr.f32.mxu1 %v11006_v51  ;;  %v11526_v51 = vsub.f32 %v5360_v36, %v11509_v60  ;;  %v1614_v36 = vadd.f32 %v13541_v38, %v13540_v52 }
 0x310   :  { %8599 = vmatpush3.xpose.msra.mxu0 %v11436_v26  ;;  %8651 = vmatpush3.xpose.msra.mxu1 %v5663_v24 }
 0x311   :  { %8600 = vmatprep.subr.mxu0 %v11467_v62  ;;  %8652 = vmatprep.subr.mxu1 %v5670_v8  ;;  %v11549_v32 = vand.u32 4294901760, %v11526_v51 }
 0x312   :  { %8528 = vmatmul.mubr.f32.gmra.mxu0 %v11066_v30  ;;  %8578 = vmatmul.mubr.f32.gmra.mxu1 %v11020_v16  ;;  %v13532_v16 = vld [vmem:[#allocation58_spill] sm:$0xff] }
 0x313   :  { %8580 = vmatprep.mubr.f32.mxu1 %v11032_v49  ;;  %8618 = vmatprep.mubr.f32.mxu0 %v5474_v4  ;;  %v5351_v55 = vsel %vm3734_vm2, %v13532_v16, 0  ;;  %v11540_v49 = vsub.f32 %v5357_v11, %v11521_v53  ;;  %13533 = vst [vmem:[#allocation82_spill] sm:$0xff] %v11549_v32  ;;  %v5697_v9 = vsub.f32 %v11526_v51, %v11549_v32  ;;  %v5345_v11 = vsel %vm3734_vm2, %v13542_v47, 0 }
 0x314   :  { %8601 = vmatpush3.xpose.msra.mxu0 %v11467_v62  ;;  %8653 = vmatpush3.xpose.msra.mxu1 %v5670_v8  ;;  %v11555_v37 = vand.u32 4294901760, %v5351_v55 }
 0x315   :  { %8602 = vmatprep.subr.mxu0 %v11482_v12  ;;  %8654 = vmatprep.subr.mxu1 %v5677_v34  ;;  %v11565_v15 = vand.u32 4294901760, %v11540_v49  ;;  %v5698_v56 = vand.u32 4294901760, %v5697_v9  ;;  %v11597_v9 = vsub.f32 %v5348_v46, %v11579_v41 }
 0x316   :  { %8581 = vmatmul.mubr.f32.gmra.mxu1 %v11044_v22  ;;  %v1602_v22 = vadd.f32 %v13535_v25, %v13534_v59  ;;  %13536 = vst [vmem:[#allocation77_spill] sm:$0xff] %v11555_v37  ;;  %v11577_v8 = vsub.f32 %v5351_v55, %v11555_v37  ;;  %v13546_v55 = vld [vmem:[#allocation27_spill] sm:$0xff]  ;;  %v13548_v59 = vld [vmem:[#allocation33_spill] sm:$0xff] }
 0x317   :  { %8583 = vmatprep.mubr.f32.mxu1 %v11056_v29  ;;  %v11559_v29 = vsub.f32 %v5354_v43, %v11543_v54  ;;  %13537 = vst [vmem:[#allocation86_spill] sm:$0xff] %v11565_v15  ;;  %v5704_v4 = vsub.f32 %v11540_v49, %v11565_v15  ;;  %v5297_v43 = vsel %vm3734_vm2, %v13545_v0, 0  ;;  %v1626_v25 = vadd.f32 %v13548_v59, %v13547_v39  ;;  %v13554_v0 = vld [vmem:[#allocation30_spill] sm:$0xff]  ;;  %v13555_v39 = vld [vmem:[#allocation17_spill] sm:$0xff]  ;;  %v13556_v59 = vld [vmem:[#allocation36_spill] sm:$0xff] }
 0x318   :  { %8603 = vmatpush3.xpose.msra.mxu0 %v11482_v12  ;;  %8655 = vmatpush3.xpose.msra.mxu1 %v5677_v34  ;;  %v11604_v52 = vand.u32 4294901760, %v5297_v43  ;;  %v1638_v31 = vadd.f32 %v13556_v59, %v13555_v39  ;;  %v11626_v15 = vand.u32 4294901760, %v11597_v9 }
 0x319   :  { %8604 = vmatprep.subr.mxu0 %v11509_v60  ;;  %8656 = vmatprep.subr.mxu1 %v5684_v3  ;;  %v11584_v34 = vand.u32 4294901760, %v11559_v29  ;;  %v5705_v7 = vand.u32 4294901760, %v5704_v4 }
 0x31a   :  { %8584 = vmatmul.mubr.f32.gmra.mxu1 %v11066_v30  ;;  %v13539_v30 = vld [vmem:[#allocation12_spill] sm:$0xff]  ;;  %13559 = vst [vmem:[#allocation32_spill] sm:$0xff] %v11626_v15  ;;  %v11629_v32 = vsub.f32 %v5297_v43, %v11604_v52  ;;  %v13565_v43 = vld [vmem:[#allocation37_spill] sm:$0xff]  ;;  %v5725_v61 = vsub.f32 %v11597_v9, %v11626_v15  ;;  %v13573_v15 = vld [vmem:[#allocation19_spill] sm:$0xff] }
 0x31b   :  { %8674 = vmatprep.mubr.f32.mxu1 %v11431_v21  ;;  %v1860_v24 = vadd.f32 %v13539_v30, %v1602_v22  ;;  %13544 = vst [vmem:[#allocation91_spill] sm:$0xff] %v11584_v34  ;;  %v11594_v22 = vand.u32 4294901760, %v5345_v11  ;;  %v11602_v30 = vand.u32 4294901760, %v11577_v8  ;;  %v1896_v59 = vadd.f32 %v13565_v43, %v1638_v31  ;;  %v13572_v43 = vld [vmem:[#allocation39_spill] sm:$0xff] }
 0x31c   :  { %8605 = vmatpush3.xpose.msra.mxu0 %v11509_v60  ;;  %8657 = vmatpush3.xpose.msra.mxu1 %v5684_v3  ;;  %v1872_v3 = vadd.f32 %v13546_v55, %v1614_v36  ;;  %v13552_v36 = vld [vmem:[#allocation106_spill] sm:$0xff]  ;;  %v1884_v55 = vadd.f32 %v13554_v0, %v1626_v25  ;;  %13560 = vst [vmem:[#allocation57_spill] sm:$0xff] %v11629_v32  ;;  %v13563_v25 = vld [vmem:[#allocation29_spill] sm:$0xff]  ;;  %v5726_v17 = vand.u32 4294901760, %v5725_v61  ;;  %v13576_v2 = vand.u32 4294901760, %v11629_v32 }
 0x31d   :  { %8606 = vmatprep.subr.mxu0 %v11521_v53  ;;  %8658 = vmatprep.subr.mxu1 %v5691_v6  ;;  %v5300_v16 = vsel %vm3734_vm2, %v1860_v24, 0  ;;  %13549 = vst [vmem:[#allocation89_spill] sm:$0xff] %v11594_v22  ;;  %13550 = vst [vmem:[#allocation28_spill] sm:$0xff] %v11602_v30  ;;  %v13551_v24 = vld [vmem:[#allocation52_spill] sm:$0xff]  ;;  %v5303_v47 = vsel %vm3734_vm2, %v13552_v36, 0  ;;  %v5718_v36 = vsub.f32 %v11577_v8, %v11602_v30  ;;  %v13566_v30 = vld [vmem:[#allocation18_spill] sm:$0xff] }
 0x31e   :  { %v5342_v38 = vsel %vm3734_vm2, %v13551_v24, 0  ;;  %v11611_v46 = vand.u32 4294901760, %v5300_v16  ;;  %v5306_v4 = vsel %vm3734_vm2, %v1872_v3, 0  ;;  %v11619_v24 = vsub.f32 %v5345_v11, %v11594_v22  ;;  %v13579_v61 = vld [vmem:[#allocation46_spill] sm:$0xff] }
 0x31f   :  { %v11632_v3 = vand.u32 4294901760, %v5303_v47  ;;  %v11640_v0 = vand.u32 4294901760, %v5306_v4  ;;  %v5312_v39 = vsel %vm3734_vm2, %v1884_v55, 0 }
 0x320   :  { %8607 = vmatpush3.xpose.msra.mxu0 %v11521_v53  ;;  %8659 = vmatpush3.xpose.msra.mxu1 %v5691_v6  ;;  %v5711_v6 = vsub.f32 %v11559_v29, %v11584_v34  ;;  %13553 = vst [vmem:[#allocation47_spill] sm:$0xff] %v11611_v46  ;;  %13557 = vst [vmem:[#allocation54_spill] sm:$0xff] %v11619_v24  ;;  %v11621_v34 = vand.u32 4294901760, %v5342_v38  ;;  %v11635_v11 = vsub.f32 %v5300_v16, %v11611_v46 }
 0x321   :  { %8608 = vmatprep.subr.mxu0 %v11543_v54  ;;  %8660 = vmatprep.subr.mxu1 %v5698_v56  ;;  %13561 = vst [vmem:[#allocation62_spill] sm:$0xff] %v11632_v3  ;;  %13564 = vst [vmem:[#allocation21_spill] sm:$0xff] %v11640_v0  ;;  %v5719_v16 = vand.u32 4294901760, %v5718_v36  ;;  %v11659_v31 = vsub.f32 %v5303_v47, %v11632_v3  ;;  %v11667_v55 = vsub.f32 %v5306_v4, %v11640_v0  ;;  %v13574_v47 = vld [vmem:[#allocation45_spill] sm:$0xff] }
 0x322   :  { %13558 = vst [vmem:[#allocation87_spill] sm:$0xff] %v11621_v34  ;;  %13562 = vst [vmem:[#allocation65_spill] sm:$0xff] %v11635_v11  ;;  %v11647_v21 = vsub.f32 %v5342_v38, %v11621_v34  ;;  %v11663_v38 = vand.u32 4294901760, %v5312_v39  ;;  %v5318_v36 = vsel %vm3734_vm2, %v1896_v59, 0  ;;  %v1662_v23 = vadd.f32 %v13574_v47, %v13573_v15 }
 0x323   :  { %13569 = vst [vmem:[#allocation76_spill] sm:$0xff] %v11659_v31  ;;  %v5483_v4 = vsub.f32 %v11629_v32, %v13576_v2 }
 0x324   :  { %8609 = vmatpush3.xpose.msra.mxu0 %v11543_v54  ;;  %8661 = vmatpush3.xpose.msra.mxu1 %v5698_v56  ;;  %v5712_v56 = vand.u32 4294901760, %v5711_v6  ;;  %v5309_v6 = vsel %vm3734_vm2, %v13563_v25, 0  ;;  %v11652_v25 = vand.u32 4294901760, %v11619_v24  ;;  %13571 = vst [vmem:[#allocation109_spill] sm:$0xff] %v11663_v38  ;;  %v11677_v20 = vand.u32 4294901760, %v11647_v21 }
 0x325   :  { %8610 = vmatprep.subr.mxu0 %v11555_v37  ;;  %8662 = vmatprep.subr.mxu1 %v5705_v7  ;;  %v11655_v5 = vand.u32 4294901760, %v5309_v6  ;;  %v11690_v15 = vsub.f32 %v5312_v39, %v11663_v38  ;;  %v1920_v32 = vadd.f32 %v13579_v61, %v1662_v23  ;;  %v13580_v39 = vld [vmem:[#allocation23_spill] sm:$0xff] }
 0x326   :  { %13568 = vst [vmem:[#allocation22_spill] sm:$0xff] %v11652_v25  ;;  %13575 = vst [vmem:[#allocation110_spill] sm:$0xff] %v11677_v20 }
 0x327   :  { %v11683_v59 = vsub.f32 %v5309_v6, %v11655_v5  ;;  %v13578_v6 = vand.u32 4294901760, %v11635_v11 }
 0x328   :  { %8611 = vmatpush3.xpose.msra.mxu0 %v11555_v37  ;;  %8663 = vmatpush3.xpose.msra.mxu1 %v5705_v7  ;;  %v1650_v7 = vadd.f32 %v13567_v48, %v13566_v30  ;;  %v13570_v48 = vld [vmem:[#allocation34_spill] sm:$0xff] }
 0x329   :  { %8612 = vmatprep.subr.mxu0 %v11579_v41  ;;  %8664 = vmatprep.subr.mxu1 %v5712_v56  ;;  %v5315_v30 = vsel %vm3734_vm2, %v13570_v48, 0  ;;  %v5732_v48 = vsub.f32 %v11619_v24, %v11652_v25  ;;  %v5493_v25 = vsub.f32 %v11635_v11, %v13578_v6  ;;  %v5484_v6 = vand.u32 4294901760, %v5483_v4 }
 0x32a   :  { %v1908_v10 = vadd.f32 %v13572_v43, %v1650_v7  ;;  %v11685_v7 = vand.u32 4294901760, %v5315_v30  ;;  %v13577_v43 = vld [vmem:[#allocation31_spill] sm:$0xff]  ;;  %v5330_v4 = vsel %vm3734_vm2, %v1920_v32, 0 }
 0x32b   :  { %v5321_v47 = vsel %vm3734_vm2, %v13577_v43, 0  ;;  %v5739_v43 = vsub.f32 %v11647_v21, %v11677_v20  ;;  %v13586_v20 = vld [vmem:[#allocation53_spill] sm:$0xff] }
 0x32c   :  { %8613 = vmatpush3.xpose.msra.mxu0 %v11579_v41  ;;  %8665 = vmatpush3.xpose.msra.mxu1 %v5712_v56  ;;  %v11694_v56 = vand.u32 4294901760, %v5318_v36  ;;  %v5324_v2 = vsel %vm3734_vm2, %v1908_v10, 0  ;;  %v5733_v41 = vand.u32 4294901760, %v5732_v48  ;;  %v11709_v24 = vsub.f32 %v5315_v30, %v11685_v7  ;;  %v13583_v30 = vld [vmem:[#allocation43_spill] sm:$0xff] }
 0x32d   :  { %8614 = vmatprep.subr.mxu0 %v11594_v22  ;;  %8666 = vmatprep.subr.mxu1 %v5719_v16  ;;  %v11711_v10 = vand.u32 4294901760, %v5321_v47  ;;  %v11724_v37 = vand.u32 4294901760, %v5324_v2  ;;  %v5740_v11 = vand.u32 4294901760, %v5739_v43 }
 0x32e   :  { %v11715_v23 = vsub.f32 %v5318_v36, %v11694_v56 }
 0x32f   :  { %13584 = vst [vmem:[#allocation66_spill] sm:$0xff] %v11724_v37  ;;  %v11733_v61 = vsub.f32 %v5321_v47, %v11711_v10  ;;  %v11746_v47 = vsub.f32 %v5324_v2, %v11724_v37 }
 0x330   :  { %8615 = vmatpush3.xpose.msra.mxu0 %v11594_v22  ;;  %8667 = vmatpush3.xpose.msra.mxu1 %v5719_v16  ;;  %v1674_v22 = vadd.f32 %v13581_v28, %v13580_v39  ;;  %v13582_v28 = vand.u32 4294901760, %v11659_v31  ;;  %v5327_v39 = vsel %vm3734_vm2, %v13583_v30, 0  ;;  %v5494_v16 = vand.u32 4294901760, %v5493_v25 }
 0x331   :  { %8616 = vmatprep.subr.mxu0 %v11621_v34  ;;  %8668 = vmatprep.subr.mxu1 %v5726_v17  ;;  %v13587_v30 = vand.u32 4294901760, %v11683_v59 }
 0x332   :  { %v5503_v48 = vsub.f32 %v11659_v31, %v13582_v28  ;;  %v13003_v28 = vand.u32 4294901760, %v11709_v24  ;;  %v11738_v31 = vand.u32 4294901760, %v5327_v39 }
 0x333   :  { %v5523_v25 = vsub.f32 %v11683_v59, %v13587_v30  ;;  %v13006_v30 = vand.u32 4294901760, %v11733_v61 }
 0x334   :  { %8617 = vmatpush3.xpose.msra.mxu0 %v11621_v34  ;;  %8669 = vmatpush3.xpose.msra.mxu1 %v5726_v17  ;;  %v13585_v17 = vand.u32 4294901760, %v11667_v55  ;;  %v1932_v34 = vadd.f32 %v13586_v20, %v1674_v22  ;;  %13588 = vst [vmem:[#allocation95_spill] sm:$0xff] %v11738_v31  ;;  %v5504_v32 = vand.u32 4294901760, %v5503_v48  ;;  %v13589_v20 = vand.u32 4294901760, %v11690_v15 }
 0x335   :  { %8670 = vmatprep.subr.mxu1 %v5733_v41  ;;  %8698 = vmatprep.subr.mxu0 %v11332_v58  ;;  %v5543_v2 = vsub.f32 %v11709_v24, %v13003_v28 }
 0x336   :  { %v5513_v36 = vsub.f32 %v11667_v55, %v13585_v17  ;;  %v5533_v22 = vsub.f32 %v11690_v15, %v13589_v20  ;;  %v11752_v17 = vpop.f32.mrf.mxu0  ;;  %v5336_v48 = vsel %vm3734_vm2, %v1932_v34, 0  ;;  %v5524_v20 = vand.u32 4294901760, %v5523_v25  ;;  %v13594_v25 = vld [vmem:[#allocation56_spill] sm:$0xff] }
 0x337   :  { %8619 = vmatmul.mubr.f32.vlgmr.msra.gmra.mxu0 %v5484_v6  ;;  %v11750_v6 = vand.u32 4294901760, %v5330_v4  ;;  %v11775_v28 = vand.u32 4294901760, %v5336_v48 }
 0x338   :  { %8621 = vmatprep.mubr.f32.mxu0 %v5494_v16  ;;  %8671 = vmatpush3.xpose.msra.mxu1 %v5733_v41  ;;  %v13590_v41 = vld [vmem:[#allocation44_spill] sm:$0xff]  ;;  %v5534_v34 = vand.u32 4294901760, %v5533_v22  ;;  %v5544_v22 = vand.u32 4294901760, %v5543_v2 }
 0x339   :  { %8699 = vmatpush3.xpose.msra.mxu0 %v11332_v58  ;;  %8672 = vmatprep.subr.mxu1 %v5740_v11  ;;  %v5333_v16 = vsel %vm3734_vm2, %v13590_v41, 0  ;;  %13591 = vst [vmem:[#allocation24_spill] sm:$0xff] %v11750_v6  ;;  %v5514_v58 = vand.u32 4294901760, %v5513_v36  ;;  %v11761_v41 = vsub.f32 %v5327_v39, %v11738_v31  ;;  %v13593_v36 = vand.u32 4294901760, %v11715_v23  ;;  %13595 = vst [vmem:[#allocation85_spill] sm:$0xff] %v11775_v28  ;;  %v11777_v39 = vpop.f32.mrf.mxu0 }
 0x33a   :  { %8700 = vmatprep.subr.mxu0 %v11353_v18  ;;  %v11763_v43 = vand.u32 4294901760, %v5333_v16 }
 0x33b   :  { %8622 = vmatmul.mubr.f32.gmra.mxu0 %v5504_v32  ;;  %v5553_v32 = vsub.f32 %v11715_v23, %v13593_v36 }
 0x33c   :  { %8624 = vmatprep.mubr.f32.mxu0 %v5514_v58  ;;  %8673 = vmatpush3.xpose.msra.mxu1 %v5740_v11  ;;  %13592 = vst [vmem:[#allocation61_spill] sm:$0xff] %v11763_v43  ;;  %v11771_v11 = vsub.f32 %v5330_v4, %v11750_v6  ;;  %v5339_v58 = vsel %vm3734_vm2, %v13594_v25, 0  ;;  %v11785_v36 = vsub.f32 %v5333_v16, %v11763_v43  ;;  %v11799_v2 = vpop.f32.mrf.mxu1 }
 0x33d   :  { %8701 = vmatpush3.xpose.msra.mxu0 %v11353_v18  ;;  %8754 = vmatprep.subr.mxu1 %v11322_v57  ;;  %v11787_v25 = vand.u32 4294901760, %v5339_v58  ;;  %v11797_v18 = vpop.f32.mrf.mxu0  ;;  %v5554_v16 = vand.u32 4294901760, %v5553_v32 }
 0x33e   :  { %8702 = vmatprep.subr.mxu0 %v11372_v27 }
 0x33f   :  { %8625 = vmatmul.mubr.f32.gmra.mxu0 %v5524_v20  ;;  %8675 = vmatmul.mubr.f32.vlgmr.msra.gmra.mxu1 %v11604_v52  ;;  %13596 = vst [vmem:[#allocation40_spill] sm:$0xff] %v11787_v25  ;;  %v5563_v20 = vsub.f32 %v11733_v61, %v13006_v30  ;;  %v11811_v30 = vsub.f32 %v5339_v58, %v11787_v25  ;;  %v13599_v58 = vand.u32 4294901760, %v11771_v11 }
 0x340   :  { %8627 = vmatprep.mubr.f32.mxu0 %v5534_v34  ;;  %8677 = vmatprep.mubr.f32.mxu1 %v11611_v46  ;;  %v11795_v34 = vsub.f32 %v5336_v48, %v11775_v28 }
 0x341   :  { %8703 = vmatpush3.xpose.msra.mxu0 %v11372_v27  ;;  %8755 = vmatpush3.xpose.msra.mxu1 %v11322_v57  ;;  %v13597_v27 = vand.u32 4294901760, %v11746_v47  ;;  %v5564_v32 = vand.u32 4294901760, %v5563_v20  ;;  %v13013_v20 = vand.u32 4294901760, %v11811_v30 }
 0x342   :  { %8704 = vmatprep.subr.mxu0 %v11394_v35  ;;  %8756 = vmatprep.subr.mxu1 %v11336_v14 }
 0x343   :  { %v5573_v4 = vsub.f32 %v11746_v47, %v13597_v27  ;;  %8628 = vmatmul.mubr.f32.gmra.mxu0 %v5544_v22  ;;  %8678 = vmatmul.mubr.f32.gmra.mxu1 %v11632_v3  ;;  %v13598_v27 = vand.u32 4294901760, %v11761_v41  ;;  %v11818_v22 = vpop.f32.mrf.mxu0  ;;  %v11820_v3 = vpop.f32.mrf.mxu1 }
 0x344   :  { %8630 = vmatprep.mubr.f32.mxu0 %v5554_v16  ;;  %8680 = vmatprep.mubr.f32.mxu1 %v11640_v0 }
 0x345   :  { %8705 = vmatpush3.xpose.msra.mxu0 %v11394_v35  ;;  %8757 = vmatpush3.xpose.msra.mxu1 %v11336_v14  ;;  %v5583_v46 = vsub.f32 %v11761_v41, %v13598_v27  ;;  %v5574_v16 = vand.u32 4294901760, %v5573_v4  ;;  %v5593_v35 = vsub.f32 %v11771_v11, %v13599_v58  ;;  %v13600_v4 = vand.u32 4294901760, %v11785_v36  ;;  %v11836_v58 = vpop.f32.mrf.mxu0  ;;  %v11838_v48 = vpop.f32.mrf.mxu1 }
 0x346   :  { %8706 = vmatprep.subr.mxu0 %v11414_v40  ;;  %8758 = vmatprep.subr.mxu1 %v11350_v63 }
 0x347   :  { %8631 = vmatmul.mubr.f32.gmra.mxu0 %v5564_v32  ;;  %8681 = vmatmul.mubr.f32.gmra.mxu1 %v11655_v5  ;;  %v5584_v27 = vand.u32 4294901760, %v5583_v46  ;;  %v5603_v0 = vsub.f32 %v11785_v36, %v13600_v4  ;;  %v5594_v32 = vand.u32 4294901760, %v5593_v35  ;;  %v5623_v4 = vsub.f32 %v11811_v30, %v13013_v20  ;;  %v11852_v35 = vpop.f32.mrf.mxu0 }
 0x348   :  { %8633 = vmatprep.mubr.f32.mxu0 %v5574_v16  ;;  %8683 = vmatprep.mubr.f32.mxu1 %v11663_v38  ;;  %v13601_v16 = vand.u32 4294901760, %v11795_v34  ;;  %v11854_v38 = vpop.f32.mrf.mxu1 }
 0x349   :  { %8707 = vmatpush3.xpose.msra.mxu0 %v11414_v40  ;;  %8759 = vmatpush3.xpose.msra.mxu1 %v11350_v63  ;;  %v5604_v46 = vand.u32 4294901760, %v5603_v0  ;;  %v11862_v0 = vpop.f32.mrf.mxu0 }
 0x34a   :  { %8708 = vmatprep.subr.mxu0 %v11441_v44  ;;  %8760 = vmatprep.subr.mxu1 %v11374_v42  ;;  %v5613_v40 = vsub.f32 %v11795_v34, %v13601_v16 }
 0x34b   :  { %8634 = vmatmul.mubr.f32.gmra.mxu0 %v5584_v27  ;;  %8684 = vmatmul.mubr.f32.gmra.mxu1 %v11685_v7 }
 0x34c   :  { %8636 = vmatprep.mubr.f32.mxu0 %v5594_v32  ;;  %8686 = vmatprep.mubr.f32.mxu1 %v11694_v56  ;;  %v5614_v27 = vand.u32 4294901760, %v5613_v40  ;;  %v11864_v32 = vpop.f32.mrf.mxu1 }
 0x34d   :  { %8709 = vmatpush3.xpose.msra.mxu0 %v11441_v44  ;;  %8761 = vmatpush3.xpose.msra.mxu1 %v11374_v42  ;;  %v5624_v44 = vand.u32 4294901760, %v5623_v4 }
 0x34e   :  { %8710 = vmatprep.subr.mxu0 %v11463_v1  ;;  %8762 = vmatprep.subr.mxu1 %v11390_v19  ;;  %v11875_v16 = vpop.f32.mrf.mxu1 }
 0x34f   :  { %8637 = vmatmul.mubr.f32.gmra.mxu0 %v5604_v46  ;;  %8687 = vmatmul.mubr.f32.gmra.mxu1 %v11711_v10  ;;  %v13603_v46 = vand.u32 4294901760, %v11455_v45 }
 0x350   :  { %8639 = vmatprep.mubr.f32.mxu0 %v5614_v27  ;;  %8689 = vmatprep.mubr.f32.mxu1 %v11724_v37 }
 0x351   :  { %8711 = vmatpush3.xpose.msra.mxu0 %v11463_v1  ;;  %8763 = vmatpush3.xpose.msra.mxu1 %v11390_v19  ;;  %v11873_v1 = vpop.f32.mrf.mxu0 }
 0x352   :  { %8712 = vmatprep.subr.mxu0 %v11487_v33  ;;  %8764 = vmatprep.subr.mxu1 %v11418_v13 }
 0x353   :  { %8640 = vmatmul.mubr.f32.gmra.mxu0 %v5624_v44  ;;  %8690 = vmatmul.mubr.f32.gmra.mxu1 %v11738_v31  ;;  %v11883_v40 = vpop.f32.mrf.mxu0  ;;  %v13625_v31 = vld [vmem:[#allocation76_spill] sm:$0xff] }
 0x354   :  { %8692 = vmatprep.mubr.f32.mxu1 %v11750_v6  ;;  %8730 = vmatprep.mubr.f32.mxu0 %v11455_v45  ;;  %13602 = vst [vmem:[#allocation83_spill] sm:$0xff] %v11883_v40  ;;  %v13618_v6 = vld [vmem:[#allocation89_spill] sm:$0xff] }
 0x355   :  { %8713 = vmatpush3.xpose.msra.mxu0 %v11487_v33  ;;  %8765 = vmatpush3.xpose.msra.mxu1 %v11418_v13  ;;  %v11885_v33 = vpop.f32.mrf.mxu1 }
 0x356   :  { %8714 = vmatprep.subr.mxu0 %v11505_v50  ;;  %8766 = vmatprep.subr.mxu1 %v11436_v26 }
 0x357   :  { %8693 = vmatmul.mubr.f32.gmra.mxu1 %v11763_v43  ;;  %v11896_v4 = vpop.f32.mrf.mxu1 }
 0x358   :  { %8695 = vmatprep.mubr.f32.mxu1 %v11775_v28 }
 0x359   :  { %8715 = vmatpush3.xpose.msra.mxu0 %v11505_v50  ;;  %8767 = vmatpush3.xpose.msra.mxu1 %v11436_v26  ;;  %v11894_v50 = vpop.f32.mrf.mxu0  ;;  %v11904_v45 = vpop.f32.mrf.mxu1 }
 0x35a   :  { %8716 = vmatprep.subr.mxu0 %v11526_v51  ;;  %8768 = vmatprep.subr.mxu1 %v11467_v62  ;;  %13605 = vst [vmem:[#allocation10_spill] sm:$0xff] %v11904_v45 }
 0x35b   :  { %8696 = vmatmul.mubr.f32.gmra.mxu1 %v11787_v25  ;;  %v11902_v27 = vpop.f32.mrf.mxu0  ;;  %v11912_v44 = vpop.f32.mrf.mxu1  ;;  %v13611_v25 = vld [vmem:[#allocation54_spill] sm:$0xff] }
 0x35c   :  { %8786 = vmatprep.mubr.f32.mxu1 %v13603_v46  ;;  %13604 = vst [vmem:[#allocation93_spill] sm:$0xff] %v11902_v27 }
 0x35d   :  { %8717 = vmatpush3.xpose.msra.mxu0 %v11526_v51  ;;  %8769 = vmatpush3.xpose.msra.mxu1 %v11467_v62  ;;  %v11910_v51 = vpop.f32.mrf.mxu0  ;;  %v11920_v46 = vpop.f32.mrf.mxu1 }
 0x35e   :  { %8718 = vmatprep.subr.mxu0 %v11540_v49  ;;  %8770 = vmatprep.subr.mxu1 %v11482_v12  ;;  %13606 = vst [vmem:[#allocation11_spill] sm:$0xff] %v11910_v51  ;;  %13608 = vst [vmem:[#allocation60_spill] sm:$0xff] %v11920_v46 }
 0x35f   :  { %v11928_v20 = vpop.f32.mrf.mxu1 }
 0x360   :  { %13610 = vst [vmem:[#allocation81_spill] sm:$0xff] %v11928_v20 }
 0x361   :  { %8719 = vmatpush3.xpose.msra.mxu0 %v11540_v49  ;;  %8771 = vmatpush3.xpose.msra.mxu1 %v11482_v12  ;;  %v11918_v49 = vpop.f32.mrf.mxu0 }
 0x362   :  { %8720 = vmatprep.subr.mxu0 %v11559_v29  ;;  %8772 = vmatprep.subr.mxu1 %v11509_v60  ;;  %13607 = vst [vmem:[#allocation80_spill] sm:$0xff] %v11918_v49  ;;  %v11936_v49 = vpop.f32.mrf.mxu1 }
 0x363   :  { %13614 = vst [vmem:[#allocation7_spill] sm:$0xff] %v11936_v49  ;;  %v13621_v49 = vld [vmem:[#allocation65_spill] sm:$0xff] }
 0x364   :  { %v13629_v45 = vand.u32 4294901760, %v13621_v49 }
 0x365   :  { %8721 = vmatpush3.xpose.msra.mxu0 %v11559_v29  ;;  %8773 = vmatpush3.xpose.msra.mxu1 %v11509_v60  ;;  %v11926_v29 = vpop.f32.mrf.mxu0 }
 0x366   :  { %8722 = vmatprep.subr.mxu0 %v11577_v8  ;;  %8774 = vmatprep.subr.mxu1 %v11521_v53  ;;  %13609 = vst [vmem:[#allocation20_spill] sm:$0xff] %v11926_v29  ;;  %v11944_v29 = vpop.f32.mrf.mxu1 }
 0x367   :  { %v11934_v28 = vpop.f32.mrf.mxu0  ;;  %13617 = vst [vmem:[#allocation8_spill] sm:$0xff] %v11944_v29 }
 0x368   :  { %13613 = vst [vmem:[#allocation90_spill] sm:$0xff] %v11934_v28  ;;  %v13620_v28 = vld [vmem:[#allocation57_spill] sm:$0xff]  ;;  %v11953_v27 = vpop.f32.mrf.mxu1 }
 0x369   :  { %8723 = vmatpush3.xpose.msra.mxu0 %v11577_v8  ;;  %8775 = vmatpush3.xpose.msra.mxu1 %v11521_v53  ;;  %v13612_v8 = vld [vmem:[#allocation77_spill] sm:$0xff]  ;;  %v11942_v43 = vpop.f32.mrf.mxu0  ;;  %13622 = vst [vmem:[#allocation26_spill] sm:$0xff] %v11953_v27  ;;  %v13627_v27 = vld [vmem:[#allocation48_spill] sm:$0xff]  ;;  %v13628_v37 = vand.u32 4294901760, %v13620_v28 }
 0x36a   :  { %8724 = vmatprep.subr.mxu0 %v11597_v9  ;;  %8776 = vmatprep.subr.mxu1 %v11543_v54  ;;  %13616 = vst [vmem:[#allocation79_spill] sm:$0xff] %v11942_v43  ;;  %v13624_v43 = vld [vmem:[#allocation41_spill] sm:$0xff]  ;;  %v11963_v20 = vpop.f32.mrf.mxu1 }
 0x36b   :  { %13626 = vst [vmem:[#allocation9_spill] sm:$0xff] %v11963_v20 }
 0x36d   :  { %8725 = vmatpush3.xpose.msra.mxu0 %v11597_v9  ;;  %8777 = vmatpush3.xpose.msra.mxu1 %v11543_v54  ;;  %v13615_v9 = vld [vmem:[#allocation84_spill] sm:$0xff] }
 0x36e   :  { %8726 = vmatprep.subr.mxu0 %v13611_v25  ;;  %8778 = vmatprep.subr.mxu1 %v13612_v8 }
 0x371   :  { %8727 = vmatpush3.xpose.msra.mxu0 %v13611_v25  ;;  %8779 = vmatpush3.xpose.msra.mxu1 %v13612_v8  ;;  %v13619_v25 = vld [vmem:[#allocation25_spill] sm:$0xff] }
 0x372   :  { %8728 = vmatprep.subr.mxu0 %v11647_v21  ;;  %8780 = vmatprep.subr.mxu1 %v13615_v9 }
 0x375   :  { %8729 = vmatpush3.xpose.msra.mxu0 %v11647_v21  ;;  %8781 = vmatpush3.xpose.msra.mxu1 %v13615_v9  ;;  %v11948_v46 = vpop.f32.mrf.mxu0  ;;  %v13623_v21 = vld [vmem:[#allocation87_spill] sm:$0xff] }
 0x376   :  { %8782 = vmatprep.subr.mxu1 %v13618_v6  ;;  %8810 = vmatprep.subr.mxu0 %v13619_v25 }
 0x377   :  { %v11958_v29 = vpop.f32.mrf.mxu0 }
 0x378   :  { %8731 = vmatmul.mubr.f32.vlgmr.msra.gmra.mxu0 %v13620_v28  ;;  %v13632_v28 = vand.u32 4294901760, %v11667_v55 }
 0x379   :  { %8733 = vmatprep.mubr.f32.mxu0 %v13621_v49  ;;  %8783 = vmatpush3.xpose.msra.mxu1 %v13618_v6 }
 0x37a   :  { %8811 = vmatpush3.xpose.msra.mxu0 %v13619_v25  ;;  %8784 = vmatprep.subr.mxu1 %v13623_v21  ;;  %v11968_v25 = vpop.f32.mrf.mxu0 }
 0x37b   :  { %8812 = vmatprep.subr.mxu0 %v13624_v43 }
 0x37c   :  { %8734 = vmatmul.mubr.f32.gmra.mxu0 %v13625_v31  ;;  %v11982_v20 = vpop.f32.mrf.mxu0 }
 0x37d   :  { %8736 = vmatprep.mubr.f32.mxu0 %v11667_v55  ;;  %8785 = vmatpush3.xpose.msra.mxu1 %v13623_v21  ;;  %v11970_v51 = vpop.f32.mrf.mxu1  ;;  %v13635_v55 = vand.u32 4294901760, %v11690_v15 }
 0x37e   :  { %8813 = vmatpush3.xpose.msra.mxu0 %v13624_v43  ;;  %8866 = vmatprep.subr.mxu1 %v11322_v57  ;;  %v13630_v43 = vld [vmem:[#allocation42_spill] sm:$0xff] }
 0x37f   :  { %8814 = vmatprep.subr.mxu0 %v13627_v27  ;;  %v11984_v40 = vpop.f32.mrf.mxu1 }
 0x380   :  { %8737 = vmatmul.mubr.f32.gmra.mxu0 %v11683_v59  ;;  %8787 = vmatmul.mubr.f32.vlgmr.msra.gmra.mxu1 %v13628_v37  ;;  %v13631_v37 = vand.u32 4294901760, %v13625_v31  ;;  %v13634_v31 = vand.u32 4294901760, %v11683_v59  ;;  %v13637_v59 = vand.u32 4294901760, %v11709_v24 }
 0x381   :  { %8739 = vmatprep.mubr.f32.mxu0 %v11690_v15  ;;  %8789 = vmatprep.mubr.f32.mxu1 %v13629_v45  ;;  %v11998_v45 = vpop.f32.mrf.mxu1  ;;  %v13638_v15 = vand.u32 4294901760, %v11715_v23 }
 0x382   :  { %8815 = vmatpush3.xpose.msra.mxu0 %v13627_v27  ;;  %8867 = vmatpush3.xpose.msra.mxu1 %v11322_v57  ;;  %v13633_v57 = vld [vmem:[#allocation50_spill] sm:$0xff]  ;;  %v11996_v27 = vpop.f32.mrf.mxu0 }
 0x383   :  { %8816 = vmatprep.subr.mxu0 %v13630_v43  ;;  %8868 = vmatprep.subr.mxu1 %v11336_v14 }
 0x384   :  { %8740 = vmatmul.mubr.f32.gmra.mxu0 %v11709_v24  ;;  %8790 = vmatmul.mubr.f32.gmra.mxu1 %v13631_v37  ;;  %v12010_v49 = vpop.f32.mrf.mxu0  ;;  %v13640_v24 = vand.u32 4294901760, %v11733_v61 }
 0x385   :  { %8742 = vmatprep.mubr.f32.mxu0 %v11715_v23  ;;  %8792 = vmatprep.mubr.f32.mxu1 %v13632_v28  ;;  %v13641_v23 = vand.u32 4294901760, %v11746_v47 }
 0x386   :  { %8817 = vmatpush3.xpose.msra.mxu0 %v13630_v43  ;;  %8869 = vmatpush3.xpose.msra.mxu1 %v11336_v14  ;;  %v13636_v14 = vld [vmem:[#allocation63_spill] sm:$0xff]  ;;  %v12012_v43 = vpop.f32.mrf.mxu1  ;;  %v12024_v37 = vpop.f32.mrf.mxu0 }
 0x387   :  { %8818 = vmatprep.subr.mxu0 %v13633_v57  ;;  %8870 = vmatprep.subr.mxu1 %v11350_v63 }
 0x388   :  { %8743 = vmatmul.mubr.f32.gmra.mxu0 %v11733_v61  ;;  %8793 = vmatmul.mubr.f32.gmra.mxu1 %v13634_v31  ;;  %v12026_v28 = vpop.f32.mrf.mxu1  ;;  %v13643_v61 = vand.u32 4294901760, %v11761_v41 }
 0x389   :  { %8745 = vmatprep.mubr.f32.mxu0 %v11746_v47  ;;  %8795 = vmatprep.mubr.f32.mxu1 %v13635_v55  ;;  %v13644_v47 = vand.u32 4294901760, %v11771_v11  ;;  %v13645_v55 = vld [vmem:[#allocation55_spill] sm:$0xff] }
 0x38a   :  { %8819 = vmatpush3.xpose.msra.mxu0 %v13633_v57  ;;  %8871 = vmatpush3.xpose.msra.mxu1 %v11350_v63  ;;  %v13639_v63 = vld [vmem:[#allocation59_spill] sm:$0xff]  ;;  %v12038_v57 = vpop.f32.mrf.mxu0  ;;  %v12040_v31 = vpop.f32.mrf.mxu1 }
 0x38b   :  { %8820 = vmatprep.subr.mxu0 %v13636_v14  ;;  %8872 = vmatprep.subr.mxu1 %v11374_v42 }
 0x38c   :  { %8746 = vmatmul.mubr.f32.gmra.mxu0 %v11761_v41  ;;  %8796 = vmatmul.mubr.f32.gmra.mxu1 %v13637_v59  ;;  %v12054_v59 = vpop.f32.mrf.mxu1  ;;  %v13647_v41 = vand.u32 4294901760, %v11785_v36 }
 0x38d   :  { %8748 = vmatprep.mubr.f32.mxu0 %v11771_v11  ;;  %8798 = vmatprep.mubr.f32.mxu1 %v13638_v15  ;;  %v13648_v11 = vand.u32 4294901760, %v11795_v34  ;;  %v13649_v15 = vld [vmem:[#allocation82_spill] sm:$0xff] }
 0x38e   :  { %8821 = vmatpush3.xpose.msra.mxu0 %v13636_v14  ;;  %8873 = vmatpush3.xpose.msra.mxu1 %v11374_v42  ;;  %v13642_v42 = vld [vmem:[#allocation74_spill] sm:$0xff]  ;;  %v12052_v14 = vpop.f32.mrf.mxu0 }
 0x38f   :  { %8822 = vmatprep.subr.mxu0 %v13639_v63  ;;  %8874 = vmatprep.subr.mxu1 %v11390_v19 }
 0x390   :  { %8749 = vmatmul.mubr.f32.gmra.mxu0 %v11785_v36  ;;  %8799 = vmatmul.mubr.f32.gmra.mxu1 %v13640_v24  ;;  %v13650_v24 = vand.u32 4294901760, %v11811_v30  ;;  %v13651_v36 = vld [vmem:[#allocation86_spill] sm:$0xff] }
 0x391   :  { %8751 = vmatprep.mubr.f32.mxu0 %v11795_v34  ;;  %8801 = vmatprep.mubr.f32.mxu1 %v13641_v23 }
 0x392   :  { %8823 = vmatpush3.xpose.msra.mxu0 %v13639_v63  ;;  %8875 = vmatpush3.xpose.msra.mxu1 %v11390_v19  ;;  %v13646_v19 = vld [vmem:[#allocation64_spill] sm:$0xff]  ;;  %v12066_v63 = vpop.f32.mrf.mxu1 }
 0x393   :  { %8824 = vmatprep.subr.mxu0 %v13642_v42  ;;  %8876 = vmatprep.subr.mxu1 %v11418_v13 }
 0x394   :  { %8752 = vmatmul.mubr.f32.gmra.mxu0 %v11811_v30  ;;  %8802 = vmatmul.mubr.f32.gmra.mxu1 %v13643_v61  ;;  %v12077_v34 = vpop.f32.mrf.mxu1  ;;  %v13652_v30 = vld [vmem:[#allocation91_spill] sm:$0xff] }
 0x395   :  { %8804 = vmatprep.mubr.f32.mxu1 %v13644_v47  ;;  %8842 = vmatprep.mubr.f32.mxu0 %v13645_v55 }
 0x396   :  { %8825 = vmatpush3.xpose.msra.mxu0 %v13642_v42  ;;  %8877 = vmatpush3.xpose.msra.mxu1 %v11418_v13  ;;  %v12064_v13 = vpop.f32.mrf.mxu0  ;;  %v12085_v42 = vpop.f32.mrf.mxu1 }
 0x397   :  { %8826 = vmatprep.subr.mxu0 %v13646_v19  ;;  %8878 = vmatprep.subr.mxu1 %v11436_v26 }
 0x398   :  { %8805 = vmatmul.mubr.f32.gmra.mxu1 %v13647_v41  ;;  %v12093_v47 = vpop.f32.mrf.mxu1 }
 0x399   :  { %8807 = vmatprep.mubr.f32.mxu1 %v13648_v11 }
 0x39a   :  { %8827 = vmatpush3.xpose.msra.mxu0 %v13646_v19  ;;  %8879 = vmatpush3.xpose.msra.mxu1 %v11436_v26  ;;  %v12075_v26 = vpop.f32.mrf.mxu0  ;;  %v12101_v19 = vpop.f32.mrf.mxu1 }
 0x39b   :  { %8828 = vmatprep.subr.mxu0 %v13649_v15  ;;  %8880 = vmatprep.subr.mxu1 %v11467_v62 }
 0x39c   :  { %8808 = vmatmul.mubr.f32.gmra.mxu1 %v13650_v24  ;;  %v12083_v23 = vpop.f32.mrf.mxu0  ;;  %v12109_v11 = vpop.f32.mrf.mxu1 }
 0x39d   :  { %8898 = vmatprep.mubr.f32.mxu1 %v13645_v55 }
 0x39e   :  { %8829 = vmatpush3.xpose.msra.mxu0 %v13649_v15  ;;  %8881 = vmatpush3.xpose.msra.mxu1 %v11467_v62  ;;  %v13653_v62 = vld [vmem:[#allocation28_spill] sm:$0xff]  ;;  %v12091_v61 = vpop.f32.mrf.mxu0  ;;  %v12117_v24 = vpop.f32.mrf.mxu1 }
 0x39f   :  { %8830 = vmatprep.subr.mxu0 %v13651_v36  ;;  %8882 = vmatprep.subr.mxu1 %v11482_v12 }
 0x3a0   :  { %v12099_v55 = vpop.f32.mrf.mxu0 }
 0x3a2   :  { %8831 = vmatpush3.xpose.msra.mxu0 %v13651_v36  ;;  %8883 = vmatpush3.xpose.msra.mxu1 %v11482_v12  ;;  %v13654_v12 = vld [vmem:[#allocation32_spill] sm:$0xff]  ;;  %v12107_v41 = vpop.f32.mrf.mxu0  ;;  %v3731_v36 = vlaneseq }
 0x3a3   :  { %8832 = vmatprep.subr.mxu0 %v13652_v30  ;;  %8884 = vmatprep.subr.mxu1 %v11509_v60  ;;  %13656 = vst [vmem:[#allocation72_spill] sm:$0xff] %v12107_v41 }
 0x3a4   :  { %v12115_v15 = vpop.f32.mrf.mxu0  ;;  %v12132_v41 = vand.u32 127, %v3731_v36 }
 0x3a5   :  { %13658 = vst [vmem:[#allocation35_spill] sm:$0xff] %v12115_v15  ;;  %v13661_v15 = vld [vmem:[#allocation62_spill] sm:$0xff] }
 0x3a6   :  { %8833 = vmatpush3.xpose.msra.mxu0 %v13652_v30  ;;  %8885 = vmatpush3.xpose.msra.mxu1 %v11509_v60  ;;  %v13655_v60 = vld [vmem:[#allocation22_spill] sm:$0xff]  ;;  %v4226_v30 = vadd.f32 %v11799_v2, %v11752_v17  ;;  %v4238_v17 = vadd.f32 %v11838_v48, %v11797_v18  ;;  %v13662_v18 = vld [vmem:[#allocation21_spill] sm:$0xff]  ;;  %vm3733_vm3 = vcmp.lt.s32.totalorder %v12132_v41, 8 }
 0x3a7   :  { %8834 = vmatprep.subr.mxu0 %v13653_v62  ;;  %8886 = vmatprep.subr.mxu1 %v11521_v53 }
 0x3aa   :  { %8835 = vmatpush3.xpose.msra.mxu0 %v13653_v62  ;;  %8887 = vmatpush3.xpose.msra.mxu1 %v11521_v53  ;;  %v13657_v53 = vld [vmem:[#allocation110_spill] sm:$0xff] }
 0x3ab   :  { %8836 = vmatprep.subr.mxu0 %v13654_v12  ;;  %8888 = vmatprep.subr.mxu1 %v11543_v54 }
 0x3ae   :  { %8837 = vmatpush3.xpose.msra.mxu0 %v13654_v12  ;;  %8889 = vmatpush3.xpose.msra.mxu1 %v11543_v54  ;;  %v4421_v12 = vadd.f32 %v11948_v46, %v4226_v30 }
 0x3af   :  { %8838 = vmatprep.subr.mxu0 %v13655_v60  ;;  %8890 = vmatprep.subr.mxu1 %v13612_v8 }
 0x3b0   :  { %v4616_v2 = vadd.f32 %v11970_v51, %v4421_v12 }
 0x3b2   :  { %8839 = vmatpush3.xpose.msra.mxu0 %v13655_v60  ;;  %8891 = vmatpush3.xpose.msra.mxu1 %v13612_v8  ;;  %v12124_v8 = vpop.f32.mrf.mxu1  ;;  %v4220_v60 = vadd.f32 %v11820_v3, %v11777_v39  ;;  %v4435_v3 = vadd.f32 %v11968_v25, %v4238_v17 }
 0x3b3   :  { %8840 = vmatprep.subr.mxu0 %v13657_v53  ;;  %8892 = vmatprep.subr.mxu1 %v13615_v9  ;;  %13659 = vst [vmem:[#allocation108_spill] sm:$0xff] %v12124_v8 }
 0x3b4   :  { %v4414_v46 = vadd.f32 %v11958_v29, %v4220_v60  ;;  %v12139_v30 = vpop.f32.mrf.mxu1  ;;  %v4632_v29 = vadd.f32 %v11998_v45, %v4435_v3  ;;  %v13663_v45 = vld [vmem:[#allocation109_spill] sm:$0xff] }
 0x3b6   :  { %8841 = vmatpush3.xpose.msra.mxu0 %v13657_v53  ;;  %8893 = vmatpush3.xpose.msra.mxu1 %v13615_v9  ;;  %v8508_v54 = vpop.f32.mrf.mxu0  ;;  %v13660_v53 = vld [vmem:[#allocation47_spill] sm:$0xff]  ;;  %v4608_v36 = vadd.f32 %v11984_v40, %v4414_v46 }
 0x3b7   :  { %8894 = vmatprep.subr.mxu1 %v13618_v6  ;;  %v4853_v39 = vadd.f32 %v8508_v54, %v4616_v2 }
 0x3b8   :  { %v4846_v62 = vpop.f32.mrf.mxu0 }
 0x3b9   :  { %8843 = vmatmul.mubr.f32.vlgmr.msra.gmra.mxu0 %v11604_v52  ;;  %v4847_v54 = vadd.f32 %v4846_v62, %v4608_v36  ;;  %v4268_v36 = vadd.f32 %v11912_v44, %v11894_v50 }
 0x3ba   :  { %8845 = vmatprep.mubr.f32.mxu0 %v13660_v53  ;;  %8895 = vmatpush3.xpose.msra.mxu1 %v13618_v6  ;;  %v8511_v9 = vpop.f32.mrf.mxu0  ;;  %v4232_v6 = vadd.f32 %v11854_v38, %v11818_v22  ;;  %v4244_v38 = vadd.f32 %v11875_v16, %v11852_v35 }
 0x3bb   :  { %8896 = vmatprep.subr.mxu1 %v13623_v21  ;;  %v4865_v22 = vadd.f32 %v8511_v9, %v4632_v29  ;;  %v13667_v29 = vld [vmem:[#allocation10_spill] sm:$0xff]  ;;  %v4470_v44 = vadd.f32 %v12064_v13, %v4268_v36  ;;  %v13673_v13 = vld [vmem:[#allocation95_spill] sm:$0xff]  ;;  %v13684_v36 = vld [vmem:[#allocation85_spill] sm:$0xff] }
 0x3bc   :  { %v4858_v8 = vpop.f32.mrf.mxu0  ;;  %v4428_v25 = vadd.f32 %v11982_v20, %v4232_v6  ;;  %v4442_v9 = vadd.f32 %v12010_v49, %v4244_v38 }
 0x3bd   :  { %8846 = vmatmul.mubr.f32.gmra.mxu0 %v13661_v15 }
 0x3be   :  { %8848 = vmatprep.mubr.f32.mxu0 %v13662_v18  ;;  %8897 = vmatpush3.xpose.msra.mxu1 %v13623_v21  ;;  %v8514_v48 = vpop.f32.mrf.mxu0  ;;  %v8564_v51 = vpop.f32.mrf.mxu1  ;;  %v4250_v21 = vadd.f32 %v11864_v32, %v11836_v58  ;;  %v4624_v20 = vadd.f32 %v12012_v43, %v4428_v25  ;;  %v4256_v58 = vadd.f32 %v11896_v4, %v11873_v1 }
 0x3bf   :  { %v5030_v12 = vadd.f32 %v8564_v51, %v4853_v39  ;;  %v4640_v32 = vadd.f32 %v12040_v31, %v4442_v9  ;;  %v4262_v43 = vadd.f32 %v11885_v33, %v11862_v0  ;;  %v13666_v51 = vld [vmem:[#allocation83_spill] sm:$0xff]  ;;  %v13674_v9 = vld [vmem:[#allocation93_spill] sm:$0xff] }
 0x3c0   :  { %v4870_v60 = vpop.f32.mrf.mxu0  ;;  %v5023_v17 = vpop.f32.mrf.mxu1  ;;  %v4859_v46 = vadd.f32 %v4858_v8, %v4624_v20  ;;  %v13672_v20 = vld [vmem:[#allocation81_spill] sm:$0xff] }
 0x3c1   :  { %8849 = vmatmul.mubr.f32.gmra.mxu0 %v11655_v5  ;;  %8899 = vmatmul.mubr.f32.vlgmr.msra.gmra.mxu1 %v11604_v52  ;;  %v12157_v40 = vsel %vm3733_vm3, %v5030_v12, -inf  ;;  %v5024_v62 = vadd.f32 %v5023_v17, %v4847_v54  ;;  %v4449_v52 = vadd.f32 %v11996_v27, %v4250_v21  ;;  %v4463_v0 = vadd.f32 %v12024_v37, %v4262_v43  ;;  %v13668_v37 = vld [vmem:[#allocation66_spill] sm:$0xff]  ;;  %v13671_v21 = vld [vmem:[#allocation11_spill] sm:$0xff] }
 0x3c2   :  { %8851 = vmatprep.mubr.f32.mxu0 %v13663_v45  ;;  %8901 = vmatprep.mubr.f32.mxu1 %v13660_v53  ;;  %v8567_v35 = vpop.f32.mrf.mxu1  ;;  %v8517_v16 = vpop.f32.mrf.mxu0  ;;  %v4871_v53 = vadd.f32 %v4870_v60, %v4640_v32  ;;  %v4274_v12 = vadd.f32 %v13667_v29, %v13666_v51 }
 0x3c3   :  { %v5042_v2 = vadd.f32 %v8567_v35, %v4865_v22  ;;  %5135 = vmax.xlane.f32.xlu0 %v12157_v40  ;;  %v4648_v27 = vadd.f32 %v12026_v28, %v4449_v52  ;;  %v12183_v8 = vsel %vm3733_vm3, %v5024_v62, -inf  ;;  %v4664_v25 = vadd.f32 %v12054_v59, %v4463_v0 }
 0x3c4   :  { %v4882_v3 = vpop.f32.mrf.mxu0  ;;  %v5035_v39 = vpop.f32.mrf.mxu1  ;;  %13665 = vst [vmem:[#allocation78_spill] sm:$0xff] %v12183_v8  ;;  %v4477_v59 = vadd.f32 %v12052_v14, %v4274_v12  ;;  %v4672_v62 = vadd.f32 %v12085_v42, %v4470_v44 }
 0x3c5   :  { %8852 = vmatmul.mubr.f32.gmra.mxu0 %v11685_v7  ;;  %8902 = vmatmul.mubr.f32.gmra.mxu1 %v13661_v15  ;;  %v12174_v49 = vsel %vm3733_vm3, %v5042_v2, -inf  ;;  %v5036_v1 = vadd.f32 %v5035_v39, %v4859_v46  ;;  %v4456_v15 = vadd.f32 %v12038_v57, %v4256_v58  ;;  %v4877_v33 = vadd.f32 %v8514_v48, %v4648_v27  ;;  %v13675_v2 = vld [vmem:[#allocation60_spill] sm:$0xff] }
 0x3c6   :  { %13664 = vst [vmem:[#allocation5_spill] sm:$0xff] %v12174_v49  ;;  %8854 = vmatprep.mubr.f32.mxu0 %v11694_v56  ;;  %8904 = vmatprep.mubr.f32.mxu1 %v13662_v18  ;;  %v8570_v4 = vpop.f32.mrf.mxu1  ;;  %v8520_v31 = vpop.f32.mrf.mxu0  ;;  %v4889_v17 = vadd.f32 %v8517_v16, %v4664_v25  ;;  %v4286_v52 = vadd.f32 %v13675_v2, %v13674_v9  ;;  %v13676_v46 = vld [vmem:[#allocation24_spill] sm:$0xff] }
 0x3c7   :  { %5139 = vmax.xlane.f32.xlu1 %v12174_v49  ;;  %5133 = vmax.xlane.f32.xlu0 %v12183_v8  ;;  %v4656_v18 = vadd.f32 %v12066_v63, %v4456_v15  ;;  %v5054_v54 = vadd.f32 %v8570_v4, %v4877_v33  ;;  %v12201_v50 = vsel %vm3733_vm3, %v5036_v1, -inf  ;;  %v4680_v14 = vadd.f32 %v12077_v34, %v4477_v59  ;;  %v13679_v1 = vld [vmem:[#allocation20_spill] sm:$0xff]  ;;  %v13690_v59 = vld [vmem:[#allocation90_spill] sm:$0xff] }
 0x3c8   :  { %v4894_v28 = vpop.f32.mrf.mxu0  ;;  %v5047_v6 = vpop.f32.mrf.mxu1  ;;  %13669 = vst [vmem:[#allocation88_spill] sm:$0xff] %v12201_v50  ;;  %v4491_v34 = vadd.f32 %v12075_v26, %v4286_v52  ;;  %v13680_v4 = vld [vmem:[#allocation8_spill] sm:$0xff] }
 0x3c9   :  { %8855 = vmatmul.mubr.f32.gmra.mxu0 %v11711_v10  ;;  %8905 = vmatmul.mubr.f32.gmra.mxu1 %v11655_v5  ;;  %v5048_v57 = vadd.f32 %v5047_v6, %v4871_v53  ;;  %v4883_v5 = vadd.f32 %v4882_v3, %v4656_v18  ;;  %v12223_v42 = vsel %vm3733_vm3, %v5054_v54, -inf  ;;  %v4901_v43 = vadd.f32 %v8520_v31, %v4680_v14  ;;  %v13682_v33 = vld [vmem:[#allocation80_spill] sm:$0xff]  ;;  %v13687_v54 = vld [vmem:[#allocation79_spill] sm:$0xff] }
 0x3ca   :  { %8857 = vmatprep.mubr.f32.mxu0 %v13668_v37  ;;  %8907 = vmatprep.mubr.f32.mxu1 %v13663_v45  ;;  %v8523_v48 = vpop.f32.mrf.mxu0  ;;  %v8573_v60 = vpop.f32.mrf.mxu1  ;;  %v4280_v45 = vadd.f32 %v13672_v20, %v13671_v21  ;;  %13677 = vst [vmem:[#allocation71_spill] sm:$0xff] %v12223_v42  ;;  %v4292_v15 = vadd.f32 %v13680_v4, %v13679_v1  ;;  %v13693_v20 = vld [vmem:[#allocation35_spill] sm:$0xff] }
 0x3cb   :  { %5137 = vmax.xlane.f32.xlu1 %v12201_v50  ;;  %v12207_v63 = vsel %vm3733_vm3, %v5048_v57, -inf  ;;  %v5066_v16 = vadd.f32 %v8573_v60, %v4889_v17  ;;  %v4696_v26 = vadd.f32 %v12093_v47, %v4491_v34  ;;  %v13691_v17 = vld [vmem:[#allocation26_spill] sm:$0xff] }
 0x3cc   :  { %13670 = vst [vmem:[#allocation6_spill] sm:$0xff] %v12207_v63  ;;  %v4906_v38 = vpop.f32.mrf.mxu0  ;;  %v5059_v22 = vpop.f32.mrf.mxu1  ;;  %5141 = vmax.xlane.f32.xlu0 %v12207_v63  ;;  %v4484_v58 = vadd.f32 %v12083_v23, %v4280_v45  ;;  %v13681_v23 = vld [vmem:[#allocation61_spill] sm:$0xff] }
 0x3cd   :  { %8858 = vmatmul.mubr.f32.gmra.mxu0 %v13673_v13  ;;  %8908 = vmatmul.mubr.f32.gmra.mxu1 %v11685_v7  ;;  %v5060_v35 = vadd.f32 %v5059_v22, %v4883_v5  ;;  %v4895_v7 = vadd.f32 %v4894_v28, %v4672_v62  ;;  %v13683_v28 = vld [vmem:[#allocation7_spill] sm:$0xff]  ;;  %v12245_v57 = vsel %vm3733_vm3, %v5066_v16, -inf  ;;  %v4913_v29 = vadd.f32 %v8523_v48, %v4696_v26  ;;  %v13696_v16 = vld [vmem:[#allocation108_spill] sm:$0xff] }
 0x3ce   :  { %8860 = vmatprep.mubr.f32.mxu0 %v13676_v46  ;;  %8910 = vmatprep.mubr.f32.mxu1 %v11694_v56  ;;  %v8526_v3 = vpop.f32.mrf.mxu0  ;;  %v8576_v39 = vpop.f32.mrf.mxu1  ;;  %v4688_v53 = vadd.f32 %v12101_v19, %v4484_v58  ;;  %v4298_v6 = vadd.f32 %v13683_v28, %v13682_v33  ;;  %13685 = vst [vmem:[#allocation92_spill] sm:$0xff] %v12245_v57 }
 0x3cf   :  { %5143 = vmax.xlane.f32.xlu1 %v12223_v42  ;;  %v12229_v32 = vsel %vm3733_vm3, %v5060_v35, -inf  ;;  %v5078_v31 = vadd.f32 %v8576_v39, %v4901_v43  ;;  %v4498_v19 = vadd.f32 %v12099_v55, %v4292_v15  ;;  %v13689_v55 = vld [vmem:[#allocation40_spill] sm:$0xff] }
 0x3d0   :  { %13678 = vst [vmem:[#allocation73_spill] sm:$0xff] %v12229_v32  ;;  %v4918_v27 = vpop.f32.mrf.mxu0  ;;  %v5071_v56 = vpop.f32.mrf.mxu1  ;;  %5145 = vmax.xlane.f32.xlu0 %v12229_v32  ;;  %v4907_v51 = vadd.f32 %v4906_v38, %v4688_v53  ;;  %v4505_v47 = vadd.f32 %v12091_v61, %v4298_v6  ;;  %v4310_v38 = vadd.f32 %v13691_v17, %v13690_v59 }
 0x3d1   :  { %8861 = vmatmul.mubr.f32.gmra.mxu0 %v13681_v23  ;;  %8911 = vmatmul.mubr.f32.gmra.mxu1 %v11711_v10  ;;  %v5072_v0 = vadd.f32 %v5071_v56, %v4895_v7  ;;  %v4704_v44 = vadd.f32 %v12117_v24, %v4498_v19  ;;  %v12266_v21 = vsel %vm3733_vm3, %v5078_v31, -inf }
 0x3d2   :  { %8863 = vmatprep.mubr.f32.mxu0 %v13684_v36  ;;  %8913 = vmatprep.mubr.f32.mxu1 %v13668_v37  ;;  %v8579_v18 = vpop.f32.mrf.mxu1  ;;  %v8529_v12 = vpop.f32.mrf.mxu0  ;;  %v13688_v37 = vld [vmem:[#allocation9_spill] sm:$0xff]  ;;  %v4712_v61 = vadd.f32 %v12109_v11, %v4505_v47  ;;  %13692 = vst [vmem:[#allocation107_spill] sm:$0xff] %v12266_v21 }
 0x3d3   :  { %5147 = vmax.xlane.f32.xlu1 %v12245_v57  ;;  %v12251_v10 = vsel %vm3733_vm3, %v5072_v0, -inf  ;;  %v4304_v60 = vadd.f32 %v13688_v37, %v13687_v54  ;;  %v5090_v48 = vadd.f32 %v8579_v18, %v4913_v29  ;;  %v4919_v45 = vadd.f32 %v4918_v27, %v4704_v44 }
 0x3d4   :  { %13686 = vst [vmem:[#allocation102_spill] sm:$0xff] %v12251_v10  ;;  %v5083_v25 = vpop.f32.mrf.mxu1  ;;  %5149 = vmax.xlane.f32.xlu0 %v12251_v10  ;;  %v4925_v11 = vadd.f32 %v8526_v3, %v4712_v61  ;;  %v4930_v9 = vpop.f32.mrf.mxu0 }
 0x3d5   :  { %8864 = vmatmul.mubr.f32.gmra.mxu0 %v13689_v55  ;;  %8914 = vmatmul.mubr.f32.gmra.mxu1 %v13673_v13  ;;  %v5084_v5 = vadd.f32 %v5083_v25, %v4907_v51  ;;  %v4512_v24 = vadd.f32 %v13693_v20, %v4304_v60  ;;  %v13695_v13 = vld [vmem:[#allocation72_spill] sm:$0xff]  ;;  %v12282_v7 = vsel %vm3733_vm3, %v5090_v48, -inf }
 0x3d6   :  { %8916 = vmatprep.mubr.f32.mxu1 %v13676_v46  ;;  %v8582_v22 = vpop.f32.mrf.mxu1  ;;  %v4519_v35 = vadd.f32 %v13695_v13, %v4310_v38  ;;  %13697 = vst [vmem:[#allocation100_spill] sm:$0xff] %v12282_v7 }
 0x3d7   :  { %5151 = vmax.xlane.f32.xlu1 %v12266_v21  ;;  %v12272_v62 = vsel %vm3733_vm3, %v5084_v5, -inf  ;;  %v4720_v52 = vadd.f32 %v12139_v30, %v4512_v24  ;;  %v5102_v39 = vadd.f32 %v8582_v22, %v4925_v11 }
 0x3d8   :  { %13694 = vst [vmem:[#allocation75_spill] sm:$0xff] %v12272_v62  ;;  %v5095_v2 = vpop.f32.mrf.mxu1  ;;  %5153 = vmax.xlane.f32.xlu0 %v12272_v62  ;;  %v4728_v46 = vadd.f32 %v13696_v16, %v4519_v35 }
 0x3d9   :  { %8917 = vmatmul.mubr.f32.gmra.mxu1 %v13681_v23  ;;  %v5096_v14 = vadd.f32 %v5095_v2, %v4919_v45  ;;  %v4931_v3 = vadd.f32 %v4930_v9, %v4720_v52  ;;  %v12293_v1 = vsel %vm3733_vm3, %v5102_v39, -inf }
 0x3da   :  { %8919 = vmatprep.mubr.f32.mxu1 %v13684_v36  ;;  %v8585_v58 = vpop.f32.mrf.mxu1  ;;  %v4937_v30 = vadd.f32 %v8529_v12, %v4728_v46  ;;  %13699 = vst [vmem:[#allocation70_spill] sm:$0xff] %v12293_v1 }
 0x3db   :  { %5155 = vmax.xlane.f32.xlu1 %v12282_v7  ;;  %v12287_v34 = vsel %vm3733_vm3, %v5096_v14, -inf }
 0x3dc   :  { %13698 = vst [vmem:[#allocation105_spill] sm:$0xff] %v12287_v34  ;;  %v5107_v43 = vpop.f32.mrf.mxu1  ;;  %5157 = vmax.xlane.f32.xlu0 %v12287_v34  ;;  %v5114_v56 = vadd.f32 %v8585_v58, %v4937_v30 }
 0x3dd   :  { %8920 = vmatmul.mubr.f32.gmra.mxu1 %v13689_v55  ;;  %v5108_v27 = vadd.f32 %v5107_v43, %v4931_v3 }
 0x3de   :  { %v12303_v15 = vsel %vm3733_vm3, %v5114_v56, -inf }
 0x3df   :  { %5159 = vmax.xlane.f32.xlu1 %v12293_v1  ;;  %v12298_v4 = vsel %vm3733_vm3, %v5108_v27, -inf  ;;  %13701 = vst [vmem:[#allocation99_spill] sm:$0xff] %v12303_v15 }
 0x3e0   :  { %13700 = vst [vmem:[#allocation101_spill] sm:$0xff] %v12298_v4  ;;  %5161 = vmax.xlane.f32.xlu0 %v12298_v4 }
 0x3e3   :  { %5163 = vmax.xlane.f32.xlu1 %v12303_v15 }
 0x3f7   :  { %v12306_v53 = vpop.f32.mrf.mxu0 }
 0x3f9   :  { %v12308_v23 = vpop.f32.mrf.mxu0 }
 0x3fb   :  { %v12310_v0 = vpop.f32.mrf.mxu0 }
 0x3fd   :  { %v12312_v28 = vpop.f32.mrf.mxu0 }
 0x3ff   :  { %v8676_v33 = vpop.f32.mrf.mxu1  ;;  %v12314_v26 = vpop.f32.mrf.mxu0 }
 0x401   :  { %v5777_v6 = vpop.f32.mrf.mxu1  ;;  %v12316_v36 = vpop.f32.mrf.mxu0 }
 0x403   :  { %v8679_v31 = vpop.f32.mrf.mxu1  ;;  %v12320_v19 = vpop.f32.mrf.mxu0 }
 0x405   :  { %v12318_v18 = vpop.f32.mrf.mxu1  ;;  %v12324_v47 = vpop.f32.mrf.mxu0 }
 0x407   :  { %v12322_v51 = vpop.f32.mrf.mxu1  ;;  %v12328_v12 = vpop.f32.mrf.mxu0 }
 0x409   :  { %v12326_v29 = vpop.f32.mrf.mxu1  ;;  %v12332_v54 = vpop.f32.mrf.mxu0 }
 0x40b   :  { %v12330_v25 = vpop.f32.mrf.mxu1  ;;  %v12336_v60 = vpop.f32.mrf.mxu0 }
 0x40d   :  { %v12334_v37 = vpop.f32.mrf.mxu1  ;;  %v12340_v55 = vpop.f32.mrf.mxu0 }
 0x40f   :  { %v12338_v44 = vpop.f32.mrf.mxu1  ;;  %v12344_v59 = vpop.f32.mrf.mxu0 }
 0x411   :  { %v12342_v5 = vpop.f32.mrf.mxu1  ;;  %v12348_v38 = vpop.f32.mrf.mxu0 }
 0x413   :  { %v12346_v17 = vpop.f32.mrf.mxu1  ;;  %v12352_v48 = vpop.f32.mrf.mxu0 }
 0x414   :  { %13702 = vst [vmem:[#allocation69_spill] sm:$0xff] %v12352_v48 }
 0x415   :  { %v12350_v61 = vpop.f32.mrf.mxu1  ;;  %v12356_v20 = vpop.f32.mrf.mxu0 }
 0x416   :  { %13703 = vst [vmem:[#allocation104_spill] sm:$0xff] %v12356_v20 }
 0x417   :  { %v12354_v22 = vpop.f32.mrf.mxu1 }
 0x419   :  { %v12358_v24 = vpop.f32.mrf.mxu1 }
 0x41a   :  { %13704 = vst [vmem:[#allocation67_spill] sm:$0xff] %v12358_v24 }
 0x41b   :  { %v12360_v13 = vpop.f32.mrf.mxu1 }
 0x41c   :  { %13705 = vst [vmem:[#allocation94_spill] sm:$0xff] %v12360_v13  ;;  %v5784_v13 = vadd.f32 %v8676_v33, %v12306_v53 }
 0x41d   :  { %v12362_v11 = vpop.f32.mrf.mxu1 }
 0x41e   :  { %13706 = vst [vmem:[#allocation98_spill] sm:$0xff] %v12362_v11 }
 0x438   :  { %v8732_v45 = vpop.f32.mrf.mxu0 }
 0x439   :  { %v5979_v8 = vadd.f32 %v8732_v45, %v5784_v13 }
 0x43a   :  { %v5971_v35 = vpop.f32.mrf.mxu0 }
 0x43c   :  { %v8735_v9 = vpop.f32.mrf.mxu0 }
 0x43e   :  { %v5985_v52 = vpop.f32.mrf.mxu0 }
 0x440   :  { %v8788_v2 = vpop.f32.mrf.mxu1  ;;  %v8738_v16 = vpop.f32.mrf.mxu0 }
 0x442   :  { %v6165_v14 = vpop.f32.mrf.mxu1  ;;  %v5999_v39 = vpop.f32.mrf.mxu0 }
 0x444   :  { %v8791_v46 = vpop.f32.mrf.mxu1  ;;  %v12364_v3 = vpop.f32.mrf.mxu0 }
 0x446   :  { %v6181_v58 = vpop.f32.mrf.mxu1  ;;  %v12366_v43 = vpop.f32.mrf.mxu0 }
 0x448   :  { %v8794_v30 = vpop.f32.mrf.mxu1  ;;  %v12370_v56 = vpop.f32.mrf.mxu0 }
 0x44a   :  { %v12368_v27 = vpop.f32.mrf.mxu1  ;;  %v12374_v15 = vpop.f32.mrf.mxu0 }
 0x44c   :  { %v12372_v4 = vpop.f32.mrf.mxu1  ;;  %v12378_v1 = vpop.f32.mrf.mxu0 }
 0x44e   :  { %v12376_v34 = vpop.f32.mrf.mxu1  ;;  %v12382_v7 = vpop.f32.mrf.mxu0 }
 0x44f   :  { %13707 = vst [vmem:[#allocation96_spill] sm:$0xff] %v12382_v7 }
 0x450   :  { %v12380_v62 = vpop.f32.mrf.mxu1  ;;  %v12386_v21 = vpop.f32.mrf.mxu0 }
 0x451   :  { %13708 = vst [vmem:[#allocation58_spill] sm:$0xff] %v12386_v21  ;;  %v12407_v24 = vpop.xlane.xlu1 %5139 }
 0x452   :  { %v12384_v10 = vpop.f32.mrf.mxu1  ;;  %v12390_v57 = vpop.f32.mrf.mxu0 }
 0x453   :  { %13710 = vst [vmem:[#allocation103_spill] sm:$0xff] %v12390_v57 }
 0x454   :  { %v12388_v32 = vpop.f32.mrf.mxu1  ;;  %v12394_v42 = vpop.f32.mrf.mxu0 }
 0x455   :  { %13709 = vst [vmem:[#allocation13_spill] sm:$0xff] %v12388_v32  ;;  %13712 = vst [vmem:[#allocation12_spill] sm:$0xff] %v12394_v42  ;;  %v5778_v32 = vadd.f32 %v5777_v6, %v12308_v23  ;;  %v6174_v42 = vadd.f32 %v8788_v2, %v5979_v8  ;;  %v5808_v23 = vadd.f32 %v12322_v51, %v12314_v26 }
 0x456   :  { %v12392_v63 = vpop.f32.mrf.mxu1  ;;  %v12398_v11 = vpop.f32.mrf.mxu0 }
 0x457   :  { %13711 = vst [vmem:[#allocation68_spill] sm:$0xff] %v12392_v63  ;;  %13714 = vst [vmem:[#allocation16_spill] sm:$0xff] %v12398_v11  ;;  %v5796_v63 = vadd.f32 %v8679_v31, %v12310_v0  ;;  %v5972_v7 = vadd.f32 %v5971_v35, %v5778_v32  ;;  %v12415_v32 = vpop.xlane.xlu0 %5135  ;;  %v5802_v35 = vadd.f32 %v12326_v29, %v12316_v36 }
 0x458   :  { %v12396_v50 = vpop.f32.mrf.mxu1  ;;  %v6007_v2 = vadd.f32 %v8738_v16, %v5808_v23 }
 0x459   :  { %13713 = vst [vmem:[#allocation14_spill] sm:$0xff] %v12396_v50  ;;  %v5993_v53 = vadd.f32 %v8735_v9, %v5796_v63  ;;  %v6166_v33 = vadd.f32 %v6165_v14, %v5972_v7  ;;  %v12419_v7 = vpop.xlane.xlu1 %5137 }
 0x45a   :  { %v12400_v20 = vpop.f32.mrf.mxu1  ;;  %v6206_v36 = vadd.f32 %v8794_v30, %v6007_v2 }
 0x45b   :  { %13715 = vst [vmem:[#allocation49_spill] sm:$0xff] %v12400_v20  ;;  %v5790_v20 = vadd.f32 %v12318_v18, %v12312_v28  ;;  %v6190_v0 = vadd.f32 %v8791_v46, %v5993_v53  ;;  %v5820_v18 = vadd.f32 %v12330_v25, %v12320_v19  ;;  %v12437_v25 = vpop.xlane.xlu0 %5133 }
 0x45c   :  { %v12403_v48 = vpop.f32.mrf.mxu1 }
 0x45d   :  { %13716 = vst [vmem:[#allocation97_spill] sm:$0xff] %v12403_v48  ;;  %v5986_v13 = vadd.f32 %v5985_v52, %v5790_v20  ;;  %v6021_v52 = vadd.f32 %v12364_v3, %v5820_v18 }
 0x45e   :  { %v12409_v50 = vpop.f32.mrf.mxu1 }
 0x45f   :  { %13717 = vst [vmem:[#allocation27_spill] sm:$0xff] %v12409_v50  ;;  %v6182_v63 = vadd.f32 %v6181_v58, %v5986_v13  ;;  %v5832_v58 = vadd.f32 %v12338_v44, %v12328_v12  ;;  %v6222_v30 = vadd.f32 %v12372_v4, %v6021_v52  ;;  %v12459_v4 = vpop.xlane.xlu0 %5141 }
 0x461   :  { %v6035_v12 = vadd.f32 %v12370_v56, %v5832_v58 }
 0x479   :  { %v8844_v49 = vpop.f32.mrf.mxu0 }
 0x47a   :  { %v6411_v48 = vadd.f32 %v8844_v49, %v6174_v42 }
 0x47b   :  { %v6404_v21 = vpop.f32.mrf.mxu0 }
 0x47c   :  { %v6405_v8 = vadd.f32 %v6404_v21, %v6166_v33  ;;  %v6000_v21 = vadd.f32 %v5999_v39, %v5802_v35 }
 0x47d   :  { %v8847_v57 = vpop.f32.mrf.mxu0 }
 0x47e   :  { %v6423_v49 = vadd.f32 %v8847_v57, %v6190_v0  ;;  %v5814_v57 = vadd.f32 %v12334_v37, %v12324_v47  ;;  %v6198_v19 = vadd.f32 %v12368_v27, %v6000_v21  ;;  %v12448_v27 = vpop.xlane.xlu1 %5143 }
 0x47f   :  { %v6416_v11 = vpop.f32.mrf.mxu0 }
 0x480   :  { %v6417_v29 = vadd.f32 %v6416_v11, %v6182_v63  ;;  %v6014_v47 = vadd.f32 %v12366_v43, %v5814_v57  ;;  %v12496_v57 = vpop.xlane.xlu0 %5145 }
 0x481   :  { %v8850_v6 = vpop.f32.mrf.mxu0  ;;  %v8900_v45 = vpop.f32.mrf.mxu1 }
 0x482   :  { %v6588_v31 = vadd.f32 %v8900_v45, %v6411_v48  ;;  %v6435_v46 = vadd.f32 %v8850_v6, %v6206_v36  ;;  %v5826_v6 = vadd.f32 %v12342_v5, %v12332_v54  ;;  %v6214_v45 = vadd.f32 %v12376_v34, %v6014_v47 }
 0x483   :  { %v6428_v50 = vpop.f32.mrf.mxu0  ;;  %v6581_v28 = vpop.f32.mrf.mxu1 }
 0x484   :  { %v6582_v42 = vadd.f32 %v6581_v28, %v6405_v8  ;;  %v12423_v26 = vsel %vm3733_vm3, %v6588_v31, -inf  ;;  %v6429_v53 = vadd.f32 %v6428_v50, %v6198_v19  ;;  %v5844_v8 = vadd.f32 %v12346_v17, %v12336_v60 }
 0x485   :  { %v8853_v51 = vpop.f32.mrf.mxu0  ;;  %v8903_v48 = vpop.f32.mrf.mxu1  ;;  %6693 = vmax.xlane.f32.xlu1 %v12423_v26  ;;  %v6028_v54 = vadd.f32 %v12374_v15, %v5826_v6  ;;  %v6238_v31 = vadd.f32 %v12380_v62, %v6035_v12  ;;  %v5838_v28 = vadd.f32 %v12350_v61, %v12340_v55  ;;  %v5166_v15 = vsub.f32 %v12157_v40, %v12415_v32  ;;  %v13718_v55 = vld [vmem:[#allocation67_spill] sm:$0xff]  ;;  %v13719_v61 = vld [vmem:[#allocation96_spill] sm:$0xff] }
 0x486   :  { %v6600_v20 = vadd.f32 %v8903_v48, %v6423_v49  ;;  %v12430_v9 = vsel %vm3733_vm3, %v6582_v42, -inf  ;;  %v6447_v13 = vadd.f32 %v8853_v51, %v6222_v30  ;;  %v6049_v63 = vadd.f32 %v12378_v1, %v5844_v8  ;;  %v12481_v49 = vpop.xlane.xlu1 %5147  ;;  %v13720_v51 = vld [vmem:[#allocation78_spill] sm:$0xff]  ;;  %v13727_v12 = vld [vmem:[#allocation104_spill] sm:$0xff] }
 0x487   :  { %v6440_v14 = vpop.f32.mrf.mxu0  ;;  %v6593_v16 = vpop.f32.mrf.mxu1  ;;  %6691 = vmax.xlane.f32.xlu0 %v12430_v9  ;;  %v6230_v62 = vadd.f32 %v12384_v10, %v6028_v54  ;;  %v5856_v1 = vadd.f32 %v12354_v22, %v12344_v59  ;;  %v5850_v40 = vadd.f32 %v13718_v55, %v12348_v38  ;;  %v6042_v32 = vadd.f32 %v13719_v61, %v5838_v28  ;;  %v13722_v38 = vld [vmem:[#allocation69_spill] sm:$0xff]  ;;  %v13723_v22 = vld [vmem:[#allocation94_spill] sm:$0xff] }
 0x488   :  { %v6594_v11 = vadd.f32 %v6593_v16, %v6417_v29  ;;  %v12441_v39 = vsel %vm3733_vm3, %v6600_v20, -inf  ;;  %v6441_v34 = vadd.f32 %v6440_v14, %v6214_v45  ;;  %v5165_v48 = vsub.f32 %v13720_v51, %v12437_v25  ;;  %v13721_v29 = vld [vmem:[#allocation13_spill] sm:$0xff] }
 0x489   :  { %v8856_v37 = vpop.f32.mrf.mxu0  ;;  %v8906_v3 = vpop.f32.mrf.mxu1  ;;  %6697 = vmax.xlane.f32.xlu1 %v12441_v39  ;;  %v6254_v20 = vadd.f32 %v13721_v29, %v6049_v63  ;;  %v5868_v16 = vadd.f32 %v13723_v22, %v13722_v38  ;;  %v5183_v19 = vmul.f32 1.442695, %v5166_v15  ;;  %v13732_v15 = vld [vmem:[#allocation12_spill] sm:$0xff]  ;;  %v13736_v29 = vld [vmem:[#allocation6_spill] sm:$0xff] }
 0x48a   :  { %v6612_v33 = vadd.f32 %v8906_v3, %v6435_v46  ;;  %v12452_v23 = vsel %vm3733_vm3, %v6594_v11, -inf  ;;  %v6459_v42 = vadd.f32 %v8856_v37, %v6238_v31  ;;  %v13724_v46 = vld [vmem:[#allocation58_spill] sm:$0xff]  ;;  %v13725_v11 = vld [vmem:[#allocation5_spill] sm:$0xff]  ;;  %v13726_v3 = vld [vmem:[#allocation68_spill] sm:$0xff]  ;;  %v5181_v45 = vmul.f32 1.442695, %v5165_v48 }
 0x48b   :  { %v6452_v44 = vpop.f32.mrf.mxu0  ;;  %v6605_v43 = vpop.f32.mrf.mxu1  ;;  %6695 = vmax.xlane.f32.xlu0 %v12452_v23  ;;  %v6063_v25 = vadd.f32 %v13724_v46, %v5856_v1  ;;  %v5168_v58 = vsub.f32 %v13725_v11, %v12407_v24  ;;  %v6246_v30 = vadd.f32 %v13726_v3, %v6042_v32  ;;  %v13730_v24 = vld [vmem:[#allocation88_spill] sm:$0xff]  ;;  %8925 = vpow2.f32 %v5183_v19  ;;  %v13734_v1 = vld [vmem:[#allocation49_spill] sm:$0xff] }
 0x48c   :  { %v6606_v50 = vadd.f32 %v6605_v43, %v6429_v53  ;;  %v12463_v0 = vsel %vm3733_vm3, %v6612_v33, -inf  ;;  %v6453_v52 = vadd.f32 %v6452_v44, %v6230_v62  ;;  %v13728_v44 = vld [vmem:[#allocation98_spill] sm:$0xff]  ;;  %v5167_v8 = vsub.f32 %v13730_v24, %v12419_v7  ;;  %v13733_v62 = vld [vmem:[#allocation71_spill] sm:$0xff]  ;;  %v13735_v48 = vld [vmem:[#allocation16_spill] sm:$0xff] }
 0x48d   :  { %v8859_v5 = vpop.f32.mrf.mxu0  ;;  %v8909_v56 = vpop.f32.mrf.mxu1  ;;  %6701 = vmax.xlane.f32.xlu1 %v12463_v0  ;;  %v5862_v43 = vadd.f32 %v13728_v44, %v13727_v12  ;;  %v5187_v63 = vmul.f32 1.442695, %v5168_v58  ;;  %8927 = vpow2.f32 %v5181_v45  ;;  %v13738_v19 = vld [vmem:[#allocation92_spill] sm:$0xff]  ;;  %v13741_v24 = vld [vmem:[#allocation107_spill] sm:$0xff] }
 0x48e   :  { %v6624_v35 = vadd.f32 %v8909_v56, %v6447_v13  ;;  %v12472_v2 = vsel %vm3733_vm3, %v6606_v50, -inf  ;;  %v6471_v53 = vadd.f32 %v8859_v5, %v6254_v20  ;;  %v13729_v13 = vld [vmem:[#allocation103_spill] sm:$0xff]  ;;  %v13731_v56 = vld [vmem:[#allocation14_spill] sm:$0xff]  ;;  %v5152_v5 = vpop.xlane.xlu1 %5151  ;;  %v5185_v51 = vmul.f32 1.442695, %v5167_v8 }
 0x48f   :  { %v6464_v60 = vpop.f32.mrf.mxu0  ;;  %v6617_v17 = vpop.f32.mrf.mxu1  ;;  %6699 = vmax.xlane.f32.xlu0 %v12472_v2  ;;  %v6056_v50 = vadd.f32 %v13729_v13, %v5850_v40  ;;  %v6270_v31 = vadd.f32 %v13731_v56, %v6063_v25  ;;  %8929 = vpow2.f32 %v5187_v63  ;;  %v5172_v46 = vsub.f32 %v13738_v19, %v12481_v49 }
 0x490   :  { %v6618_v18 = vadd.f32 %v6617_v17, %v6441_v34  ;;  %v12485_v21 = vsel %vm3733_vm3, %v6624_v35, -inf  ;;  %v6465_v34 = vadd.f32 %v6464_v60, %v6246_v30  ;;  %v6077_v17 = vadd.f32 %v13732_v15, %v5868_v16  ;;  %v5150_v40 = vpop.xlane.xlu0 %5149 }
 0x491   :  { %v8862_v10 = vpop.f32.mrf.mxu0  ;;  %v8912_v36 = vpop.f32.mrf.mxu1  ;;  %6705 = vmax.xlane.f32.xlu1 %v12485_v21  ;;  %v6262_v55 = vadd.f32 %v13734_v1, %v6056_v50  ;;  %8931 = vpow2.f32 %v5185_v51  ;;  %v5195_v50 = vmul.f32 1.442695, %v5172_v46  ;;  %v5174_v8 = vsub.f32 %v13741_v24, %v5152_v5  ;;  %v13744_v1 = vld [vmem:[#allocation75_spill] sm:$0xff]  ;;  %v13748_v46 = vld [vmem:[#allocation101_spill] sm:$0xff] }
 0x492   :  { %v6636_v14 = vadd.f32 %v8912_v36, %v6459_v42  ;;  %v12500_v59 = vsel %vm3733_vm3, %v6618_v18, -inf  ;;  %v5170_v42 = vsub.f32 %v13733_v62, %v12448_v27  ;;  %v6483_v60 = vadd.f32 %v8862_v10, %v6270_v31 }
 0x493   :  { %v6476_v47 = vpop.f32.mrf.mxu0  ;;  %v6629_v37 = vpop.f32.mrf.mxu1  ;;  %6703 = vmax.xlane.f32.xlu0 %v12500_v59  ;;  %v6070_v36 = vadd.f32 %v13735_v48, %v5862_v43  ;;  %v5169_v27 = vsub.f32 %v13736_v29, %v12459_v4  ;;  %v13739_v4 = vld [vmem:[#allocation27_spill] sm:$0xff]  ;;  %v5199_v5 = vmul.f32 1.442695, %v5174_v8  ;;  %v13746_v29 = vld [vmem:[#allocation105_spill] sm:$0xff] }
 0x494   :  { %v6630_v33 = vadd.f32 %v6629_v37, %v6453_v52  ;;  %v12511_v6 = vsel %vm3733_vm3, %v6636_v14, -inf  ;;  %v13737_v52 = vld [vmem:[#allocation97_spill] sm:$0xff]  ;;  %v6477_v38 = vadd.f32 %v6476_v47, %v6262_v55  ;;  %v5191_v16 = vmul.f32 1.442695, %v5170_v42  ;;  %v5156_v37 = vpop.xlane.xlu1 %5155  ;;  %v5154_v49 = vpop.xlane.xlu0 %5153 }
 0x495   :  { %v8915_v54 = vpop.f32.mrf.mxu1  ;;  %6709 = vmax.xlane.f32.xlu1 %v12511_v6  ;;  %v8865_v7 = vpop.f32.mrf.mxu0  ;;  %v6286_v14 = vadd.f32 %v13737_v52, %v6077_v17  ;;  %v6278_v58 = vadd.f32 %v13739_v4, %v6070_v36  ;;  %v13743_v17 = vld [vmem:[#allocation100_spill] sm:$0xff]  ;;  %v5175_v55 = vsub.f32 %v13744_v1, %v5154_v49 }
 0x496   :  { %v6648_v35 = vadd.f32 %v8915_v54, %v6471_v53  ;;  %v12522_v28 = vsel %vm3733_vm3, %v6630_v33, -inf  ;;  %v5189_v53 = vmul.f32 1.442695, %v5169_v27  ;;  %v13740_v33 = vld [vmem:[#allocation73_spill] sm:$0xff]  ;;  %8933 = vpow2.f32 %v5191_v16 }
 0x497   :  { %v6641_v18 = vpop.f32.mrf.mxu1  ;;  %6707 = vmax.xlane.f32.xlu0 %v12522_v28  ;;  %v6488_v25 = vpop.f32.mrf.mxu0  ;;  %v6495_v3 = vadd.f32 %v8865_v7, %v6286_v14  ;;  %v5171_v12 = vsub.f32 %v13740_v33, %v12496_v57  ;;  %v5176_v62 = vsub.f32 %v13743_v17, %v5156_v37  ;;  %v5201_v36 = vmul.f32 1.442695, %v5175_v55 }
 0x498   :  { %v6642_v61 = vadd.f32 %v6641_v18, %v6465_v34  ;;  %v12531_v32 = vsel %vm3733_vm3, %v6648_v35, -inf  ;;  %v6489_v43 = vadd.f32 %v6488_v25, %v6278_v58  ;;  %8935 = vpow2.f32 %v5189_v53  ;;  %v13742_v34 = vld [vmem:[#allocation102_spill] sm:$0xff]  ;;  %v5160_v63 = vpop.xlane.xlu1 %5159  ;;  %v12571_v42 = vpop.eup %8925 }
 0x499   :  { %v8918_v20 = vpop.f32.mrf.mxu1  ;;  %6713 = vmax.xlane.f32.xlu1 %v12531_v32  ;;  %v5193_v31 = vmul.f32 1.442695, %v5171_v12  ;;  %v5173_v35 = vsub.f32 %v13742_v34, %v5150_v40  ;;  %8937 = vpow2.f32 %v5195_v50  ;;  %v5158_v7 = vpop.xlane.xlu0 %5157  ;;  %v5203_v41 = vmul.f32 1.442695, %v5176_v62 }
 0x49a   :  { %v6660_v22 = vadd.f32 %v8918_v20, %v6483_v60  ;;  %v12540_v10 = vsel %vm3733_vm3, %v6642_v61, -inf  ;;  %v12575_v40 = vpop.eup %8927  ;;  %v13745_v60 = vld [vmem:[#allocation70_spill] sm:$0xff]  ;;  %v5177_v27 = vsub.f32 %v13746_v29, %v5158_v7 }
 0x49b   :  { %v6653_v11 = vpop.f32.mrf.mxu1  ;;  %6711 = vmax.xlane.f32.xlu0 %v12540_v10  ;;  %8939 = vpow2.f32 %v5193_v31  ;;  %v5197_v18 = vmul.f32 1.442695, %v5173_v35  ;;  %v5178_v61 = vsub.f32 %v13745_v60, %v5160_v63 }
 0x49c   :  { %v6654_v30 = vadd.f32 %v6653_v11, %v6477_v38  ;;  %v12548_v47 = vsel %vm3733_vm3, %v6660_v22, -inf  ;;  %8941 = vpow2.f32 %v5199_v5  ;;  %v12579_v51 = vpop.eup %8929  ;;  %v5164_v48 = vpop.xlane.xlu1 %5163  ;;  %v13747_v38 = vld [vmem:[#allocation99_spill] sm:$0xff]  ;;  %v5205_v19 = vmul.f32 1.442695, %v5177_v27 }
 0x49d   :  { %v8921_v44 = vpop.f32.mrf.mxu1  ;;  %6717 = vmax.xlane.f32.xlu1 %v12548_v47  ;;  %8943 = vpow2.f32 %v5197_v18  ;;  %v5162_v52 = vpop.xlane.xlu0 %5161  ;;  %v5207_v14 = vmul.f32 1.442695, %v5178_v61  ;;  %v5180_v22 = vsub.f32 %v13747_v38, %v5164_v48 }
 0x49e   :  { %v6672_v45 = vadd.f32 %v8921_v44, %v6495_v3  ;;  %v12555_v13 = vsel %vm3733_vm3, %v6654_v30, -inf  ;;  %v12583_v20 = vpop.eup %8931  ;;  %8945 = vpow2.f32 %v5203_v41  ;;  %v5179_v25 = vsub.f32 %v13748_v46, %v5162_v52 }
 0x49f   :  { %v6665_v54 = vpop.f32.mrf.mxu1  ;;  %6715 = vmax.xlane.f32.xlu0 %v12555_v13  ;;  %8947 = vpow2.f32 %v5201_v36  ;;  %v5211_v4 = vmul.f32 1.442695, %v5180_v22 }
 0x4a0   :  { %v6666_v56 = vadd.f32 %v6665_v54, %v6489_v43  ;;  %v12561_v57 = vsel %vm3733_vm3, %v6672_v45, -inf  ;;  %8949 = vpow2.f32 %v5207_v14  ;;  %v5209_v37 = vmul.f32 1.442695, %v5179_v25 }
 0x4a1   :  { %6721 = vmax.xlane.f32.xlu1 %v12561_v57  ;;  %8951 = vpow2.f32 %v5205_v19 }
 0x4a2   :  { %v12567_v15 = vsel %vm3733_vm3, %v6666_v56, -inf  ;;  %8953 = vpow2.f32 %v5211_v4 }
 0x4a3   :  { %6719 = vmax.xlane.f32.xlu0 %v12567_v15  ;;  %v12587_v16 = vpop.eup %8933  ;;  %8955 = vpow2.f32 %v5209_v37 }
 0x4a5   :  { %5215 = vadd.xlane.f32.xlu1 %v12571_v42  ;;  %v12591_v11 = vpop.eup %8935 }
 0x4a6   :  { %v12594_v58 = vpop.eup %8937 }
 0x4a7   :  { %5213 = vadd.xlane.f32.xlu0 %v12575_v40 }
 0x4a8   :  { %v12597_v3 = vpop.eup %8939 }
 0x4a9   :  { %5219 = vadd.xlane.f32.xlu1 %v12579_v51  ;;  %v12600_v30 = vpop.eup %8941 }
 0x4aa   :  { %v12603_v53 = vpop.eup %8943 }
 0x4ab   :  { %5217 = vadd.xlane.f32.xlu0 %v12583_v20  ;;  %v12606_v33 = vpop.eup %8945 }
 0x4ac   :  { %v12609_v12 = vpop.eup %8947 }
 0x4ad   :  { %5223 = vadd.xlane.f32.xlu1 %v12587_v16  ;;  %v12612_v44 = vpop.eup %8949 }
 0x4ae   :  { %v12615_v49 = vpop.eup %8951 }
 0x4af   :  { %5221 = vadd.xlane.f32.xlu0 %v12591_v11  ;;  %v12618_v43 = vpop.eup %8953 }
 0x4b0   :  { %v12621_v45 = vpop.eup %8955 }
 0x4b1   :  { %5227 = vadd.xlane.f32.xlu1 %v12594_v58 }
 0x4b3   :  { %5225 = vadd.xlane.f32.xlu0 %v12597_v3 }
 0x4b5   :  { %5231 = vadd.xlane.f32.xlu1 %v12600_v30 }
 0x4b7   :  { %5229 = vadd.xlane.f32.xlu0 %v12603_v53 }
 0x4b9   :  { %5235 = vadd.xlane.f32.xlu1 %v12606_v33 }
 0x4bb   :  { %5233 = vadd.xlane.f32.xlu0 %v12609_v12 }
 0x4bd   :  { %5239 = vadd.xlane.f32.xlu1 %v12612_v44 }
 0x4bf   :  { %5237 = vadd.xlane.f32.xlu0 %v12615_v49 }
 0x4c1   :  { %5243 = vadd.xlane.f32.xlu1 %v12618_v43 }
 0x4c3   :  { %5241 = vadd.xlane.f32.xlu0 %v12621_v45 }
 0x50e   :  { %v6694_v50 = vpop.xlane.xlu1 %6693 }
 0x50f   :  { %v6724_v24 = vsub.f32 %v12423_v26, %v6694_v50 }
 0x510   :  { %v6692_v8 = vpop.xlane.xlu0 %6691 }
 0x511   :  { %v6741_v54 = vmul.f32 1.442695, %v6724_v24  ;;  %v6723_v56 = vsub.f32 %v12430_v9, %v6692_v8 }
 0x512   :  { %v6698_v31 = vpop.xlane.xlu1 %6697 }
 0x513   :  { %8957 = vpow2.f32 %v6741_v54  ;;  %v6739_v34 = vmul.f32 1.442695, %v6723_v56  ;;  %v6726_v35 = vsub.f32 %v12441_v39, %v6698_v31 }
 0x514   :  { %v6696_v63 = vpop.xlane.xlu0 %6695 }
 0x515   :  { %8959 = vpow2.f32 %v6739_v34  ;;  %v6745_v5 = vmul.f32 1.442695, %v6726_v35  ;;  %v6725_v17 = vsub.f32 %v12452_v23, %v6696_v63 }
 0x516   :  { %v6702_v62 = vpop.xlane.xlu1 %6701 }
 0x517   :  { %8961 = vpow2.f32 %v6745_v5  ;;  %v6743_v7 = vmul.f32 1.442695, %v6725_v17  ;;  %v6728_v18 = vsub.f32 %v12463_v0, %v6702_v62 }
 0x518   :  { %v6700_v26 = vpop.xlane.xlu0 %6699 }
 0x519   :  { %8963 = vpow2.f32 %v6743_v7  ;;  %v6749_v1 = vmul.f32 1.442695, %v6728_v18  ;;  %v6727_v9 = vsub.f32 %v12472_v2, %v6700_v26 }
 0x51a   :  { %v6706_v55 = vpop.xlane.xlu1 %6705 }
 0x51b   :  { %8965 = vpow2.f32 %v6749_v1  ;;  %v6747_v41 = vmul.f32 1.442695, %v6727_v9  ;;  %v6730_v39 = vsub.f32 %v12485_v21, %v6706_v55 }
 0x51c   :  { %v6704_v60 = vpop.xlane.xlu0 %6703 }
 0x51d   :  { %8967 = vpow2.f32 %v6747_v41  ;;  %v6753_v61 = vmul.f32 1.442695, %v6730_v39  ;;  %v6729_v23 = vsub.f32 %v12500_v59, %v6704_v60 }
 0x51e   :  { %v6710_v48 = vpop.xlane.xlu1 %6709 }
 0x51f   :  { %8969 = vpow2.f32 %v6753_v61  ;;  %v6751_v36 = vmul.f32 1.442695, %v6729_v23  ;;  %v6732_v0 = vsub.f32 %v12511_v6, %v6710_v48 }
 0x520   :  { %v12633_v29 = vpop.eup %8957  ;;  %v6708_v27 = vpop.xlane.xlu0 %6707 }
 0x521   :  { %8971 = vpow2.f32 %v6751_v36  ;;  %v6757_v2 = vmul.f32 1.442695, %v6732_v0  ;;  %v6731_v52 = vsub.f32 %v12522_v28, %v6708_v27  ;;  %6773 = vadd.xlane.f32.xlu1 %v12633_v29 }
 0x522   :  { %v12637_v21 = vpop.eup %8959  ;;  %v6714_v14 = vpop.xlane.xlu1 %6713 }
 0x523   :  { %8973 = vpow2.f32 %v6757_v2  ;;  %v6755_v38 = vmul.f32 1.442695, %v6731_v52  ;;  %v6734_v59 = vsub.f32 %v12531_v32, %v6714_v14  ;;  %6771 = vadd.xlane.f32.xlu0 %v12637_v21 }
 0x524   :  { %v12641_v22 = vpop.eup %8961  ;;  %v6712_v6 = vpop.xlane.xlu0 %6711 }
 0x525   :  { %8975 = vpow2.f32 %v6755_v38  ;;  %v6761_v19 = vmul.f32 1.442695, %v6734_v59  ;;  %v6733_v46 = vsub.f32 %v12540_v10, %v6712_v6  ;;  %6777 = vadd.xlane.f32.xlu1 %v12641_v22 }
 0x526   :  { %v12645_v28 = vpop.eup %8963  ;;  %v6718_v25 = vpop.xlane.xlu1 %6717 }
 0x527   :  { %8977 = vpow2.f32 %v6761_v19  ;;  %v6759_v4 = vmul.f32 1.442695, %v6733_v46  ;;  %v6736_v37 = vsub.f32 %v12548_v47, %v6718_v25  ;;  %6775 = vadd.xlane.f32.xlu0 %v12645_v28 }
 0x528   :  { %v12649_v32 = vpop.eup %8965  ;;  %v6716_v50 = vpop.xlane.xlu0 %6715 }
 0x529   :  { %8979 = vpow2.f32 %v6759_v4  ;;  %v6765_v24 = vmul.f32 1.442695, %v6736_v37  ;;  %v6735_v8 = vsub.f32 %v12555_v13, %v6716_v50  ;;  %6781 = vadd.xlane.f32.xlu1 %v12649_v32 }
 0x52a   :  { %v12653_v10 = vpop.eup %8967  ;;  %v6722_v54 = vpop.xlane.xlu1 %6721 }
 0x52b   :  { %8981 = vpow2.f32 %v6765_v24  ;;  %v6763_v56 = vmul.f32 1.442695, %v6735_v8  ;;  %v6738_v31 = vsub.f32 %v12561_v57, %v6722_v54  ;;  %6779 = vadd.xlane.f32.xlu0 %v12653_v10 }
 0x52c   :  { %v12657_v47 = vpop.eup %8969  ;;  %v6720_v34 = vpop.xlane.xlu0 %6719 }
 0x52d   :  { %8983 = vpow2.f32 %v6763_v56  ;;  %v6769_v35 = vmul.f32 1.442695, %v6738_v31  ;;  %v6737_v63 = vsub.f32 %v12567_v15, %v6720_v34  ;;  %6785 = vadd.xlane.f32.xlu1 %v12657_v47 }
 0x52e   :  { %v12661_v13 = vpop.eup %8971  ;;  %v5216_v5 = vpop.xlane.xlu1 %5215 }
 0x52f   :  { %8985 = vpow2.f32 %v6769_v35  ;;  %v6767_v17 = vmul.f32 1.442695, %v6737_v63  ;;  %6783 = vadd.xlane.f32.xlu0 %v12661_v13 }
 0x530   :  { %v12664_v62 = vpop.eup %8973  ;;  %8987 = vrcp.f32 %v5216_v5  ;;  %v5214_v57 = vpop.xlane.xlu0 %5213 }
 0x531   :  { %8989 = vpow2.f32 %v6767_v17  ;;  %6789 = vadd.xlane.f32.xlu1 %v12664_v62 }
 0x532   :  { %v12667_v7 = vpop.eup %8975  ;;  %8991 = vrcp.f32 %v5214_v57  ;;  %v5220_v15 = vpop.xlane.xlu1 %5219 }
 0x533   :  { %8993 = vrcp.f32 %v5220_v15  ;;  %6787 = vadd.xlane.f32.xlu0 %v12667_v7 }
 0x534   :  { %v12670_v18 = vpop.eup %8977  ;;  %v5218_v26 = vpop.xlane.xlu0 %5217 }
 0x535   :  { %8995 = vrcp.f32 %v5218_v26  ;;  %6793 = vadd.xlane.f32.xlu1 %v12670_v18 }
 0x536   :  { %v12673_v1 = vpop.eup %8979  ;;  %v5224_v9 = vpop.xlane.xlu1 %5223 }
 0x537   :  { %8997 = vrcp.f32 %v5224_v9  ;;  %6791 = vadd.xlane.f32.xlu0 %v12673_v1 }
 0x538   :  { %v12676_v55 = vpop.eup %8981  ;;  %v5222_v41 = vpop.xlane.xlu0 %5221 }
 0x539   :  { %8999 = vrcp.f32 %v5222_v41  ;;  %6797 = vadd.xlane.f32.xlu1 %v12676_v55 }
 0x53a   :  { %v12679_v39 = vpop.eup %8983  ;;  %v5228_v60 = vpop.xlane.xlu1 %5227 }
 0x53b   :  { %9001 = vrcp.f32 %v5228_v60  ;;  %6795 = vadd.xlane.f32.xlu0 %v12679_v39 }
 0x53c   :  { %v12682_v61 = vpop.eup %8985  ;;  %v5226_v23 = vpop.xlane.xlu0 %5225 }
 0x53d   :  { %v8988_v48 = vpop.eup %8987  ;;  %9003 = vrcp.f32 %v5226_v23  ;;  %6801 = vadd.xlane.f32.xlu1 %v12682_v61 }
 0x53e   :  { %v12685_v36 = vpop.eup %8989  ;;  %v5248_v0 = vmul.f32 %v8988_v48, %v12571_v42  ;;  %v5232_v27 = vpop.xlane.xlu1 %5231 }
 0x53f   :  { %v8992_v2 = vpop.eup %8991  ;;  %9005 = vrcp.f32 %v5232_v27  ;;  %6799 = vadd.xlane.f32.xlu0 %v12685_v36 }
 0x540   :  { %v8994_v52 = vpop.eup %8993  ;;  %5278 = vst [vmem:[#allocation2 + $0x8] sm:$0xff] %v5248_v0  ;;  %v5246_v14 = vmul.f32 %v8992_v2, %v12575_v40  ;;  %v5230_v38 = vpop.xlane.xlu0 %5229 }
 0x541   :  { %v5252_v59 = vmul.f32 %v8994_v52, %v12579_v51  ;;  %9007 = vrcp.f32 %v5230_v38 }
 0x542   :  { %v8996_v6 = vpop.eup %8995  ;;  %5277 = vst [vmem:[#allocation2] sm:$0xff] %v5246_v14  ;;  %v5236_v19 = vpop.xlane.xlu1 %5235 }
 0x543   :  { %5280 = vst [vmem:[#allocation2 + $0x18] sm:$0xff] %v5252_v59  ;;  %v5250_v46 = vmul.f32 %v8996_v6, %v12583_v20  ;;  %9009 = vrcp.f32 %v5236_v19 }
 0x544   :  { %v8998_v42 = vpop.eup %8997  ;;  %v5234_v25 = vpop.xlane.xlu0 %5233 }
 0x545   :  { %5279 = vst [vmem:[#allocation2 + $0x10] sm:$0xff] %v5250_v46  ;;  %v5256_v4 = vmul.f32 %v8998_v42, %v12587_v16  ;;  %9011 = vrcp.f32 %v5234_v25 }
 0x546   :  { %v9000_v37 = vpop.eup %8999  ;;  %v5240_v50 = vpop.xlane.xlu1 %5239 }
 0x547   :  { %5282 = vst [vmem:[#allocation2 + $0x28] sm:$0xff] %v5256_v4  ;;  %v5254_v40 = vmul.f32 %v9000_v37, %v12591_v11  ;;  %9013 = vrcp.f32 %v5240_v50 }
 0x548   :  { %v9002_v51 = vpop.eup %9001  ;;  %v5238_v24 = vpop.xlane.xlu0 %5237 }
 0x549   :  { %5281 = vst [vmem:[#allocation2 + $0x20] sm:$0xff] %v5254_v40  ;;  %v5260_v8 = vmul.f32 %v9002_v51, %v12594_v58  ;;  %9015 = vrcp.f32 %v5238_v24 }
 0x54a   :  { %v9004_v20 = vpop.eup %9003  ;;  %v5244_v54 = vpop.xlane.xlu1 %5243 }
 0x54b   :  { %5284 = vst [vmem:[#allocation2 + $0x38] sm:$0xff] %v5260_v8  ;;  %v5258_v56 = vmul.f32 %v9004_v20, %v12597_v3  ;;  %9017 = vrcp.f32 %v5244_v54 }
 0x54c   :  { %v9006_v16 = vpop.eup %9005  ;;  %v5242_v31 = vpop.xlane.xlu0 %5241 }
 0x54d   :  { %5283 = vst [vmem:[#allocation2 + $0x30] sm:$0xff] %v5258_v56  ;;  %v5264_v34 = vmul.f32 %v9006_v16, %v12600_v30  ;;  %9019 = vrcp.f32 %v5242_v31 }
 0x54e   :  { %v9008_v11 = vpop.eup %9007 }
 0x54f   :  { %5286 = vst [vmem:[#allocation2 + $0x48] sm:$0xff] %v5264_v34  ;;  %v5262_v35 = vmul.f32 %v9008_v11, %v12603_v53 }
 0x550   :  { %v9010_v63 = vpop.eup %9009 }
 0x551   :  { %5285 = vst [vmem:[#allocation2 + $0x40] sm:$0xff] %v5262_v35  ;;  %v5268_v58 = vmul.f32 %v9010_v63, %v12606_v33 }
 0x552   :  { %v9012_v5 = vpop.eup %9011 }
 0x553   :  { %5288 = vst [vmem:[#allocation2 + $0x58] sm:$0xff] %v5268_v58  ;;  %v5266_v17 = vmul.f32 %v9012_v5, %v12609_v12 }
 0x554   :  { %v9014_v3 = vpop.eup %9013 }
 0x555   :  { %5287 = vst [vmem:[#allocation2 + $0x50] sm:$0xff] %v5266_v17  ;;  %v5272_v57 = vmul.f32 %v9014_v3, %v12612_v44 }
 0x556   :  { %v9016_v15 = vpop.eup %9015 }
 0x557   :  { %5290 = vst [vmem:[#allocation2 + $0x68] sm:$0xff] %v5272_v57  ;;  %v5270_v30 = vmul.f32 %v9016_v15, %v12615_v49 }
 0x558   :  { %v9018_v26 = vpop.eup %9017 }
 0x559   :  { %5289 = vst [vmem:[#allocation2 + $0x60] sm:$0xff] %v5270_v30  ;;  %v5276_v53 = vmul.f32 %v9018_v26, %v12618_v43 }
 0x55a   :  { %v9020_v9 = vpop.eup %9019 }
 0x55b   :  { %5292 = vst [vmem:[#allocation2 + $0x78] sm:$0xff] %v5276_v53  ;;  %v5274_v33 = vmul.f32 %v9020_v9, %v12621_v45 }
 0x55d   :  { %5291 = vst [vmem:[#allocation2 + $0x70] sm:$0xff] %v5274_v33 }
 0x5aa   :  { %v6774_v41 = vpop.xlane.xlu1 %6773 }
 0x5ab   :  { %9021 = vrcp.f32 %v6774_v41 }
 0x5ac   :  { %v6772_v12 = vpop.xlane.xlu0 %6771 }
 0x5ad   :  { %9023 = vrcp.f32 %v6772_v12 }
 0x5ae   :  { %v6778_v60 = vpop.xlane.xlu1 %6777 }
 0x5af   :  { %9025 = vrcp.f32 %v6778_v60 }
 0x5b0   :  { %v6776_v44 = vpop.xlane.xlu0 %6775 }
 0x5b1   :  { %9027 = vrcp.f32 %v6776_v44 }
 0x5b2   :  { %v6782_v23 = vpop.xlane.xlu1 %6781 }
 0x5b3   :  { %9029 = vrcp.f32 %v6782_v23 }
 0x5b4   :  { %v6780_v49 = vpop.xlane.xlu0 %6779 }
 0x5b5   :  { %9031 = vrcp.f32 %v6780_v49 }
 0x5b6   :  { %v6786_v48 = vpop.xlane.xlu1 %6785 }
 0x5b7   :  { %9033 = vrcp.f32 %v6786_v48 }
 0x5b8   :  { %v9022_v43 = vpop.eup %9021  ;;  %v6784_v0 = vpop.xlane.xlu0 %6783 }
 0x5b9   :  { %v6806_v27 = vmul.f32 %v9022_v43, %v12633_v29  ;;  %9035 = vrcp.f32 %v6784_v0 }
 0x5ba   :  { %v9024_v45 = vpop.eup %9023  ;;  %v6790_v2 = vpop.xlane.xlu1 %6789 }
 0x5bb   :  { %6837 = vst [vmem:[#allocation2 + $0x88] sm:$0xff] %v6806_v27  ;;  %v6804_v52 = vmul.f32 %v9024_v45, %v12637_v21  ;;  %9037 = vrcp.f32 %v6790_v2 }
 0x5bc   :  { %v9026_v14 = vpop.eup %9025  ;;  %v6788_v38 = vpop.xlane.xlu0 %6787 }
 0x5bd   :  { %6836 = vst [vmem:[#allocation2 + $0x80] sm:$0xff] %v6804_v52  ;;  %v6810_v59 = vmul.f32 %v9026_v14, %v12641_v22  ;;  %9039 = vrcp.f32 %v6788_v38 }
 0x5be   :  { %v9028_v6 = vpop.eup %9027  ;;  %v6794_v19 = vpop.xlane.xlu1 %6793 }
 0x5bf   :  { %6839 = vst [vmem:[#allocation2 + $0x98] sm:$0xff] %v6810_v59  ;;  %v6808_v46 = vmul.f32 %v9028_v6, %v12645_v28  ;;  %9041 = vrcp.f32 %v6794_v19 }
 0x5c0   :  { %v9030_v29 = vpop.eup %9029  ;;  %v6792_v42 = vpop.xlane.xlu0 %6791 }
 0x5c1   :  { %6838 = vst [vmem:[#allocation2 + $0x90] sm:$0xff] %v6808_v46  ;;  %v6814_v25 = vmul.f32 %v9030_v29, %v12649_v32  ;;  %9043 = vrcp.f32 %v6792_v42 }
 0x5c2   :  { %v9032_v21 = vpop.eup %9031  ;;  %v6798_v4 = vpop.xlane.xlu1 %6797 }
 0x5c3   :  { %6841 = vst [vmem:[#allocation2 + $0xa8] sm:$0xff] %v6814_v25  ;;  %v6812_v37 = vmul.f32 %v9032_v21, %v12653_v10  ;;  %9045 = vrcp.f32 %v6798_v4 }
 0x5c4   :  { %v9034_v22 = vpop.eup %9033  ;;  %v6796_v50 = vpop.xlane.xlu0 %6795 }
 0x5c5   :  { %6840 = vst [vmem:[#allocation2 + $0xa0] sm:$0xff] %v6812_v37  ;;  %v6818_v40 = vmul.f32 %v9034_v22, %v12657_v47  ;;  %9047 = vrcp.f32 %v6796_v50 }
 0x5c6   :  { %v9036_v28 = vpop.eup %9035  ;;  %v6802_v51 = vpop.xlane.xlu1 %6801 }
 0x5c7   :  { %6843 = vst [vmem:[#allocation2 + $0xb8] sm:$0xff] %v6818_v40  ;;  %v6816_v24 = vmul.f32 %v9036_v28, %v12661_v13  ;;  %9049 = vrcp.f32 %v6802_v51 }
 0x5c8   :  { %v9038_v32 = vpop.eup %9037  ;;  %v6800_v8 = vpop.xlane.xlu0 %6799 }
 0x5c9   :  { %6842 = vst [vmem:[#allocation2 + $0xb0] sm:$0xff] %v6816_v24  ;;  %v6822_v20 = vmul.f32 %v9038_v32, %v12664_v62  ;;  %9051 = vrcp.f32 %v6800_v8 }
 0x5ca   :  { %v9040_v10 = vpop.eup %9039 }
 0x5cb   :  { %6845 = vst [vmem:[#allocation2 + $0xc8] sm:$0xff] %v6822_v20  ;;  %v6820_v54 = vmul.f32 %v9040_v10, %v12667_v7 }
 0x5cc   :  { %v9042_v56 = vpop.eup %9041 }
 0x5cd   :  { %6844 = vst [vmem:[#allocation2 + $0xc0] sm:$0xff] %v6820_v54  ;;  %v6826_v47 = vmul.f32 %v9042_v56, %v12670_v18 }
 0x5ce   :  { %v9044_v16 = vpop.eup %9043 }
 0x5cf   :  { %6847 = vst [vmem:[#allocation2 + $0xd8] sm:$0xff] %v6826_v47  ;;  %v6824_v31 = vmul.f32 %v9044_v16, %v12673_v1 }
 0x5d0   :  { %v9046_v13 = vpop.eup %9045 }
 0x5d1   :  { %6846 = vst [vmem:[#allocation2 + $0xd0] sm:$0xff] %v6824_v31  ;;  %v6830_v34 = vmul.f32 %v9046_v13, %v12676_v55 }
 0x5d2   :  { %v9048_v11 = vpop.eup %9047 }
 0x5d3   :  { %6849 = vst [vmem:[#allocation2 + $0xe8] sm:$0xff] %v6830_v34  ;;  %v6828_v62 = vmul.f32 %v9048_v11, %v12679_v39 }
 0x5d4   :  { %v9050_v35 = vpop.eup %9049 }
 0x5d5   :  { %6848 = vst [vmem:[#allocation2 + $0xe0] sm:$0xff] %v6828_v62  ;;  %v6834_v7 = vmul.f32 %v9050_v35, %v12682_v61 }
 0x5d6   :  { %v9052_v63 = vpop.eup %9051 }
 0x5d7   :  { %6851 = vst [vmem:[#allocation2 + $0xf8] sm:$0xff] %v6834_v7  ;;  %v6832_v18 = vmul.f32 %v9052_v63, %v12685_v36 }
 0x5d9   :  { %6850 = vst [vmem:[#allocation2 + $0xf0] sm:$0xff] %v6832_v18 }
 0x5da   :  { %9065 = shalt.err (!%p9062_p4)
}
 0x5db   :  { %s9077_s13 = smov 128   ;;  %s9078_s14 = smov 8  }
 0x5dc   :  { %6863 = dma.vmem_to_hbm [thread:$0]  %s6858_s11, 4096, %s12728_s5, [#allocation3], %s9077_s13, %s9077_s13, %s9078_s14  }
 0x5dd   :  { %9074 = dma.done.wait [#allocation3], 4096  }
 0x5de   :  { %9075 = vsyncadd [#allocation3], 4294963200 }
 0x5df   :  { %6867 = vsyncpa [#allocation3], 1 }

</bundles_post_ra>
